<compile_context>
chip_gen: v7x
topology: tpu7x:2x2x1
jax: 0.10.0
libtpu: 0.0.40
codegen_flags: <defaults>
</compile_context>

<pallas_src>
import math

import jax
import jax.numpy as jnp
import numpy as np
from jax.experimental import pallas as pl
from jax.experimental.pallas import tpu as pltpu

NUM_CLASSES = 14
OUT_LANES = 128   # lane-dense output slab (padded from 14)
LANE = 128
SUBLANE = 8


def _round_up(x, m):
    return (x + m - 1) // m * m


def _gelu_exact(v):
    # nn.GELU() default (erf-based, not tanh approximation)
    return 0.5 * v * (1.0 + jax.lax.erf(v * jnp.float32(1.0 / math.sqrt(2.0))))


# --------------------------------- kernel ---------------------------------

def moe_classifier_kernel(
    x_ref,
    w1_ref, b1_ref,
    w2_ref, b2_ref,
    w3_ref, b3_ref,
    wg_ref, bg_ref,
    we_ref, be_ref,
    rep_ref, sel_ref,
    out_ref,
):
    cdt = w1_ref.dtype          # MXU operand dtype (bf16 by default, f32 for strict path)

    x = x_ref[...].astype(cdt)

    # ---- trunk: 3x [Linear (BN folded in) -> GELU], f32 accumulation / elementwise ----
    h = jnp.dot(x, w1_ref[...], preferred_element_type=jnp.float32) + b1_ref[...]
    h = _gelu_exact(h)
    h = jnp.dot(h.astype(cdt), w2_ref[...], preferred_element_type=jnp.float32) + b2_ref[...]
    h = _gelu_exact(h)
    h = jnp.dot(h.astype(cdt), w3_ref[...], preferred_element_type=jnp.float32) + b3_ref[...]
    h = _gelu_exact(h)

    hc = h.astype(cdt)

    # ---- gating head: Linear(hidden, M) -> softmax over mixtures (f32) ----
    g = jnp.dot(hc, wg_ref[...], preferred_element_type=jnp.float32) + bg_ref[...]   # (T, M)
    g = g - jnp.max(g, axis=-1, keepdims=True)
    g = jnp.exp(g)
    g = g / jnp.sum(g, axis=-1, keepdims=True)

    # ---- expert head: Linear(hidden, 14*M) ----
    e = jnp.dot(hc, we_ref[...], preferred_element_type=jnp.float32) + be_ref[...]   # (T, 14*M)

    # ---- MoE combine ----
    # Column c*M + m of `e` pairs with gate[:, m].  Replicate the gate across the 14 class
    # groups with a constant 0/1 matmul (MXU, not jnp.tile), multiply, then segmented-sum
    # with a constant (14*M, 128) selector — lane-dense output, no in-kernel reshape.
    g_tiled = jnp.dot(g, rep_ref[...], preferred_element_type=jnp.float32)           # (T, 14*M)
    out_ref[...] = jnp.dot(e * g_tiled, sel_ref[...], preferred_element_type=jnp.float32)


# --------------------------------- wrapper ---------------------------------

def moe_classifier_forward(x, params, *, num_mixtures, compute_dtype=jnp.bfloat16,
                           batch_tile=256):
    B, input_dim = x.shape
    hidden = params["w1"].shape[1]
    M = num_mixtures
    EW = NUM_CLASSES * M

    # --- pad the input feature dim so the x tile is lane-dense ---
    in_p = _round_up(input_dim, LANE)
    w1 = params["w1"]
    if in_p != input_dim:
        x = jnp.pad(x, ((0, 0), (0, in_p - input_dim)))
        w1 = jnp.pad(w1, ((0, in_p - input_dim), (0, 0)))

    # --- batch tiling: big tiles, padded batch, parallel grid axis (megacore / v7x 2-TC) ---
    bt = min(batch_tile, _round_up(B, SUBLANE))
    bt = max(SUBLANE, _round_up(bt, SUBLANE))
    B_p = _round_up(B, bt)
    if B_p != B:
        x = jnp.pad(x, ((0, B_p - B), (0, 0)))
    grid = (B_p // bt,)

    # --- MXU operands in the compute dtype (halves DMA + 2x MXU throughput on v6e/v7x) ---
    cd = compute_dtype
    x = x.astype(cd)
    w1c = w1.astype(cd)
    w2c = params["w2"].astype(cd)
    w3c = params["w3"].astype(cd)
    wgc = params["wg"].astype(cd)
    wec = params["we"].astype(cd)

    # --- constant combine matrices, built once at trace time (not per grid step) ---
    rep = (np.arange(M)[:, None] == (np.arange(EW) % M)[None, :]).astype(np.float32)  # (M, 14*M)
    sel = np.zeros((EW, OUT_LANES), np.float32)                                       # (14*M, 128)
    sel[np.arange(EW), np.arange(EW) // M] = 1.0
    rep = jnp.asarray(rep)
    sel = jnp.asarray(sel)

    full = lambda i: (0, 0)
    in_specs = [
        pl.BlockSpec((bt, in_p), lambda i: (i, 0)),      # x
        pl.BlockSpec((in_p, hidden), full),              # w1 (BN1 folded)
        pl.BlockSpec((1, hidden), full),                 # b1
        pl.BlockSpec((hidden, hidden), full),            # w2 (BN2 folded)
        pl.BlockSpec((1, hidden), full),                 # b2
        pl.BlockSpec((hidden, hidden), full),            # w3 (BN3 folded)
        pl.BlockSpec((1, hidden), full),                 # b3
        pl.BlockSpec((hidden, M), full),                 # wg
        pl.BlockSpec((1, M), full),                      # bg
        pl.BlockSpec((hidden, EW), full),                # we
        pl.BlockSpec((1, EW), full),                     # be
        pl.BlockSpec((M, EW), full),                     # rep
        pl.BlockSpec((EW, OUT_LANES), full),             # sel
    ]
    out_spec = pl.BlockSpec((bt, OUT_LANES), lambda i: (i, 0))

    out = pl.pallas_call(
        moe_classifier_kernel,
        out_shape=jax.ShapeDtypeStruct((B_p, OUT_LANES), jnp.float32),
        grid_spec=pltpu.PrefetchScalarGridSpec(
            num_scalar_prefetch=0,
            grid=grid,
            in_specs=in_specs,
            out_specs=out_spec,
        ),
        compiler_params=pltpu.CompilerParams(
            dimension_semantics=("parallel",),
        ),
    )(x, w1c, params["b1"], w2c, params["b2"], w3c, params["b3"],
      wgc, params["bg"], wec, params["be"], rep, sel)

    return out[:B, :NUM_CLASSES]


# ------------------------- deterministic parameter setup -------------------------

def _kaiming_uniform(key, out_f, in_f):
    # init_weights(): torch.nn.init.kaiming_uniform_ defaults -> bound = sqrt(6 / fan_in)
    bound = math.sqrt(6.0 / in_f)
    w = jax.random.uniform(key, (out_f, in_f), jnp.float32, -bound, bound)
    return w.T  # stored as (in, out) for x @ W


def make_params(key, input_dim, hidden_dim, num_mixtures):
    """Raw parameters matching MoeClassifierModel.init_weights(), eval-mode BN stats."""
    ks = jax.random.split(key, 5)
    zeros_h = jnp.zeros((hidden_dim,), jnp.float32)
    ones_h = jnp.ones((hidden_dim,), jnp.float32)
    bn = dict(gamma=ones_h, beta=zeros_h, mean=zeros_h, var=ones_h)
    return {
        "w1": _kaiming_uniform(ks[0], hidden_dim, input_dim),
        "b1": jnp.zeros((hidden_dim,), jnp.float32), "bn1": bn,
        "w2": _kaiming_uniform(ks[1], hidden_dim, hidden_dim),
        "b2": jnp.zeros((hidden_dim,), jnp.float32), "bn2": bn,
        "w3": _kaiming_uniform(ks[2], hidden_dim, hidden_dim),
        "b3": jnp.zeros((hidden_dim,), jnp.float32), "bn3": bn,
        "wg": _kaiming_uniform(ks[3], num_mixtures, hidden_dim),
        "bg": jnp.zeros((num_mixtures,), jnp.float32),
        "we": _kaiming_uniform(ks[4], NUM_CLASSES * num_mixtures, hidden_dim),
        "be": jnp.zeros((NUM_CLASSES * num_mixtures,), jnp.float32),
    }


def fold_bn(params, eps=1e-5):
    """Fold eval-mode BatchNorm1d into the preceding Linear: (x@w + b)*s + t == x@(w*s) + (b*s + t)."""
    out = {}
    for i in (1, 2, 3):
        w, b, bn = params[f"w{i}"], params[f"b{i}"], params[f"bn{i}"]
        s = bn["gamma"] / jnp.sqrt(bn["var"] + eps)
        t = bn["beta"] - bn["mean"] * s
        out[f"w{i}"] = w * s[None, :]
        out[f"b{i}"] = (b * s + t)[None, :]
    out["wg"] = params["wg"]
    out["bg"] = params["bg"][None, :]
    out["we"] = params["we"]
    out["be"] = params["be"][None, :]
    return out


def reference_forward(x, p, num_mixtures, compute_dtype=jnp.float32):
    cd = compute_dtype

    def dense(h, w, b):
        return jnp.dot(h.astype(cd), w.astype(cd), preferred_element_type=jnp.float32) + b

    h = _gelu_exact(dense(x, p["w1"], p["b1"]))
    h = _gelu_exact(dense(h, p["w2"], p["b2"]))
    h = _gelu_exact(dense(h, p["w3"], p["b3"]))
    gate = jax.nn.softmax(dense(h, p["wg"], p["bg"]), axis=-1)                  # (B, M)
    expert = dense(h, p["we"], p["be"]).reshape(-1, NUM_CLASSES, num_mixtures)  # (B, 14, M)
    return (expert * gate[:, None, :]).sum(axis=-1)                             # (B, 14)


if __name__ == "__main__":
    # Small shapes consistent with the module's forward: x is (batch, input_dim).
    B, INPUT_DIM, HIDDEN, M = 512, 32, 128, 4

    key = jax.random.PRNGKey(0)
    k_x, k_p = jax.random.split(key)
    x = jax.random.normal(k_x, (B, INPUT_DIM), jnp.float32)
    raw = make_params(k_p, INPUT_DIM, HIDDEN, M)
    folded = fold_bn(raw)

    # TODO(synk): Dropout is stochastic in train mode; eval-mode (identity) semantics are used here.

    # f32 path: strict check against the exact-erf f32 reference.
    out_f32 = jax.block_until_ready(
        moe_classifier_forward(x, folded, num_mixtures=M,
                               compute_dtype=jnp.float32, batch_tile=256))
    ref_f32 = reference_forward(x, folded, M, compute_dtype=jnp.float32)
    assert out_f32.shape == (B, NUM_CLASSES)
    np.testing.assert_allclose(np.asarray(out_f32), np.asarray(ref_f32), atol=1e-4, rtol=1e-4)

    # default bf16-MXU path: checked against a reference using the same bf16 quantization.
    out_bf16 = jax.block_until_ready(
        moe_classifier_forward(x, folded, num_mixtures=M, batch_tile=256))
    ref_bf16 = reference_forward(x, folded, M, compute_dtype=jnp.bfloat16)
    assert out_bf16.shape == (B, NUM_CLASSES)
    np.testing.assert_allclose(np.asarray(out_bf16), np.asarray(ref_bf16), atol=1e-2, rtol=1e-2)

    print("KERNEL_OK")
</pallas_src>

<mosaic_0001>
module attributes {stable_mosaic.version = 11 : i64} {
  func.func @moe_classifier_kernel(%arg0: i32, %arg1: memref<256x128xf32, #tpu.memory_space<vmem>>, %arg2: memref<128x128xf32, #tpu.memory_space<vmem>>, %arg3: memref<1x128xf32, #tpu.memory_space<vmem>>, %arg4: memref<128x128xf32, #tpu.memory_space<vmem>>, %arg5: memref<1x128xf32, #tpu.memory_space<vmem>>, %arg6: memref<128x128xf32, #tpu.memory_space<vmem>>, %arg7: memref<1x128xf32, #tpu.memory_space<vmem>>, %arg8: memref<128x4xf32, #tpu.memory_space<vmem>>, %arg9: memref<1x4xf32, #tpu.memory_space<vmem>>, %arg10: memref<128x56xf32, #tpu.memory_space<vmem>>, %arg11: memref<1x56xf32, #tpu.memory_space<vmem>>, %arg12: memref<4x56xf32, #tpu.memory_space<vmem>>, %arg13: memref<56x128xf32, #tpu.memory_space<vmem>>, %arg14: memref<256x128xf32, #tpu.memory_space<vmem>>) attributes {dimension_semantics = [#tpu.dimension_semantics<parallel>], iteration_bounds = array<i64: 2>, scalar_prefetch = 0 : i64, scratch_operands = 0 : i64, tpu.core_type = #tpu.core_type<tc>, window_params = [{transform_indices = @transform_0, window_bounds = array<i64: 256, 128>}, {pipeline_mode = #tpu.pipeline_mode<synchronous>, transform_indices = @transform_1, window_bounds = array<i64: 128, 128>}, {pipeline_mode = #tpu.pipeline_mode<synchronous>, transform_indices = @transform_2, window_bounds = array<i64: 1, 128>}, {pipeline_mode = #tpu.pipeline_mode<synchronous>, transform_indices = @transform_3, window_bounds = array<i64: 128, 128>}, {pipeline_mode = #tpu.pipeline_mode<synchronous>, transform_indices = @transform_4, window_bounds = array<i64: 1, 128>}, {pipeline_mode = #tpu.pipeline_mode<synchronous>, transform_indices = @transform_5, window_bounds = array<i64: 128, 128>}, {pipeline_mode = #tpu.pipeline_mode<synchronous>, transform_indices = @transform_6, window_bounds = array<i64: 1, 128>}, {pipeline_mode = #tpu.pipeline_mode<synchronous>, transform_indices = @transform_7, window_bounds = array<i64: 128, 4>}, {pipeline_mode = #tpu.pipeline_mode<synchronous>, transform_indices = @transform_8, window_bounds = array<i64: 1, 4>}, {pipeline_mode = #tpu.pipeline_mode<synchronous>, transform_indices = @transform_9, window_bounds = array<i64: 128, 56>}, {pipeline_mode = #tpu.pipeline_mode<synchronous>, transform_indices = @transform_10, window_bounds = array<i64: 1, 56>}, {pipeline_mode = #tpu.pipeline_mode<synchronous>, transform_indices = @transform_11, window_bounds = array<i64: 4, 56>}, {pipeline_mode = #tpu.pipeline_mode<synchronous>, transform_indices = @transform_12, window_bounds = array<i64: 56, 128>}, {transform_indices = @transform_13, window_bounds = array<i64: 256, 128>}]} {
    %c0 = arith.constant 0 : index
    %c0_0 = arith.constant 0 : index
    %0 = vector.load %arg1[%c0, %c0_0] : memref<256x128xf32, #tpu.memory_space<vmem>>, vector<256x128xf32>
    %c0_1 = arith.constant 0 : index
    %c0_2 = arith.constant 0 : index
    %1 = vector.load %arg2[%c0_1, %c0_2] : memref<128x128xf32, #tpu.memory_space<vmem>>, vector<128x128xf32>
    %cst = arith.constant dense<0.000000e+00> : vector<256x128xf32>
    %2 = tpu.matmul %0, %1, %cst {dimension_numbers = #tpu.dot_dimension_numbers<[1], [0], [0], [1], [0, 0, 1, 1], [], []>} : vector<256x128xf32>, vector<128x128xf32>, vector<256x128xf32> -> vector<256x128xf32>
    %c0_3 = arith.constant 0 : index
    %c0_4 = arith.constant 0 : index
    %3 = vector.load %arg3[%c0_3, %c0_4] : memref<1x128xf32, #tpu.memory_space<vmem>>, vector<1x128xf32>
    %4 = vector.broadcast %3 : vector<1x128xf32> to vector<256x128xf32>
    %5 = arith.addf %2, %4 : vector<256x128xf32>
    %cst_5 = arith.constant 5.000000e-01 : f32
    %6 = vector.broadcast %cst_5 : f32 to vector<256x128xf32>
    %7 = arith.mulf %6, %5 : vector<256x128xf32>
    %cst_6 = arith.constant 0.707106769 : f32
    %8 = vector.broadcast %cst_6 : f32 to vector<256x128xf32>
    %9 = arith.mulf %5, %8 : vector<256x128xf32>
    %10 = math.erf %9 : vector<256x128xf32>
    %cst_7 = arith.constant 1.000000e+00 : f32
    %11 = vector.broadcast %cst_7 : f32 to vector<256x128xf32>
    %12 = arith.addf %11, %10 : vector<256x128xf32>
    %13 = arith.mulf %7, %12 : vector<256x128xf32>
    %c0_8 = arith.constant 0 : index
    %c0_9 = arith.constant 0 : index
    %14 = vector.load %arg4[%c0_8, %c0_9] : memref<128x128xf32, #tpu.memory_space<vmem>>, vector<128x128xf32>
    %cst_10 = arith.constant dense<0.000000e+00> : vector<256x128xf32>
    %15 = tpu.matmul %13, %14, %cst_10 {dimension_numbers = #tpu.dot_dimension_numbers<[1], [0], [0], [1], [0, 0, 1, 1], [], []>} : vector<256x128xf32>, vector<128x128xf32>, vector<256x128xf32> -> vector<256x128xf32>
    %c0_11 = arith.constant 0 : index
    %c0_12 = arith.constant 0 : index
    %16 = vector.load %arg5[%c0_11, %c0_12] : memref<1x128xf32, #tpu.memory_space<vmem>>, vector<1x128xf32>
    %17 = vector.broadcast %16 : vector<1x128xf32> to vector<256x128xf32>
    %18 = arith.addf %15, %17 : vector<256x128xf32>
    %cst_13 = arith.constant 5.000000e-01 : f32
    %19 = vector.broadcast %cst_13 : f32 to vector<256x128xf32>
    %20 = arith.mulf %19, %18 : vector<256x128xf32>
    %cst_14 = arith.constant 0.707106769 : f32
    %21 = vector.broadcast %cst_14 : f32 to vector<256x128xf32>
    %22 = arith.mulf %18, %21 : vector<256x128xf32>
    %23 = math.erf %22 : vector<256x128xf32>
    %cst_15 = arith.constant 1.000000e+00 : f32
    %24 = vector.broadcast %cst_15 : f32 to vector<256x128xf32>
    %25 = arith.addf %24, %23 : vector<256x128xf32>
    %26 = arith.mulf %20, %25 : vector<256x128xf32>
    %c0_16 = arith.constant 0 : index
    %c0_17 = arith.constant 0 : index
    %27 = vector.load %arg6[%c0_16, %c0_17] : memref<128x128xf32, #tpu.memory_space<vmem>>, vector<128x128xf32>
    %cst_18 = arith.constant dense<0.000000e+00> : vector<256x128xf32>
    %28 = tpu.matmul %26, %27, %cst_18 {dimension_numbers = #tpu.dot_dimension_numbers<[1], [0], [0], [1], [0, 0, 1, 1], [], []>} : vector<256x128xf32>, vector<128x128xf32>, vector<256x128xf32> -> vector<256x128xf32>
    %c0_19 = arith.constant 0 : index
    %c0_20 = arith.constant 0 : index
    %29 = vector.load %arg7[%c0_19, %c0_20] : memref<1x128xf32, #tpu.memory_space<vmem>>, vector<1x128xf32>
    %30 = vector.broadcast %29 : vector<1x128xf32> to vector<256x128xf32>
    %31 = arith.addf %28, %30 : vector<256x128xf32>
    %cst_21 = arith.constant 5.000000e-01 : f32
    %32 = vector.broadcast %cst_21 : f32 to vector<256x128xf32>
    %33 = arith.mulf %32, %31 : vector<256x128xf32>
    %cst_22 = arith.constant 0.707106769 : f32
    %34 = vector.broadcast %cst_22 : f32 to vector<256x128xf32>
    %35 = arith.mulf %31, %34 : vector<256x128xf32>
    %36 = math.erf %35 : vector<256x128xf32>
    %cst_23 = arith.constant 1.000000e+00 : f32
    %37 = vector.broadcast %cst_23 : f32 to vector<256x128xf32>
    %38 = arith.addf %37, %36 : vector<256x128xf32>
    %39 = arith.mulf %33, %38 : vector<256x128xf32>
    %c0_24 = arith.constant 0 : index
    %c0_25 = arith.constant 0 : index
    %40 = vector.load %arg8[%c0_24, %c0_25] : memref<128x4xf32, #tpu.memory_space<vmem>>, vector<128x4xf32>
    %cst_26 = arith.constant dense<0.000000e+00> : vector<256x4xf32>
    %41 = tpu.matmul %39, %40, %cst_26 {dimension_numbers = #tpu.dot_dimension_numbers<[1], [0], [0], [1], [0, 0, 1, 1], [], []>} : vector<256x128xf32>, vector<128x4xf32>, vector<256x4xf32> -> vector<256x4xf32>
    %c0_27 = arith.constant 0 : index
    %c0_28 = arith.constant 0 : index
    %42 = vector.load %arg9[%c0_27, %c0_28] : memref<1x4xf32, #tpu.memory_space<vmem>>, vector<1x4xf32>
    %43 = vector.broadcast %42 : vector<1x4xf32> to vector<256x4xf32>
    %44 = arith.addf %41, %43 : vector<256x4xf32>
    %cst_29 = arith.constant dense<0xFF800000> : vector<256xf32>
    %45 = vector.multi_reduction <maximumf>, %44, %cst_29 [1] : vector<256x4xf32> to vector<256xf32>
    %46 = vector.shape_cast %45 : vector<256xf32> to vector<256x1xf32>
    %47 = vector.broadcast %46 : vector<256x1xf32> to vector<256x4xf32>
    %48 = arith.subf %44, %47 : vector<256x4xf32>
    %49 = math.exp %48 : vector<256x4xf32>
    %cst_30 = arith.constant dense<0.000000e+00> : vector<256xf32>
    %50 = vector.multi_reduction <add>, %49, %cst_30 [1] : vector<256x4xf32> to vector<256xf32>
    %51 = vector.shape_cast %50 : vector<256xf32> to vector<256x1xf32>
    %52 = vector.broadcast %51 : vector<256x1xf32> to vector<256x4xf32>
    %53 = arith.divf %49, %52 : vector<256x4xf32>
    %c0_31 = arith.constant 0 : index
    %c0_32 = arith.constant 0 : index
    %54 = vector.load %arg10[%c0_31, %c0_32] : memref<128x56xf32, #tpu.memory_space<vmem>>, vector<128x56xf32>
    %cst_33 = arith.constant dense<0.000000e+00> : vector<256x56xf32>
    %55 = tpu.matmul %39, %54, %cst_33 {dimension_numbers = #tpu.dot_dimension_numbers<[1], [0], [0], [1], [0, 0, 1, 1], [], []>} : vector<256x128xf32>, vector<128x56xf32>, vector<256x56xf32> -> vector<256x56xf32>
    %c0_34 = arith.constant 0 : index
    %c0_35 = arith.constant 0 : index
    %56 = vector.load %arg11[%c0_34, %c0_35] : memref<1x56xf32, #tpu.memory_space<vmem>>, vector<1x56xf32>
    %57 = vector.broadcast %56 : vector<1x56xf32> to vector<256x56xf32>
    %58 = arith.addf %55, %57 : vector<256x56xf32>
    %c0_36 = arith.constant 0 : index
    %c0_37 = arith.constant 0 : index
    %59 = vector.load %arg12[%c0_36, %c0_37] : memref<4x56xf32, #tpu.memory_space<vmem>>, vector<4x56xf32>
    %cst_38 = arith.constant dense<0.000000e+00> : vector<256x56xf32>
    %60 = tpu.matmul %53, %59, %cst_38 {dimension_numbers = #tpu.dot_dimension_numbers<[1], [0], [0], [1], [0, 0, 1, 1], [], []>} : vector<256x4xf32>, vector<4x56xf32>, vector<256x56xf32> -> vector<256x56xf32>
    %61 = arith.mulf %58, %60 : vector<256x56xf32>
    %c0_39 = arith.constant 0 : index
    %c0_40 = arith.constant 0 : index
    %62 = vector.load %arg13[%c0_39, %c0_40] : memref<56x128xf32, #tpu.memory_space<vmem>>, vector<56x128xf32>
    %cst_41 = arith.constant dense<0.000000e+00> : vector<256x128xf32>
    %63 = tpu.matmul %61, %62, %cst_41 {dimension_numbers = #tpu.dot_dimension_numbers<[1], [0], [0], [1], [0, 0, 1, 1], [], []>} : vector<256x56xf32>, vector<56x128xf32>, vector<256x128xf32> -> vector<256x128xf32>
    %c0_42 = arith.constant 0 : index
    %c0_43 = arith.constant 0 : index
    %64 = vector.load %arg14[%c0_42, %c0_43] : memref<256x128xf32, #tpu.memory_space<vmem>>, vector<256x128xf32>
    tpu.vector_store %arg14[%c0_42, %c0_43], %63 {strides = array<i32>} : memref<256x128xf32, #tpu.memory_space<vmem>>, vector<256x128xf32>,
    return
  }
  func.func @transform_0(%arg0: i32) -> (i32, i32) {
    %c0_i32 = arith.constant 0 : i32
    %c0_i32_0 = arith.constant 0 : i32
    return %arg0, %c0_i32 : i32, i32
  }
  func.func @transform_1(%arg0: i32) -> (i32, i32) {
    %c0_i32 = arith.constant 0 : i32
    %c0_i32_0 = arith.constant 0 : i32
    %c0_i32_1 = arith.constant 0 : i32
    return %c0_i32, %c0_i32_0 : i32, i32
  }
  func.func @transform_2(%arg0: i32) -> (i32, i32) {
    %c0_i32 = arith.constant 0 : i32
    %c0_i32_0 = arith.constant 0 : i32
    %c0_i32_1 = arith.constant 0 : i32
    return %c0_i32, %c0_i32_0 : i32, i32
  }
  func.func @transform_3(%arg0: i32) -> (i32, i32) {
    %c0_i32 = arith.constant 0 : i32
    %c0_i32_0 = arith.constant 0 : i32
    %c0_i32_1 = arith.constant 0 : i32
    return %c0_i32, %c0_i32_0 : i32, i32
  }
  func.func @transform_4(%arg0: i32) -> (i32, i32) {
    %c0_i32 = arith.constant 0 : i32
    %c0_i32_0 = arith.constant 0 : i32
    %c0_i32_1 = arith.constant 0 : i32
    return %c0_i32, %c0_i32_0 : i32, i32
  }
  func.func @transform_5(%arg0: i32) -> (i32, i32) {
    %c0_i32 = arith.constant 0 : i32
    %c0_i32_0 = arith.constant 0 : i32
    %c0_i32_1 = arith.constant 0 : i32
    return %c0_i32, %c0_i32_0 : i32, i32
  }
  func.func @transform_6(%arg0: i32) -> (i32, i32) {
    %c0_i32 = arith.constant 0 : i32
    %c0_i32_0 = arith.constant 0 : i32
    %c0_i32_1 = arith.constant 0 : i32
    return %c0_i32, %c0_i32_0 : i32, i32
  }
  func.func @transform_7(%arg0: i32) -> (i32, i32) {
    %c0_i32 = arith.constant 0 : i32
    %c0_i32_0 = arith.constant 0 : i32
    %c0_i32_1 = arith.constant 0 : i32
    return %c0_i32, %c0_i32_0 : i32, i32
  }
  func.func @transform_8(%arg0: i32) -> (i32, i32) {
    %c0_i32 = arith.constant 0 : i32
    %c0_i32_0 = arith.constant 0 : i32
    %c0_i32_1 = arith.constant 0 : i32
    return %c0_i32, %c0_i32_0 : i32, i32
  }
  func.func @transform_9(%arg0: i32) -> (i32, i32) {
    %c0_i32 = arith.constant 0 : i32
    %c0_i32_0 = arith.constant 0 : i32
    %c0_i32_1 = arith.constant 0 : i32
    return %c0_i32, %c0_i32_0 : i32, i32
  }
  func.func @transform_10(%arg0: i32) -> (i32, i32) {
    %c0_i32 = arith.constant 0 : i32
    %c0_i32_0 = arith.constant 0 : i32
    %c0_i32_1 = arith.constant 0 : i32
    return %c0_i32, %c0_i32_0 : i32, i32
  }
  func.func @transform_11(%arg0: i32) -> (i32, i32) {
    %c0_i32 = arith.constant 0 : i32
    %c0_i32_0 = arith.constant 0 : i32
    %c0_i32_1 = arith.constant 0 : i32
    return %c0_i32, %c0_i32_0 : i32, i32
  }
  func.func @transform_12(%arg0: i32) -> (i32, i32) {
    %c0_i32 = arith.constant 0 : i32
    %c0_i32_0 = arith.constant 0 : i32
    %c0_i32_1 = arith.constant 0 : i32
    return %c0_i32, %c0_i32_0 : i32, i32
  }
  func.func @transform_13(%arg0: i32) -> (i32, i32) {
    %c0_i32 = arith.constant 0 : i32
    %c0_i32_0 = arith.constant 0 : i32
    return %arg0, %c0_i32 : i32, i32
  }
}

</mosaic_0001>

<bundles_post_ra>
// kernel: tpu_custom_call.1
= control target key start
LH: loop header
LB: loop body
LE: loop exit
PB: predicated region body
PF: predicated region fallthrough
CT: control target
= control target key end

     0   :  { %s6650_s0 = inlined_call_operand.hbm [shape: f32[512,128], index: 0, kind: input, shape index: {}]   ;;  %s6651_s1 = inlined_call_operand.vmem [shape: f32[128,128], index: 1, kind: input, shape index: {}]   ;;  %s6652_s2 = inlined_call_operand.vmem [shape: f32[1,128], index: 2, kind: input, shape index: {}]   ;;  %s6653_s3 = inlined_call_operand.vmem [shape: f32[128,128], index: 3, kind: input, shape index: {}]   ;;  %s6654_s4 = inlined_call_operand.vmem [shape: f32[1,128], index: 4, kind: input, shape index: {}]   ;;  %s6655_s5 = inlined_call_operand.hbm [shape: f32[128,128], index: 5, kind: input, shape index: {}]   ;;  %s6656_s6 = inlined_call_operand.vmem [shape: f32[1,128], index: 6, kind: input, shape index: {}]   ;;  %s6657_s7 = inlined_call_operand.vmem [shape: f32[128,4], index: 7, kind: input, shape index: {}]   ;;  %s6658_s8 = inlined_call_operand.vmem [shape: f32[1,4], index: 8, kind: input, shape index: {}]   ;;  %s6659_s9 = inlined_call_operand.vmem [shape: f32[128,56], index: 9, kind: input, shape index: {}]   ;;  %s6660_s10 = inlined_call_operand.vmem [shape: f32[1,56], index: 10, kind: input, shape index: {}]   ;;  %s6661_s11 = inlined_call_operand.vmem [shape: f32[4,56], index: 11, kind: input, shape index: {}]   ;;  %s6662_s12 = inlined_call_operand.hbm [shape: f32[56,128], index: 12, kind: input, shape index: {}]   ;;  %s6663_s13 = inlined_call_operand.hbm [shape: f32[512,128], index: 13, kind: output, shape index: {}]  }
   0x1   :  { %6672 = sst [smem:[#allocation28_spill]] %s6660_s10 }
   0x2   :  { %6673 = sst [smem:[#allocation29_spill]] %s6661_s11 }
   0x3   :  { %6674 = sst [smem:[#allocation30_spill]] %s6663_s13 }
   0x4   :  { %18 = vsyncpa [#allocation3], 0 }
   0x5   :  { %20 = vsyncpa [#allocation3 + $0x1], 0 }
   0x6   :  { %21 = vsyncpa [#allocation6], 0 }
   0x7   :  { %22 = vsyncpa [#allocation4], 0 }
   0x8   :  { %24 = vsyncpa [#allocation4 + $0x1], 0  ;;  %s5149_s25 = smov 0   ;;  %s5151_s26 = smov 0  }
   0x9   :  { %s5153_s27 = smov 0   ;;  %s5155_s28 = smov 0  }
   0xa LB: > { %6675 = sst [smem:[#allocation12_spill]] %s5057_s25  ;;  %s5170_s29 = sadd.s32 4294967295, %s5069_s28   ;;  %s5069_s28 = sphi %s5155_s28, %s6728_s28   ;;  %s5065_s27 = sphi %s5153_s27, %s6727_s27   ;;  %s5061_s26 = sphi %s5151_s26, %s6726_s26   ;;  %s5057_s25 = sphi %s5149_s25, %s6725_s25  }
   0xb   : > { %s3420_s30 = sadd.s32 4294967294, %s5069_s28   ;;  %p50_p0 = scmp.ne.s32.totalorder %s5061_s26, %s5057_s25 }
   0xc   : > { %p6666_p1 = scmp.eq.s32.totalorder %s5170_s29, 0  ;;  %p332_p3 = scmp.eq.s32.totalorder %s3420_s30, 1 }
   0xd   : > { %p3421_p5 = scmp.ge.s32.totalorder %s5069_s28, 1  ;;  %p339_p7 = scmp.lt.s32.totalorder %s5069_s28, 3 }
   0xe   : > { %p5179_p4 = por %p6666_p1, %p50_p0  ;;  %p5184_p6 = por %p332_p3, %p50_p0 }
   0xf   : > { %p5189_p8 = pnand %p3421_p5, %p339_p7  ;;  %s5071_s17 = smov [#allocation5]  }
  0x10   : > { %s6676_s14 = scalar_select %p5179_p4, 1, 0 }
  0x11   : > { %s6677_s15 = scalar_select %p5184_p6, 1, 0 }
  0x12   : > { %s363_s18 = sshll.u32 %s5071_s17, 4  ;;  %p4534_p9 = pneg %p5189_p8  ;;  %s5193_s18 = int_to_ptr.vmem [resolvable:$true] %s363_s18 }
  0x13   : > { %6678 = sst [smem:[#allocation13_spill]] %s6677_s15  ;;  %s5072_s20 = smov [#allocation7]  }
  0x14   : > { %p5200_p11 = pnand %p4534_p9, %p6666_p1  ;;  %s394_s21 = sshll.u32 %s5072_s20, 4  ;;  %s5204_s21 = int_to_ptr.vmem [resolvable:$true] %s394_s21 }
  0x15   : > { %s4913_s24 = scalar_lea.hbm %s6655_s5, 2048 }
  0x16   : > { %p4914_p12 = scmp.ne.s32.totalorder %s6655_s5, %s4913_s24  ;;  %p4915_p13 = pneg %p5200_p11 }
  0x17   : > { %p4920_p5 = scmp.lt.u32.totalorder %s4913_s24, %s6655_s5 }
  0x18   : > { %p4916_p0 = pnand %p4915_p13, %p4914_p12 }
  0x1a   : > { %p4917_p3 = pneg %p4916_p0 }
  0x1c   : > { %p4922_p7 = pnand %p4920_p5, %p4917_p3 }
  0x1e   : > { %4925 = shalt.err (!%p4922_p7)
}
  0x1f   : > { %s4926_s20 = scalar_lea.vmem %s5193_s18, 2048  ;;  %p4934_p2 = scmp.lt.s32.totalorder %s5193_s18, %s5193_s18 }
  0x20   : > { %p4927_p9 = scmp.ne.s32.totalorder %s5193_s18, %s4926_s20  ;;  %p4935_p12 = scmp.lt.s32.totalorder %s4926_s20, %s4926_s20 }
  0x22   : > { %p4929_p10 = pnand %p4927_p9, %p4915_p13  ;;  %p4936_p0 = por %p4935_p12, %p4934_p2 }
  0x24   : > { %p4930_p1 = pneg %p4929_p10 }
  0x26   : > { %p4937_p6 = pnand %p4936_p0, %p4930_p1 }
  0x28   : > { %4940 = shalt.err (!%p4937_p6)
}
  0x29   : > { %s6668_s25 = smov 128   ;;  %s6669_s15 = smov 8  }
  0x2a   : > { %4537 = dma.hbm_to_vmem [thread:$0]  (!%p5200_p11), %s6655_s5, 2048, %s5193_s18, [#allocation6], %s6668_s25, %s6668_s25, %s6669_s15  }
  0x2b   : > { %s4941_s17 = scalar_lea.hbm %s6662_s12, 896 }
  0x2c   : > { %p4942_p1 = scmp.ne.s32.totalorder %s6662_s12, %s4941_s17  ;;  %p4948_p10 = scmp.lt.u32.totalorder %s4941_s17, %s6662_s12 }
  0x2e   : > { %p4944_p2 = pnand %p4942_p1, %p4915_p13 }
  0x30   : > { %p4945_p6 = pneg %p4944_p2 }
  0x32   : > { %p4950_p3 = pnand %p4948_p10, %p4945_p6 }
  0x34   : > { %4953 = shalt.err (!%p4950_p3)
}
  0x35   : > { %s4954_s18 = scalar_lea.vmem %s5204_s21, 896  ;;  %p4962_p12 = scmp.lt.s32.totalorder %s5204_s21, %s5204_s21 }
  0x36   : > { %p4955_p5 = scmp.ne.s32.totalorder %s5204_s21, %s4954_s18  ;;  %p4963_p0 = scmp.lt.s32.totalorder %s4954_s18, %s4954_s18 }
  0x38   : > { %p4957_p7 = pnand %p4955_p5, %p4915_p13  ;;  %p4964_p1 = por %p4963_p0, %p4962_p12 }
  0x3a   : > { %p4958_p9 = pneg %p4957_p7 }
  0x3c   : > { %p4965_p2 = pnand %p4964_p1, %p4958_p9 }
  0x3e   : > { %4968 = shalt.err (!%p4965_p2)
}
  0x3f   : > { %4540 = dma.hbm_to_vmem [thread:$0]  (!%p5200_p11), %s6662_s12, 896, %s5204_s21, [#allocation6], %s6668_s25, %s6668_s25, %s6669_s15  }
  0x40   : > { %s5265_s13 = sadd.s32 1, %s5069_s28   ;;  %s37_s19 = sadd.s32 1, %s5065_s27 }
  0x41   : > { %s34_s22 = ssub.s32 %s5069_s28, %s5265_s13  ;;  %p44_p13 = scmp.ne.s32.totalorder %s5065_s27, %s5061_s26 }
  0x42   : > { %p35_p6 = scmp.eq.s32.totalorder %s34_s22, 0  ;;  %p45_p10 = scmp.eq.s32.totalorder %s5069_s28, 0 }
  0x43   : > { %p6681_p3 = scmp.eq.s32.totalorder %s5170_s29, 1  ;;  %p4551_p7 = scmp.lt.s32.totalorder %s5069_s28, 2 }
  0x44   : > { %s5281_s24 = scalar_select %p35_p6, %s5065_s27, %s37_s19  }
  0x45   : > { %p5275_p5 = por %p6681_p3, %p44_p13  ;;  %p46_p9 = por %p45_p10, %p44_p13 }
  0x46   : > { %s408_s30 = sand.u32 1, %s5065_s27   ;;  %s3508_s21 = sshll.u32 %s5069_s28, 12 }
  0x47   : > { %s6682_s23 = scalar_select %p5275_p5, 1, 0 }
  0x48   : > { %s3425_s17 = sshll.u32 %s408_s30, 8  ;;  %s5288_s10 = scalar_lea.hbm %s6650_s0, %s3508_s21 }
  0x49   : > { %s412_s11 = scalar_lea.vmem [#allocation2], %s3425_s17  ;;  %p5292_p11 = pnand %p4551_p7, %p46_p9 }
  0x4a   : > { %s419_s22 = sshll.u32 %s412_s11, 4  ;;  %s5296_s25 = scalar_lea.sflag [#allocation3], %s408_s30  ;;  %s5290_s22 = int_to_ptr.vmem [resolvable:$true] %s419_s22 }
  0x4b   : > { %s4969_s15 = scalar_lea.hbm %s5288_s10, 4096  ;;  %p4971_p0 = pneg %p5292_p11 }
  0x4c   : > { %p4970_p12 = scmp.ne.s32.totalorder %s5288_s10, %s4969_s15  ;;  %s4974_s20 = scalar_lea.hbm %s6650_s0, 8192 }
  0x4d   : > { %p4975_p13 = scmp.lt.u32.totalorder %s5288_s10, %s6650_s0  ;;  %p4976_p6 = scmp.lt.u32.totalorder %s4974_s20, %s4969_s15 }
  0x4e   : > { %p4972_p1 = pnand %p4971_p0, %p4970_p12  ;;  %p4978_p3 = scmp.lt.u32.totalorder %s4969_s15, %s5288_s10 }
  0x4f   : > { %p4977_p10 = por %p4976_p6, %p4975_p13 }
  0x50   : > { %p4973_p2 = pneg %p4972_p1 }
  0x51   : > { %p4979_p7 = por %p4978_p3, %p4977_p10 }
  0x53   : > { %p4980_p9 = pnand %p4979_p7, %p4973_p2 }
  0x55   : > { %4983 = shalt.err (!%p4980_p9)
}
  0x56   : > { %s4984_s30 = scalar_lea.vmem %s5290_s22, 4096  ;;  %s5075_s17 = smov [#allocation2]  }
  0x57   : > { %p4985_p12 = scmp.ne.s32.totalorder %s5290_s22, %s4984_s30  ;;  %s4989_s21 = sshll.u32 %s5075_s17, 4  ;;  %s4990_s21 = int_to_ptr.vmem [resolvable:$false] %s4989_s21 }
  0x58   : > { %s4991_s18 = scalar_lea.vmem %s4990_s21, 8192  ;;  %p4992_p4 = scmp.lt.s32.totalorder %s5290_s22, %s4990_s21 }
  0x59   : > { %p4987_p1 = pnand %p4985_p12, %p4971_p0  ;;  %p4993_p13 = scmp.lt.s32.totalorder %s4991_s18, %s4984_s30 }
  0x5b   : > { %p4988_p5 = pneg %p4987_p1  ;;  %p4994_p6 = por %p4993_p13, %p4992_p4 }
  0x5d   : > { %p4995_p10 = pnand %p4994_p6, %p4988_p5 }
  0x5f   : > { %4998 = shalt.err (!%p4995_p10)
}
  0x60   : > { %s6684_s15 = smov 8   ;;  %s6685_s20 = smov 128  }
  0x61   : > { %4544 = dma.hbm_to_vmem [thread:$0]  (!%p5292_p11), %s5288_s10, 4096, %s5290_s22, %s5296_s25, %s6685_s20, %s6685_s20, %s6684_s15  }
  0x62   : > { %431 = sbr.rel (%p5189_p8) target bundleno = 1884 (0x75c), region = 72 }
  0x69   : > { %s5330_s11 = sand.u32 1, %s5061_s26   ;;  %p6686_p4 = scmp.ne.s32.totalorder %s6676_s14, 0 }
  0x6a   : > { %s3429_s30 = sshll.u32 %s5330_s11, 8  ;;  %s434_s17 = scalar_lea.sflag [#allocation3], %s5330_s11 }
  0x6b   : > { %s5336_s19 = scalar_lea.vmem [#allocation2], %s3429_s30 }
  0x6c   : > { %5044 = dma.done.wait (%p6686_p4), %s434_s17, 4096  }
  0x6d   : > { %5046 = vsyncadd (%p6686_p4), %s434_s17, 4294963200  ;;  %p6687_p5 = scmp.eq.s32.totalorder %s5170_s29, 0 }
  0x6f   : > { %5048 = dma.done.wait (%p6687_p5), [#allocation6], 2944   ;;  %p6688_p8 = pmov %p6687_p5 }
  0x70   : > { %v522_v0 = vld [vmem:[%s6651_s1] sm:$0xff]  ;;  %v523_v1 = vld [vmem:[%s6651_s1 + $0x8] sm:$0xff]  ;;  %v524_v2 = vld [vmem:[%s6651_s1 + $0x10] sm:$0xff]  ;;  %vm1994_vm0 = vcmask 31744   ;;  %s6703_s16 = sld [smem:[#allocation29_spill]]  ;;  %vm2692_vm1 = vcmask 1043456  }
  0x71   : > { %5050 = vsyncadd (%p6688_p8), [#allocation6], 4294964352  ;;  %v4334_v3 = vpack.c.bf16 %v523_v1, %v522_v0  ;;  %v525_v4 = vld [vmem:[%s6651_s1 + $0x18] sm:$0xff]  ;;  %v526_v6 = vld [vmem:[%s6651_s1 + $0x20] sm:$0xff]  ;;  %s6704_s10 = sld [smem:[#allocation28_spill]]  ;;  %vm2960_vm2 = vcmask 457728  }
  0x72   : > { %v4338_v5 = vpack.c.bf16 %v525_v4, %v524_v2  ;;  %v527_v7 = vld [vmem:[%s6651_s1 + $0x28] sm:$0xff]  ;;  %v490_v9 = vld [vmem:[%s5336_s19] sm:$0xff]  ;;  %v528_v10 = vld [vmem:[%s6651_s1 + $0x30] sm:$0xff]  ;;  %s6565_s22 = scalar_lea.vmem [#allocation8], %s3429_s30  ;;  %s3509_s30 = sshll.u32 %s5170_s29, 12 }
  0x73   : > { %4335 = vmatprep.subr.bf16.mxu0 %v4334_v3  ;;  %4506 = vmatprep.subr.bf16.mxu1 %v4334_v3  ;;  %v4342_v8 = vpack.c.bf16 %v527_v7, %v526_v6  ;;  %v529_v11 = vld [vmem:[%s6651_s1 + $0x38] sm:$0xff]  ;;  %v506_v13 = vld [vmem:[%s5336_s19 + $0x80] sm:$0xff]  ;;  %v531_v15 = vld [vmem:[%s6651_s1 + $0x48] sm:$0xff]  ;;  %s3328_s21 = sshll.u32 %s6565_s22, 4  ;;  %s6719_s15 = sld [smem:[#allocation30_spill]]  ;;  %s6604_s21 = int_to_ptr.vmem [resolvable:$true] %s3328_s21 }
  0x74   : > { %4337 = vmatpush3.bf16.msra.mxu0 %v4334_v3  ;;  %4514 = vmatpush3.bf16.msra.mxu1 %v4334_v3  ;;  %v4346_v12 = vpack.c.bf16 %v529_v11, %v528_v10  ;;  %v530_v14 = vld [vmem:[%s6651_s1 + $0x40] sm:$0xff]  ;;  %v532_v17 = vld [vmem:[%s6651_s1 + $0x50] sm:$0xff]  ;;  %v533_v18 = vld [vmem:[%s6651_s1 + $0x58] sm:$0xff]  ;;  %s3315_s17 = scalar_lea.sflag [#allocation4], %s5330_s11  ;;  %s4999_s29 = scalar_lea.vmem %s6604_s21, 4096 }
  0x75   : > { %4339 = vmatprep.subr.bf16.mxu0 %v4338_v5  ;;  %4507 = vmatprep.subr.bf16.mxu1 %v4338_v5  ;;  %v4350_v16 = vpack.c.bf16 %v531_v15, %v530_v14  ;;  %v4354_v19 = vpack.c.bf16 %v533_v18, %v532_v17  ;;  %v534_v20 = vld [vmem:[%s6651_s1 + $0x60] sm:$0xff]  ;;  %v535_v21 = vld [vmem:[%s6651_s1 + $0x68] sm:$0xff]  ;;  %v536_v23 = vld [vmem:[%s6651_s1 + $0x70] sm:$0xff]  ;;  %p5000_p11 = scmp.ne.s32.totalorder %s6604_s21, %s4999_s29  ;;  %p6720_p0 = scmp.ne.s32.totalorder %s6682_s23, 0 }
  0x76   : > { %3854 = vmatprep.mubr.f32.mxu0 %v490_v9  ;;  %3878 = vmatprep.mubr.f32.mxu1 %v506_v13  ;;  %v4358_v22 = vpack.c.bf16 %v535_v21, %v534_v20  ;;  %v537_v24 = vld [vmem:[%s6651_s1 + $0x78] sm:$0xff]  ;;  %v930_v26 = vld [vmem:[%s6653_s3] sm:$0xff]  ;;  %v931_v27 = vld [vmem:[%s6653_s3 + $0x8] sm:$0xff] }
  0x77   : > { %v4362_v25 = vpack.c.bf16 %v537_v24, %v536_v23  ;;  %v4366_v28 = vpack.c.bf16 %v931_v27, %v930_v26  ;;  %v932_v29 = vld [vmem:[%s6653_s3 + $0x10] sm:$0xff]  ;;  %v933_v30 = vld [vmem:[%s6653_s3 + $0x18] sm:$0xff]  ;;  %v491_v31 = vld [vmem:[%s5336_s19 + $0x8] sm:$0xff]  ;;  %p5001_p2 = pnand %p5000_p11, %p6720_p0 }
  0x78   : > { %4341 = vmatpush3.bf16.msra.mxu0 %v4338_v5  ;;  %4515 = vmatpush3.bf16.msra.mxu1 %v4338_v5  ;;  %v507_v32 = vld [vmem:[%s5336_s19 + $0x88] sm:$0xff]  ;;  %v492_v33 = vld [vmem:[%s5336_s19 + $0x10] sm:$0xff]  ;;  %v4370_v35 = vpack.c.bf16 %v933_v30, %v932_v29  ;;  %v934_v36 = vld [vmem:[%s6653_s3 + $0x20] sm:$0xff] }
  0x79   : > { %4343 = vmatprep.subr.bf16.mxu0 %v4342_v8  ;;  %4508 = vmatprep.subr.bf16.mxu1 %v4342_v8  ;;  %v508_v34 = vld [vmem:[%s5336_s19 + $0x90] sm:$0xff]  ;;  %v935_v37 = vld [vmem:[%s6653_s3 + $0x28] sm:$0xff]  ;;  %v493_v38 = vld [vmem:[%s5336_s19 + $0x18] sm:$0xff]  ;;  %s6602_s20 = scalar_lea.hbm %s6719_s15, %s3509_s30  ;;  %p5002_p3 = pneg %p5001_p2 }
  0x7a   : > { %v509_v39 = vld [vmem:[%s5336_s19 + $0x98] sm:$0xff]  ;;  %v494_v40 = vld [vmem:[%s5336_s19 + $0x20] sm:$0xff]  ;;  %v4374_v42 = vpack.c.bf16 %v935_v37, %v934_v36  ;;  %v495_v43 = vld [vmem:[%s5336_s19 + $0x28] sm:$0xff] }
  0x7b   : > { %v510_v41 = vld [vmem:[%s5336_s19 + $0xa0] sm:$0xff]  ;;  %v511_v44 = vld [vmem:[%s5336_s19 + $0xa8] sm:$0xff]  ;;  %v496_v45 = vld [vmem:[%s5336_s19 + $0x30] sm:$0xff] }
  0x7c   : > { %4345 = vmatpush3.bf16.msra.mxu0 %v4342_v8  ;;  %4516 = vmatpush3.bf16.msra.mxu1 %v4342_v8  ;;  %v512_v46 = vld [vmem:[%s5336_s19 + $0xb0] sm:$0xff]  ;;  %v497_v47 = vld [vmem:[%s5336_s19 + $0x38] sm:$0xff]  ;;  %v498_v49 = vld [vmem:[%s5336_s19 + $0x40] sm:$0xff] }
  0x7d   : > { %4347 = vmatprep.subr.bf16.mxu0 %v4346_v12  ;;  %4509 = vmatprep.subr.bf16.mxu1 %v4346_v12  ;;  %v513_v48 = vld [vmem:[%s5336_s19 + $0xb8] sm:$0xff]  ;;  %v514_v50 = vld [vmem:[%s5336_s19 + $0xc0] sm:$0xff]  ;;  %v499_v51 = vld [vmem:[%s5336_s19 + $0x48] sm:$0xff] }
  0x7e   : > { %v515_v52 = vld [vmem:[%s5336_s19 + $0xc8] sm:$0xff]  ;;  %v500_v53 = vld [vmem:[%s5336_s19 + $0x50] sm:$0xff]  ;;  %v501_v55 = vld [vmem:[%s5336_s19 + $0x58] sm:$0xff] }
  0x7f   : > { %v516_v54 = vld [vmem:[%s5336_s19 + $0xd0] sm:$0xff]  ;;  %v517_v56 = vld [vmem:[%s5336_s19 + $0xd8] sm:$0xff]  ;;  %v502_v57 = vld [vmem:[%s5336_s19 + $0x60] sm:$0xff] }
  0x80   : > { %4349 = vmatpush3.bf16.msra.mxu0 %v4346_v12  ;;  %4517 = vmatpush3.bf16.msra.mxu1 %v4346_v12  ;;  %v518_v58 = vld [vmem:[%s5336_s19 + $0xe0] sm:$0xff]  ;;  %v503_v59 = vld [vmem:[%s5336_s19 + $0x68] sm:$0xff]  ;;  %v504_v61 = vld [vmem:[%s5336_s19 + $0x70] sm:$0xff] }
  0x81   : > { %4351 = vmatprep.subr.bf16.mxu0 %v4350_v16  ;;  %4510 = vmatprep.subr.bf16.mxu1 %v4350_v16  ;;  %v519_v60 = vld [vmem:[%s5336_s19 + $0xe8] sm:$0xff]  ;;  %v520_v62 = vld [vmem:[%s5336_s19 + $0xf0] sm:$0xff]  ;;  %v505_v63 = vld [vmem:[%s5336_s19 + $0x78] sm:$0xff] }
  0x82   : > { %v521_v0 = vld [vmem:[%s5336_s19 + $0xf8] sm:$0xff]  ;;  %v936_v1 = vld [vmem:[%s6653_s3 + $0x30] sm:$0xff]  ;;  %v938_v4 = vld [vmem:[%s6653_s3 + $0x40] sm:$0xff] }
  0x83   : > { %v937_v2 = vld [vmem:[%s6653_s3 + $0x38] sm:$0xff]  ;;  %v939_v5 = vld [vmem:[%s6653_s3 + $0x48] sm:$0xff]  ;;  %v940_v7 = vld [vmem:[%s6653_s3 + $0x50] sm:$0xff] }
  0x84   : > { %4353 = vmatpush3.bf16.msra.mxu0 %v4350_v16  ;;  %4518 = vmatpush3.bf16.msra.mxu1 %v4350_v16  ;;  %v4378_v3 = vpack.c.bf16 %v937_v2, %v936_v1  ;;  %v4382_v6 = vpack.c.bf16 %v939_v5, %v938_v4  ;;  %v941_v8 = vld [vmem:[%s6653_s3 + $0x58] sm:$0xff]  ;;  %v942_v10 = vld [vmem:[%s6653_s3 + $0x60] sm:$0xff]  ;;  %v943_v11 = vld [vmem:[%s6653_s3 + $0x68] sm:$0xff] }
  0x85   : > { %4355 = vmatprep.subr.bf16.mxu0 %v4354_v19  ;;  %4511 = vmatprep.subr.bf16.mxu1 %v4354_v19  ;;  %v4386_v9 = vpack.c.bf16 %v941_v8, %v940_v7  ;;  %v4390_v12 = vpack.c.bf16 %v943_v11, %v942_v10  ;;  %v944_v13 = vld [vmem:[%s6653_s3 + $0x70] sm:$0xff]  ;;  %v945_v14 = vld [vmem:[%s6653_s3 + $0x78] sm:$0xff]  ;;  %v1338_v16 = vld [vmem:[#allocation5] sm:$0xff] }
  0x86   : > { %v4394_v15 = vpack.c.bf16 %v945_v14, %v944_v13  ;;  %v1339_v17 = vld [vmem:[#allocation5 + $0x8] sm:$0xff]  ;;  %v1340_v18 = vld [vmem:[#allocation5 + $0x10] sm:$0xff]  ;;  %v1341_v20 = vld [vmem:[#allocation5 + $0x18] sm:$0xff] }
  0x87   : > { %v4402_v21 = vpack.c.bf16 %v1341_v20, %v1340_v18  ;;  %v1343_v23 = vld [vmem:[#allocation5 + $0x28] sm:$0xff] }
  0x88   : > { %4357 = vmatpush3.bf16.msra.mxu0 %v4354_v19  ;;  %4519 = vmatpush3.bf16.msra.mxu1 %v4354_v19  ;;  %v4398_v19 = vpack.c.bf16 %v1339_v17, %v1338_v16 }
  0x89   : > { %4359 = vmatprep.subr.bf16.mxu0 %v4358_v22  ;;  %4512 = vmatprep.subr.bf16.mxu1 %v4358_v22 }
  0x8c   : > { %4361 = vmatpush3.bf16.msra.mxu0 %v4358_v22  ;;  %4520 = vmatpush3.bf16.msra.mxu1 %v4358_v22  ;;  %v1342_v22 = vld [vmem:[#allocation5 + $0x20] sm:$0xff] }
  0x8d   : > { %4363 = vmatprep.subr.bf16.mxu0 %v4362_v25  ;;  %4513 = vmatprep.subr.bf16.mxu1 %v4362_v25  ;;  %v4406_v24 = vpack.c.bf16 %v1343_v23, %v1342_v22 }
  0x90   : > { %4365 = vmatpush3.bf16.msra.mxu0 %v4362_v25  ;;  %4521 = vmatpush3.bf16.msra.mxu1 %v4362_v25  ;;  %v5477_v25 = vld [vmem:[%s6652_s2] ss:$0 sm:$0xff] }
  0x91   : > { %4367 = vmatprep.subr.bf16.mxu1 %v4366_v28  ;;  %4399 = vmatprep.subr.bf16.mxu0 %v4398_v19 }
  0x93   : > { %3855 = vmatmul.mubr.f32.vlgmr.msra.gmra.mrb[0].mxu0 %v491_v31  ;;  %3879 = vmatmul.mubr.f32.vlgmr.msra.gmra.mrb[0].mxu1 %v507_v32 }
  0x94   : > { %3857 = vmatprep.mubr.f32.mxu0 %v492_v33  ;;  %3881 = vmatprep.mubr.f32.mxu1 %v508_v34 }
  0x95   : > { %4369 = vmatpush3.bf16.msra.mxu1 %v4366_v28  ;;  %4401 = vmatpush3.bf16.msra.mxu0 %v4398_v19 }
  0x96   : > { %4371 = vmatprep.subr.bf16.mxu1 %v4370_v35  ;;  %4403 = vmatprep.subr.bf16.mxu0 %v4402_v21 }
  0x97   : > { %3858 = vmatmul.mubr.f32.gmra.mrb[2].mxu0 %v493_v38  ;;  %3882 = vmatmul.mubr.f32.gmra.mrb[2].mxu1 %v509_v39 }
  0x98   : > { %3860 = vmatprep.mubr.f32.mxu0 %v494_v40  ;;  %3884 = vmatprep.mubr.f32.mxu1 %v510_v41 }
  0x99   : > { %4373 = vmatpush3.bf16.msra.mxu1 %v4370_v35  ;;  %4405 = vmatpush3.bf16.msra.mxu0 %v4402_v21 }
  0x9a   : > { %4375 = vmatprep.subr.bf16.mxu1 %v4374_v42  ;;  %4407 = vmatprep.subr.bf16.mxu0 %v4406_v24 }
  0x9b   : > { %3861 = vmatmul.mubr.f32.gmra.mrb[4].mxu0 %v495_v43  ;;  %3885 = vmatmul.mubr.f32.gmra.mrb[4].mxu1 %v511_v44 }
  0x9c   : > { %3863 = vmatprep.mubr.f32.mxu0 %v496_v45  ;;  %3887 = vmatprep.mubr.f32.mxu1 %v512_v46 }
  0x9d   : > { %4377 = vmatpush3.bf16.msra.mxu1 %v4374_v42  ;;  %4409 = vmatpush3.bf16.msra.mxu0 %v4406_v24 }
  0x9e   : > { %4379 = vmatprep.subr.bf16.mxu1 %v4378_v3 }
  0x9f   : > { %3864 = vmatmul.mubr.f32.gmra.mrb[6].mxu0 %v497_v47  ;;  %3888 = vmatmul.mubr.f32.gmra.mrb[6].mxu1 %v513_v48 }
  0xa0   : > { %3866 = vmatprep.mubr.f32.mxu0 %v498_v49  ;;  %3890 = vmatprep.mubr.f32.mxu1 %v514_v50 }
  0xa1   : > { %4381 = vmatpush3.bf16.msra.mxu1 %v4378_v3 }
  0xa2   : > { %4383 = vmatprep.subr.bf16.mxu1 %v4382_v6 }
  0xa3   : > { %3867 = vmatmul.mubr.f32.gmra.mrb[8].mxu0 %v499_v51  ;;  %3891 = vmatmul.mubr.f32.gmra.mrb[8].mxu1 %v515_v52 }
  0xa4   : > { %3869 = vmatprep.mubr.f32.mxu0 %v500_v53  ;;  %3893 = vmatprep.mubr.f32.mxu1 %v516_v54 }
  0xa5   : > { %4385 = vmatpush3.bf16.msra.mxu1 %v4382_v6 }
  0xa6   : > { %4387 = vmatprep.subr.bf16.mxu1 %v4386_v9 }
  0xa7   : > { %3870 = vmatmul.mubr.f32.gmra.mrb[10].mxu0 %v501_v55  ;;  %3894 = vmatmul.mubr.f32.gmra.mrb[10].mxu1 %v517_v56 }
  0xa8   : > { %3872 = vmatprep.mubr.f32.mxu0 %v502_v57  ;;  %3896 = vmatprep.mubr.f32.mxu1 %v518_v58 }
  0xa9   : > { %4389 = vmatpush3.bf16.msra.mxu1 %v4386_v9 }
  0xaa   : > { %4391 = vmatprep.subr.bf16.mxu1 %v4390_v12 }
  0xab   : > { %3873 = vmatmul.mubr.f32.gmra.mrb[12].mxu0 %v503_v59  ;;  %3897 = vmatmul.mubr.f32.gmra.mrb[12].mxu1 %v519_v60 }
  0xac   : > { %3875 = vmatprep.mubr.f32.mxu0 %v504_v61  ;;  %3899 = vmatprep.mubr.f32.mxu1 %v520_v62 }
  0xad   : > { %4393 = vmatpush3.bf16.msra.mxu1 %v4390_v12 }
  0xae   : > { %4395 = vmatprep.subr.bf16.mxu1 %v4394_v15 }
  0xaf   : > { %3876 = vmatmul.mubr.f32.gmra.mrb[14].mxu0 %v505_v63  ;;  %3900 = vmatmul.mubr.f32.gmra.mrb[14].mxu1 %v521_v0 }
  0xb1   : > { %4397 = vmatpush3.bf16.msra.mxu1 %v4394_v15 }
 0x166   : > { %v3856_v26 = vpop.f32.mrb[0].mxu0  ;;  %v3880_v27 = vpop.f32.mrb[0].mxu1 }
 0x167   : > { %v617_v28 = vadd.f32 %v3856_v26, %v5477_v25  ;;  %v611_v29 = vpop.f32.mrb[1].mxu0  ;;  %v5480_v30 = vpop.f32.mrb[1].mxu1  ;;  %v5522_v8 = vadd.f32 %v3880_v27, %v5477_v25 }
 0x168   : > { %v612_v31 = vadd.f32 %v5477_v25, %v611_v29  ;;  %v5539_v27 = vadd.f32 %v5477_v25, %v5480_v30 }
 0x169   : > { %v803_v32 = vmul.f32 0.70710677, %v617_v28  ;;  %v771_v4 = vmul.f32 0.5, %v617_v28  ;;  %v819_v26 = vmul.f32 0.70710677, %v5522_v8 }
 0x16a   : > { %v802_v33 = vmul.f32 0.70710677, %v612_v31  ;;  %v3859_v34 = vpop.f32.mrb[2].mxu0  ;;  %v5483_v35 = vpop.f32.mrb[2].mxu1  ;;  %v770_v63 = vmul.f32 0.5, %v612_v31 }
 0x16b   : > { %4593 = verf.f32 %v803_v32  ;;  %v627_v36 = vadd.f32 %v3859_v34, %v5477_v25  ;;  %v621_v37 = vpop.f32.mrb[3].mxu0  ;;  %v5486_v38 = vpop.f32.mrb[3].mxu1 }
 0x16c   : > { %4595 = verf.f32 %v802_v33  ;;  %v622_v39 = vadd.f32 %v5477_v25, %v621_v37 }
 0x16d   : > { %v805_v40 = vmul.f32 0.70710677, %v627_v36  ;;  %v773_v20 = vmul.f32 0.5, %v627_v36 }
 0x16e   : > { %v804_v41 = vmul.f32 0.70710677, %v622_v39  ;;  %v3862_v42 = vpop.f32.mrb[4].mxu0  ;;  %v5492_v45 = vpop.f32.mrb[4].mxu1  ;;  %v772_v15 = vmul.f32 0.5, %v622_v39 }
 0x16f   : > { %4597 = verf.f32 %v805_v40  ;;  %v5490_v43 = vadd.f32 %v3862_v42, %v5477_v25  ;;  %v631_v44 = vpop.f32.mrb[5].mxu0  ;;  %v5495_v47 = vpop.f32.mrb[5].mxu1 }
 0x170   : > { %4599 = verf.f32 %v804_v41  ;;  %v632_v46 = vadd.f32 %v5477_v25, %v631_v44 }
 0x171   : > { %v807_v48 = vmul.f32 0.70710677, %v5490_v43  ;;  %v775_v30 = vmul.f32 0.5, %v5490_v43 }
 0x172   : > { %v806_v49 = vmul.f32 0.70710677, %v632_v46  ;;  %v3865_v50 = vpop.f32.mrb[6].mxu0  ;;  %v5498_v51 = vpop.f32.mrb[6].mxu1  ;;  %v774_v37 = vmul.f32 0.5, %v632_v46 }
 0x173   : > { %4601 = verf.f32 %v807_v48  ;;  %v5501_v52 = vadd.f32 %v3865_v50, %v5477_v25  ;;  %v641_v53 = vpop.f32.mrb[7].mxu0  ;;  %v5503_v54 = vpop.f32.mrb[7].mxu1  ;;  %v5557_v50 = vadd.f32 %v5477_v25, %v5486_v38 }
 0x174   : > { %4603 = verf.f32 %v806_v49  ;;  %v5506_v55 = vadd.f32 %v5477_v25, %v641_v53  ;;  %v818_v49 = vmul.f32 0.70710677, %v5539_v27 }
 0x175   : > { %v4594_v56 = vpop.eup %4593  ;;  %v809_v57 = vmul.f32 0.70710677, %v5501_v52 }
 0x176   : > { %v4596_v58 = vpop.eup %4595  ;;  %v867_v59 = vadd.f32 1.0, %v4594_v56  ;;  %v808_v60 = vmul.f32 0.70710677, %v5506_v55  ;;  %v3868_v61 = vpop.f32.mrb[8].mxu0 }
 0x177   : > { %v5510_v62 = vpop.f32.mrb[8].mxu1  ;;  %v866_v0 = vadd.f32 1.0, %v4596_v58  ;;  %4605 = verf.f32 %v809_v57  ;;  %v5513_v1 = vadd.f32 %v3868_v61, %v5477_v25  ;;  %v651_v2 = vpop.f32.mrb[9].mxu0  ;;  %v776_v61 = vmul.f32 0.5, %v5506_v55 }
 0x178   : > { %v5515_v3 = vpop.f32.mrb[9].mxu1  ;;  %4607 = verf.f32 %v808_v60  ;;  %v5518_v5 = vadd.f32 %v5477_v25, %v651_v2  ;;  %v899_v11 = vmul.f32 %v867_v59, %v771_v4  ;;  %v777_v4 = vmul.f32 0.5, %v5501_v52 }
 0x179   : > { %v4598_v6 = vpop.eup %4597  ;;  %v811_v7 = vmul.f32 0.70710677, %v5513_v1  ;;  %v898_v9 = vmul.f32 %v866_v0, %v770_v63 }
 0x17a   : > { %v4600_v10 = vpop.eup %4599  ;;  %v869_v12 = vadd.f32 1.0, %v4598_v6  ;;  %v810_v13 = vmul.f32 0.70710677, %v5518_v5  ;;  %v3871_v14 = vpop.f32.mrb[10].mxu0  ;;  %v5571_v6 = vadd.f32 %v5483_v35, %v5477_v25 }
 0x17b   : > { %v868_v16 = vadd.f32 1.0, %v4600_v10  ;;  %4609 = verf.f32 %v811_v7  ;;  %v5526_v17 = vadd.f32 %v3871_v14, %v5477_v25  ;;  %v661_v18 = vpop.f32.mrb[11].mxu0  ;;  %3934 = vmatprep.mubr.f32.mxu1 %v898_v9  ;;  %v5528_v19 = vpop.f32.mrb[10].mxu1  ;;  %v820_v9 = vmul.f32 0.70710677, %v5557_v50 }
 0x17c   : > { %4611 = verf.f32 %v810_v13  ;;  %v5531_v21 = vadd.f32 %v5477_v25, %v661_v18  ;;  %3935 = vmatmul.mubr.f32.vlgmr.msra.gmra.mrb[16].mxu1 %v899_v11  ;;  %v5533_v22 = vpop.f32.mrb[11].mxu1  ;;  %v901_v34 = vmul.f32 %v869_v12, %v773_v20  ;;  %v5581_v14 = vadd.f32 %v5477_v25, %v5495_v47 }
 0x17d   : > { %v4602_v23 = vpop.eup %4601  ;;  %v813_v24 = vmul.f32 0.70710677, %v5526_v17  ;;  %v900_v28 = vmul.f32 %v868_v16, %v772_v15  ;;  %v778_v15 = vmul.f32 0.5, %v5518_v5  ;;  %v779_v18 = vmul.f32 0.5, %v5513_v1 }
 0x17e   : > { %v4604_v29 = vpop.eup %4603  ;;  %v871_v31 = vadd.f32 1.0, %v4602_v23  ;;  %v812_v32 = vmul.f32 0.70710677, %v5531_v21  ;;  %v3874_v33 = vpop.f32.mrb[12].mxu0  ;;  %v821_v20 = vmul.f32 0.70710677, %v5571_v6  ;;  %v5588_v23 = vadd.f32 %v5492_v45, %v5477_v25 }
 0x17f   : > { %v5542_v36 = vpop.f32.mrb[12].mxu1  ;;  %v870_v39 = vadd.f32 1.0, %v4604_v29  ;;  %4613 = verf.f32 %v813_v24  ;;  %v5545_v40 = vadd.f32 %v3874_v33, %v5477_v25  ;;  %v671_v41 = vpop.f32.mrb[13].mxu0  ;;  %3937 = vmatprep.mubr.f32.mxu1 %v900_v28  ;;  %v5592_v47 = vadd.f32 %v5477_v25, %v5503_v54 }
 0x180   : > { %v5547_v42 = vpop.f32.mrb[13].mxu1  ;;  %4615 = verf.f32 %v812_v32  ;;  %v5551_v44 = vadd.f32 %v5477_v25, %v671_v41  ;;  %3938 = vmatmul.mubr.f32.gmra.mrb[18].mxu1 %v901_v34  ;;  %v903_v59 = vmul.f32 %v871_v31, %v775_v30  ;;  %v822_v29 = vmul.f32 0.70710677, %v5581_v14 }
 0x181   : > { %v4606_v48 = vpop.eup %4605  ;;  %v815_v46 = vmul.f32 0.70710677, %v5545_v40  ;;  %v902_v53 = vmul.f32 %v870_v39, %v774_v37  ;;  %4617 = verf.f32 %v819_v26  ;;  %v780_v31 = vmul.f32 0.5, %v5531_v21 }
 0x182   : > { %v4608_v56 = vpop.eup %4607  ;;  %v873_v57 = vadd.f32 1.0, %v4606_v48  ;;  %v814_v43 = vmul.f32 0.70710677, %v5551_v44  ;;  %v3877_v58 = vpop.f32.mrb[14].mxu0  ;;  %v781_v45 = vmul.f32 0.5, %v5526_v17  ;;  %v5600_v37 = vadd.f32 %v5498_v51, %v5477_v25 }
 0x183   : > { %v5560_v60 = vpop.f32.mrb[14].mxu1  ;;  %v872_v63 = vadd.f32 1.0, %v4608_v56  ;;  %4619 = verf.f32 %v815_v46  ;;  %v5564_v0 = vadd.f32 %v3877_v58, %v5477_v25  ;;  %v681_v2 = vpop.f32.mrb[15].mxu0  ;;  %3940 = vmatprep.mubr.f32.mxu1 %v902_v53  ;;  %v823_v34 = vmul.f32 0.70710677, %v5588_v23 }
 0x184   : > { %v5566_v38 = vpop.f32.mrb[15].mxu1  ;;  %4621 = verf.f32 %v814_v43  ;;  %v5574_v7 = vadd.f32 %v5477_v25, %v681_v2  ;;  %3941 = vmatmul.mubr.f32.gmra.mrb[20].mxu1 %v903_v59  ;;  %v905_v35 = vmul.f32 %v873_v57, %v777_v4  ;;  %v824_v39 = vmul.f32 0.70710677, %v5592_v47 }
 0x185   : > { %v4610_v55 = vpop.eup %4609  ;;  %4623 = verf.f32 %v818_v49  ;;  %v817_v10 = vmul.f32 0.70710677, %v5564_v0  ;;  %v904_v11 = vmul.f32 %v872_v63, %v776_v61  ;;  %v5605_v21 = vadd.f32 %v5477_v25, %v5515_v3 }
 0x186   : > { %v4612_v12 = vpop.eup %4611  ;;  %v875_v13 = vadd.f32 1.0, %v4610_v55  ;;  %v816_v52 = vmul.f32 0.70710677, %v5574_v7  ;;  %v782_v46 = vmul.f32 0.5, %v5551_v44  ;;  %v783_v56 = vmul.f32 0.5, %v5545_v40 }
 0x187   : > { %v874_v16 = vadd.f32 1.0, %v4612_v12  ;;  %4625 = verf.f32 %v817_v10  ;;  %3943 = vmatprep.mubr.f32.mxu1 %v904_v11  ;;  %v825_v57 = vmul.f32 0.70710677, %v5600_v37  ;;  %v5612_v43 = vadd.f32 %v5510_v62, %v5477_v25 }
 0x188   : > { %4627 = verf.f32 %v816_v52  ;;  %3944 = vmatmul.mubr.f32.gmra.mrb[22].mxu1 %v905_v35  ;;  %v907_v1 = vmul.f32 %v875_v13, %v779_v18  ;;  %v826_v61 = vmul.f32 0.70710677, %v5605_v21  ;;  %v5617_v44 = vadd.f32 %v5477_v25, %v5533_v22 }
 0x189   : > { %v4614_v24 = vpop.eup %4613  ;;  %v906_v26 = vmul.f32 %v874_v16, %v778_v15  ;;  %4629 = verf.f32 %v820_v9  ;;  %v786_v63 = vmul.f32 0.5, %v5539_v27  ;;  %v784_v4 = vmul.f32 0.5, %v5574_v7 }
 0x18a   : > { %v4616_v5 = vpop.eup %4615  ;;  %v877_v28 = vadd.f32 1.0, %v4614_v24  ;;  %4631 = verf.f32 %v821_v20  ;;  %v787_v62 = vmul.f32 0.5, %v5522_v8  ;;  %v785_v11 = vmul.f32 0.5, %v5564_v0 }
 0x18b   : > { %v876_v32 = vadd.f32 1.0, %v4616_v5  ;;  %3946 = vmatprep.mubr.f32.mxu1 %v906_v26  ;;  %v4618_v33 = vpop.eup %4617  ;;  %4633 = verf.f32 %v822_v29  ;;  %v827_v12 = vmul.f32 0.70710677, %v5612_v43  ;;  %v5626_v22 = vadd.f32 %v5528_v19, %v5477_v25 }
 0x18c   : > { %3947 = vmatmul.mubr.f32.gmra.mrb[24].mxu1 %v907_v1  ;;  %v909_v17 = vmul.f32 %v877_v28, %v781_v45  ;;  %4635 = verf.f32 %v823_v34  ;;  %v883_v10 = vadd.f32 1.0, %v4618_v33  ;;  %v828_v7 = vmul.f32 0.70710677, %v5617_v44 }
 0x18d   : > { %v4620_v54 = vpop.eup %4619  ;;  %v908_v41 = vmul.f32 %v876_v32, %v780_v31  ;;  %4637 = verf.f32 %v824_v39  ;;  %v5631_v52 = vadd.f32 %v5477_v25, %v5547_v42  ;;  %v788_v0 = vmul.f32 0.5, %v5557_v50 }
 0x18e   : > { %v4622_v30 = vpop.eup %4621  ;;  %v879_v48 = vadd.f32 1.0, %v4620_v54  ;;  %4639 = verf.f32 %v825_v57  ;;  %v789_v18 = vmul.f32 0.5, %v5571_v6  ;;  %v829_v20 = vmul.f32 0.70710677, %v5626_v22 }
 0x18f   : > { %v4624_v49 = vpop.eup %4623  ;;  %v878_v53 = vadd.f32 1.0, %v4622_v30  ;;  %3949 = vmatprep.mubr.f32.mxu1 %v908_v41  ;;  %4641 = verf.f32 %v826_v61  ;;  %v757_v24 = vadd.f32 %v5542_v36, %v5477_v25  ;;  %v830_v26 = vmul.f32 0.70710677, %v5631_v52 }
 0x190   : > { %3950 = vmatmul.mubr.f32.gmra.mrb[26].mxu1 %v909_v17  ;;  %v911_v40 = vmul.f32 %v879_v48, %v783_v56  ;;  %v882_v2 = vadd.f32 1.0, %v4624_v49  ;;  %4643 = verf.f32 %v827_v12  ;;  %v762_v50 = vadd.f32 %v5477_v25, %v5566_v38 }
 0x191   : > { %v4626_v51 = vpop.eup %4625  ;;  %v910_v3 = vmul.f32 %v878_v53, %v782_v46  ;;  %4645 = verf.f32 %v828_v7  ;;  %v915_v5 = vmul.f32 %v883_v10, %v787_v62  ;;  %v790_v6 = vmul.f32 0.5, %v5581_v14 }
 0x192   : > { %v4628_v58 = vpop.eup %4627  ;;  %v881_v59 = vadd.f32 1.0, %v4626_v51  ;;  %v914_v15 = vmul.f32 %v882_v2, %v786_v63  ;;  %v791_v31 = vmul.f32 0.5, %v5588_v23  ;;  %4647 = verf.f32 %v829_v20  ;;  %v1348_v20 = vld [vmem:[#allocation5 + $0x50] sm:$0xff] }
 0x193   : > { %v880_v55 = vadd.f32 1.0, %v4628_v58  ;;  %3952 = vmatprep.mubr.f32.mxu1 %v910_v3  ;;  %v4630_v9 = vpop.eup %4629  ;;  %v831_v32 = vmul.f32 0.70710677, %v757_v24  ;;  %v767_v36 = vadd.f32 %v5560_v60, %v5477_v25  ;;  %4649 = verf.f32 %v830_v26  ;;  %v1350_v26 = vld [vmem:[#allocation5 + $0x60] sm:$0xff] }
 0x194   : > { %3953 = vmatmul.mubr.f32.gmra.mrb[28].mxu1 %v911_v40  ;;  %v4632_v13 = vpop.eup %4631  ;;  %v913_v8 = vmul.f32 %v881_v59, %v785_v11  ;;  %v884_v35 = vadd.f32 1.0, %v4630_v9  ;;  %v832_v45 = vmul.f32 0.70710677, %v762_v50  ;;  %v792_v54 = vmul.f32 0.5, %v5592_v47 }
 0x195   : > { %v912_v27 = vmul.f32 %v880_v55, %v784_v4  ;;  %v4634_v16 = vpop.eup %4633  ;;  %v885_v19 = vadd.f32 1.0, %v4632_v13  ;;  %4651 = verf.f32 %v831_v32  ;;  %v833_v30 = vmul.f32 0.70710677, %v767_v36  ;;  %v1748_v32 = vld [vmem:[%s6657_s7 + $0x10] sm:$0xff] }
 0x196   : > { %v4636_v42 = vpop.eup %4635  ;;  %v886_v29 = vadd.f32 1.0, %v4634_v16  ;;  %v916_v1 = vmul.f32 %v884_v35, %v788_v0  ;;  %v793_v23 = vmul.f32 0.5, %v5600_v37  ;;  %4653 = verf.f32 %v832_v45  ;;  %v1344_v0 = vld [vmem:[#allocation5 + $0x30] sm:$0xff]  ;;  %v1345_v35 = vld [vmem:[#allocation5 + $0x38] sm:$0xff]  ;;  %v1346_v16 = vld [vmem:[#allocation5 + $0x40] sm:$0xff] }
 0x197   : > { %3955 = vmatprep.mubr.f32.mxu1 %v912_v27  ;;  %v4638_v28 = vpop.eup %4637  ;;  %v887_v33 = vadd.f32 1.0, %v4636_v42  ;;  %v917_v34 = vmul.f32 %v885_v19, %v789_v18  ;;  %v794_v17 = vmul.f32 0.5, %v5605_v21  ;;  %4655 = verf.f32 %v833_v30  ;;  %v1347_v18 = vld [vmem:[#allocation5 + $0x48] sm:$0xff]  ;;  %v1752_v30 = vld [vmem:[%s6657_s7 + $0x30] sm:$0xff] }
 0x198   : > { %3956 = vmatmul.mubr.f32.gmra.mrb[30].mxu1 %v913_v8  ;;  %v4640_v38 = vpop.eup %4639  ;;  %v888_v39 = vadd.f32 1.0, %v4638_v28  ;;  %v918_v14 = vmul.f32 %v886_v29, %v790_v6  ;;  %v795_v47 = vmul.f32 0.5, %v5612_v43  ;;  %v796_v3 = vmul.f32 0.5, %v5617_v44  ;;  %v1352_v28 = vld [vmem:[#allocation5 + $0x70] sm:$0xff]  ;;  %v1353_v6 = vld [vmem:[#allocation5 + $0x78] sm:$0xff] }
 0x199   : > { %3958 = vmatprep.mubr.f32.mxu1 %v914_v15  ;;  %v4642_v41 = vpop.eup %4641  ;;  %v889_v48 = vadd.f32 1.0, %v4640_v38  ;;  %v919_v25 = vmul.f32 %v887_v33, %v791_v31  ;;  %v797_v21 = vmul.f32 0.5, %v5626_v22  ;;  %v798_v2 = vmul.f32 0.5, %v5631_v52  ;;  %v1747_v31 = vld [vmem:[%s6657_s7 + $0x8] sm:$0xff]  ;;  %v1749_v33 = vld [vmem:[%s6657_s7 + $0x18] sm:$0xff] }
 0x19a   : > { %v4644_v60 = vpop.eup %4643  ;;  %v890_v49 = vadd.f32 1.0, %v4642_v41  ;;  %v920_v46 = vmul.f32 %v888_v39, %v792_v54  ;;  %v799_v9 = vmul.f32 0.5, %v757_v24  ;;  %v800_v11 = vmul.f32 0.5, %v762_v50  ;;  %v1349_v24 = vld [vmem:[#allocation5 + $0x58] sm:$0xff]  ;;  %v1351_v50 = vld [vmem:[#allocation5 + $0x68] sm:$0xff]  ;;  %v2347_v54 = vld [vmem:[%s6659_s9] sm:$0xff] }
 0x19b   : > { %v4646_v53 = vpop.eup %4645  ;;  %v891_v56 = vadd.f32 1.0, %v4644_v60  ;;  %v921_v51 = vmul.f32 %v889_v48, %v793_v23  ;;  %v801_v22 = vmul.f32 0.5, %v767_v36  ;;  %v4410_v15 = vpack.c.bf16 %v1345_v35, %v1344_v0  ;;  %v1751_v38 = vld [vmem:[%s6657_s7 + $0x28] sm:$0xff]  ;;  %v1753_v23 = vld [vmem:[%s6657_s7 + $0x38] sm:$0xff] }
 0x19c   : > { %3959 = vmatmul.mubr.f32.gmra.mrb[32].mxu1 %v915_v5  ;;  %v4648_v57 = vpop.eup %4647  ;;  %v892_v37 = vadd.f32 1.0, %v4646_v53  ;;  %v922_v58 = vmul.f32 %v890_v49, %v794_v17  ;;  %v4414_v19 = vpack.c.bf16 %v1347_v18, %v1346_v16  ;;  %v4418_v42 = vpack.c.bf16 %v1349_v24, %v1348_v20  ;;  %v2348_v39 = vld [vmem:[%s6659_s9 + $0x8] sm:$0xff]  ;;  %v1756_v49 = vld [vmem:[%s6657_s7 + $0x50] sm:$0xff]  ;;  %v2350_v20 = vld [vmem:[%s6659_s9 + $0x18] sm:$0xff] }
 0x19d   : > { %3961 = vmatprep.mubr.f32.mxu1 %v916_v1  ;;  %v4650_v59 = vpop.eup %4649  ;;  %v893_v61 = vadd.f32 1.0, %v4648_v57  ;;  %v923_v40 = vmul.f32 %v891_v56, %v795_v47  ;;  %4411 = vmatprep.subr.bf16.mxu0 %v4410_v15  ;;  %v4422_v5 = vpack.c.bf16 %v1351_v50, %v1350_v26  ;;  %v4426_v29 = vpack.c.bf16 %v1353_v6, %v1352_v28  ;;  %v1746_v1 = vld [vmem:[%s6657_s7] sm:$0xff]  ;;  %v1755_v60 = vld [vmem:[%s6657_s7 + $0x48] sm:$0xff] }
 0x19e   : > { %v894_v4 = vadd.f32 1.0, %v4650_v59  ;;  %v924_v55 = vmul.f32 %v892_v37, %v796_v3  ;;  %4413 = vmatpush3.bf16.msra.mxu0 %v4410_v15  ;;  %v4430_v36 = vpack.c.bf16 %v1747_v31, %v1746_v1  ;;  %v4434_v45 = vpack.c.bf16 %v1749_v33, %v1748_v32  ;;  %v5700_v47 = vld [vmem:[%s6654_s4] ss:$0 sm:$0xff] }
 0x19f   : > { %v4652_v63 = vpop.eup %4651  ;;  %v925_v44 = vmul.f32 %v893_v61, %v797_v21  ;;  %4415 = vmatprep.subr.bf16.mxu0 %v4414_v19  ;;  %v4442_v48 = vpack.c.bf16 %v1753_v23, %v1752_v30 }
 0x1a0   : > { %3962 = vmatmul.mubr.f32.gmra.mrb[34].mxu1 %v917_v34  ;;  %v4654_v43 = vpop.eup %4653  ;;  %v895_v62 = vadd.f32 1.0, %v4652_v63  ;;  %v926_v27 = vmul.f32 %v894_v4, %v798_v2  ;;  %v1750_v34 = vld [vmem:[%s6657_s7 + $0x20] sm:$0xff]  ;;  %4431 = vmatprep.subr.bf16.mxu1 %v4430_v36 }
 0x1a1   : > { %3964 = vmatprep.mubr.f32.mxu1 %v918_v14  ;;  %v4656_v10 = vpop.eup %4655  ;;  %v896_v12 = vadd.f32 1.0, %v4654_v43  ;;  %4433 = vmatpush3.bf16.msra.mxu1 %v4430_v36  ;;  %v5676_v14 = vpack.c.bf16 %v2348_v39, %v2347_v54  ;;  %v4438_v41 = vpack.c.bf16 %v1751_v38, %v1750_v34  ;;  %v2351_v38 = vld [vmem:[%s6659_s9 + $0x20] sm:$0xff]  ;;  %v2352_v54 = vld [vmem:[%s6659_s9 + $0x28] sm:$0xff] }
 0x1a2   : > { %v897_v13 = vadd.f32 1.0, %v4656_v10  ;;  %v927_v7 = vmul.f32 %v895_v62, %v799_v9  ;;  %4417 = vmatpush3.bf16.msra.mxu0 %v4414_v19  ;;  %4435 = vmatprep.subr.bf16.mxu1 %v4434_v45  ;;  %v2349_v19 = vld [vmem:[%s6659_s9 + $0x10] sm:$0xff] }
 0x1a3   : > { %v928_v8 = vmul.f32 %v896_v12, %v800_v11  ;;  %4419 = vmatprep.subr.bf16.mxu0 %v4418_v42  ;;  %v4466_v32 = vpack.c.bf16 %v2350_v20, %v2349_v19 }
 0x1a4   : > { %3965 = vmatmul.mubr.f32.gmra.mrb[36].mxu1 %v919_v25  ;;  %v929_v52 = vmul.f32 %v897_v13, %v801_v22  ;;  %v1754_v25 = vld [vmem:[%s6657_s7 + $0x40] sm:$0xff] }
 0x1a5   : > { %3967 = vmatprep.mubr.f32.mxu1 %v920_v46  ;;  %4437 = vmatpush3.bf16.msra.mxu1 %v4434_v45  ;;  %v4446_v17 = vpack.c.bf16 %v1755_v60, %v1754_v25  ;;  %v1757_v46 = vld [vmem:[%s6657_s7 + $0x58] sm:$0xff] }
 0x1a6   : > { %4421 = vmatpush3.bf16.msra.mxu0 %v4418_v42  ;;  %4439 = vmatprep.subr.bf16.mxu1 %v4438_v41  ;;  %v4450_v53 = vpack.c.bf16 %v1757_v46, %v1756_v49 }
 0x1a7   : > { %4423 = vmatprep.subr.bf16.mxu0 %v4422_v5 }
 0x1a8   : > { %3968 = vmatmul.mubr.f32.gmra.mrb[38].mxu1 %v921_v51 }
 0x1a9   : > { %3970 = vmatprep.mubr.f32.mxu1 %v922_v58  ;;  %4441 = vmatpush3.bf16.msra.mxu1 %v4438_v41 }
 0x1aa   : > { %4425 = vmatpush3.bf16.msra.mxu0 %v4422_v5  ;;  %4443 = vmatprep.subr.bf16.mxu1 %v4442_v48 }
 0x1ab   : > { %4427 = vmatprep.subr.bf16.mxu0 %v4426_v29 }
 0x1ac   : > { %3971 = vmatmul.mubr.f32.gmra.mrb[40].mxu1 %v923_v40 }
 0x1ad   : > { %3973 = vmatprep.mubr.f32.mxu1 %v924_v55  ;;  %4445 = vmatpush3.bf16.msra.mxu1 %v4442_v48 }
 0x1ae   : > { %4429 = vmatpush3.bf16.msra.mxu0 %v4426_v29  ;;  %4447 = vmatprep.subr.bf16.mxu1 %v4446_v17 }
 0x1af   : > { %4463 = vmatprep.subr.bf16.mxu0 %v5676_v14 }
 0x1b0   : > { %3974 = vmatmul.mubr.f32.gmra.mrb[42].mxu1 %v925_v44 }
 0x1b1   : > { %3976 = vmatprep.mubr.f32.mxu1 %v926_v27  ;;  %4449 = vmatpush3.bf16.msra.mxu1 %v4446_v17 }
 0x1b2   : > { %4451 = vmatprep.subr.bf16.mxu1 %v4450_v53 }
 0x1b4   : > { %3977 = vmatmul.mubr.f32.gmra.mrb[44].mxu1 %v927_v7 }
 0x1b5   : > { %3979 = vmatprep.mubr.f32.mxu1 %v928_v8  ;;  %4453 = vmatpush3.bf16.msra.mxu1 %v4450_v53  ;;  %v4470_v53 = vpack.c.bf16 %v2352_v54, %v2351_v38 }
 0x1b8   : > { %3980 = vmatmul.mubr.f32.gmra.mrb[46].mxu1 %v929_v52 }
 0x24f   : > { %v3936_v56 = vpop.f32.mrb[16].mxu1 }
 0x250   : > { %v1025_v51 = vadd.f32 %v3936_v56, %v5700_v47  ;;  %v1019_v57 = vpop.f32.mrb[17].mxu1 }
 0x251   : > { %v1020_v3 = vadd.f32 %v5700_v47, %v1019_v57 }
 0x252   : > { %v1211_v37 = vmul.f32 0.70710677, %v1025_v51  ;;  %v1179_v24 = vmul.f32 0.5, %v1025_v51 }
 0x253   : > { %v1210_v58 = vmul.f32 0.70710677, %v1020_v3  ;;  %v3939_v59 = vpop.f32.mrb[18].mxu1  ;;  %v1178_v35 = vmul.f32 0.5, %v1020_v3 }
 0x254   : > { %4657 = verf.f32 %v1211_v37  ;;  %v1035_v21 = vadd.f32 %v3939_v59, %v5700_v47  ;;  %v1029_v61 = vpop.f32.mrb[19].mxu1 }
 0x255   : > { %4659 = verf.f32 %v1210_v58  ;;  %v1030_v40 = vadd.f32 %v5700_v47, %v1029_v61 }
 0x256   : > { %v1213_v63 = vmul.f32 0.70710677, %v1035_v21  ;;  %v1181_v39 = vmul.f32 0.5, %v1035_v21 }
 0x257   : > { %v1212_v2 = vmul.f32 0.70710677, %v1030_v40  ;;  %v3942_v4 = vpop.f32.mrb[20].mxu1  ;;  %v1180_v36 = vmul.f32 0.5, %v1030_v40 }
 0x258   : > { %4661 = verf.f32 %v1213_v63  ;;  %v5707_v55 = vadd.f32 %v3942_v4, %v5700_v47  ;;  %v1039_v43 = vpop.f32.mrb[21].mxu1 }
 0x259   : > { %4663 = verf.f32 %v1212_v2  ;;  %v1040_v9 = vadd.f32 %v5700_v47, %v1039_v43 }
 0x25a   : > { %v1215_v62 = vmul.f32 0.70710677, %v5707_v55  ;;  %v1183_v37 = vmul.f32 0.5, %v5707_v55 }
 0x25b   : > { %v1214_v44 = vmul.f32 0.70710677, %v1040_v9  ;;  %v3945_v10 = vpop.f32.mrb[22].mxu1  ;;  %v1182_v56 = vmul.f32 0.5, %v1040_v9 }
 0x25c   : > { %4665 = verf.f32 %v1215_v62  ;;  %v5712_v11 = vadd.f32 %v3945_v10, %v5700_v47  ;;  %v1049_v12 = vpop.f32.mrb[23].mxu1 }
 0x25d   : > { %4667 = verf.f32 %v1214_v44  ;;  %v5715_v27 = vadd.f32 %v5700_v47, %v1049_v12 }
 0x25e   : > { %v4658_v22 = vpop.eup %4657  ;;  %v1217_v13 = vmul.f32 0.70710677, %v5712_v11  ;;  %v1185_v44 = vmul.f32 0.5, %v5712_v11 }
 0x25f   : > { %v4660_v7 = vpop.eup %4659  ;;  %v1275_v8 = vadd.f32 1.0, %v4658_v22  ;;  %v1216_v52 = vmul.f32 0.70710677, %v5715_v27  ;;  %v3948_v0 = vpop.f32.mrb[24].mxu1  ;;  %v1184_v43 = vmul.f32 0.5, %v5715_v27 }
 0x260   : > { %v1274_v15 = vadd.f32 1.0, %v4660_v7  ;;  %4669 = verf.f32 %v1217_v13  ;;  %v5720_v16 = vadd.f32 %v3948_v0, %v5700_v47  ;;  %v1059_v18 = vpop.f32.mrb[25].mxu1 }
 0x261   : > { %4671 = verf.f32 %v1216_v52  ;;  %v5729_v42 = vadd.f32 %v5700_v47, %v1059_v18  ;;  %v1307_v6 = vmul.f32 %v1275_v8, %v1179_v24 }
 0x262   : > { %v4662_v26 = vpop.eup %4661  ;;  %v1219_v50 = vmul.f32 0.70710677, %v5720_v16  ;;  %v1306_v5 = vmul.f32 %v1274_v15, %v1178_v35  ;;  %v1187_v19 = vmul.f32 0.5, %v5720_v16 }
 0x263   : > { %v4664_v28 = vpop.eup %4663  ;;  %v1277_v29 = vadd.f32 1.0, %v4662_v26  ;;  %v1218_v1 = vmul.f32 0.70710677, %v5729_v42  ;;  %v3951_v31 = vpop.f32.mrb[26].mxu1  ;;  %v1186_v35 = vmul.f32 0.5, %v5729_v42 }
 0x264   : > { %v1276_v33 = vadd.f32 1.0, %v4664_v28  ;;  %4673 = verf.f32 %v1219_v50  ;;  %v5734_v45 = vadd.f32 %v3951_v31, %v5700_v47  ;;  %v1069_v34 = vpop.f32.mrb[27].mxu1  ;;  %4014 = vmatprep.mubr.f32.mxu0 %v1306_v5 }
 0x265   : > { %4675 = verf.f32 %v1218_v1  ;;  %v5743_v41 = vadd.f32 %v5700_v47, %v1069_v34  ;;  %4015 = vmatmul.mubr.f32.vlgmr.msra.gmra.mrb[16].mxu0 %v1307_v6  ;;  %v1309_v46 = vmul.f32 %v1277_v29, %v1181_v39 }
 0x266   : > { %v4666_v30 = vpop.eup %4665  ;;  %v1221_v23 = vmul.f32 0.70710677, %v5734_v45  ;;  %v1308_v48 = vmul.f32 %v1276_v33, %v1180_v36  ;;  %4465 = vmatpush3.bf16.msra.mxu0 %v5676_v14  ;;  %v1189_v36 = vmul.f32 0.5, %v5734_v45 }
 0x267   : > { %v4668_v25 = vpop.eup %4667  ;;  %v1279_v60 = vadd.f32 1.0, %v4666_v30  ;;  %v1220_v17 = vmul.f32 0.70710677, %v5743_v41  ;;  %v3954_v49 = vpop.f32.mrb[28].mxu1  ;;  %4467 = vmatprep.subr.bf16.mxu0 %v4466_v32  ;;  %v1188_v1 = vmul.f32 0.5, %v5743_v41 }
 0x268   : > { %v1278_v51 = vadd.f32 1.0, %v4668_v25  ;;  %4677 = verf.f32 %v1221_v23  ;;  %v5749_v57 = vadd.f32 %v3954_v49, %v5700_v47  ;;  %v1079_v3 = vpop.f32.mrb[29].mxu1  ;;  %4017 = vmatprep.mubr.f32.mxu0 %v1308_v48 }
 0x269   : > { %4679 = verf.f32 %v1220_v17  ;;  %v5753_v14 = vadd.f32 %v5700_v47, %v1079_v3  ;;  %4018 = vmatmul.mubr.f32.gmra.mrb[18].mxu0 %v1309_v46  ;;  %v1311_v4 = vmul.f32 %v1279_v60, %v1183_v37 }
 0x26a   : > { %v4670_v58 = vpop.eup %4669  ;;  %v1223_v59 = vmul.f32 0.70710677, %v5749_v57  ;;  %v1310_v21 = vmul.f32 %v1278_v51, %v1182_v56  ;;  %4469 = vmatpush3.bf16.msra.mxu0 %v4466_v32  ;;  %v1191_v49 = vmul.f32 0.5, %v5749_v57 }
 0x26b   : > { %v4672_v61 = vpop.eup %4671  ;;  %v1281_v40 = vadd.f32 1.0, %v4670_v58  ;;  %v1222_v63 = vmul.f32 0.70710677, %v5753_v14  ;;  %v3957_v2 = vpop.f32.mrb[30].mxu1  ;;  %4471 = vmatprep.subr.bf16.mxu0 %v4470_v53  ;;  %v1190_v25 = vmul.f32 0.5, %v5753_v14 }
 0x26c   : > { %v1280_v55 = vadd.f32 1.0, %v4672_v61  ;;  %4681 = verf.f32 %v1223_v59  ;;  %v5759_v9 = vadd.f32 %v3957_v2, %v5700_v47  ;;  %v1089_v62 = vpop.f32.mrb[31].mxu1  ;;  %4020 = vmatprep.mubr.f32.mxu0 %v1310_v21 }
 0x26d   : > { %4683 = verf.f32 %v1222_v63  ;;  %v5763_v10 = vadd.f32 %v5700_v47, %v1089_v62  ;;  %4021 = vmatmul.mubr.f32.gmra.mrb[20].mxu0 %v1311_v4  ;;  %v1313_v0 = vmul.f32 %v1281_v40, %v1185_v44 }
 0x26e   : > { %v4674_v12 = vpop.eup %4673  ;;  %v1225_v22 = vmul.f32 0.70710677, %v5759_v9  ;;  %v1312_v13 = vmul.f32 %v1280_v55, %v1184_v43  ;;  %4473 = vmatpush3.bf16.msra.mxu0 %v4470_v53  ;;  %v1193_v63 = vmul.f32 0.5, %v5759_v9 }
 0x26f   : > { %v4676_v27 = vpop.eup %4675  ;;  %v1283_v7 = vadd.f32 1.0, %v4674_v12  ;;  %v1224_v8 = vmul.f32 0.70710677, %v5763_v10  ;;  %v3960_v52 = vpop.f32.mrb[32].mxu1  ;;  %v1192_v21 = vmul.f32 0.5, %v5763_v10 }
 0x270   : > { %v1282_v15 = vadd.f32 1.0, %v4676_v27  ;;  %4685 = verf.f32 %v1225_v22  ;;  %v5769_v11 = vadd.f32 %v3960_v52, %v5700_v47  ;;  %v1099_v18 = vpop.f32.mrb[33].mxu1  ;;  %4023 = vmatprep.mubr.f32.mxu0 %v1312_v13 }
 0x271   : > { %4687 = verf.f32 %v1224_v8  ;;  %v5773_v20 = vadd.f32 %v5700_v47, %v1099_v18  ;;  %4024 = vmatmul.mubr.f32.gmra.mrb[22].mxu0 %v1313_v0  ;;  %v1315_v29 = vmul.f32 %v1283_v7, %v1187_v19 }
 0x272   : > { %v4678_v24 = vpop.eup %4677  ;;  %v1227_v26 = vmul.f32 0.70710677, %v5769_v11  ;;  %v1314_v50 = vmul.f32 %v1282_v15, %v1186_v35  ;;  %v1195_v8 = vmul.f32 0.5, %v5769_v11 }
 0x273   : > { %v4680_v5 = vpop.eup %4679  ;;  %v1285_v42 = vadd.f32 1.0, %v4678_v24  ;;  %v1226_v28 = vmul.f32 0.70710677, %v5773_v20  ;;  %v3963_v6 = vpop.f32.mrb[34].mxu1  ;;  %v1194_v13 = vmul.f32 0.5, %v5773_v20 }
 0x274   : > { %v1284_v31 = vadd.f32 1.0, %v4680_v5  ;;  %4689 = verf.f32 %v1227_v26  ;;  %v5779_v16 = vadd.f32 %v3963_v6, %v5700_v47  ;;  %v1109_v32 = vpop.f32.mrb[35].mxu1  ;;  %4026 = vmatprep.mubr.f32.mxu0 %v1314_v50 }
 0x275   : > { %4691 = verf.f32 %v1226_v28  ;;  %v5783_v33 = vadd.f32 %v5700_v47, %v1109_v32  ;;  %4027 = vmatmul.mubr.f32.gmra.mrb[24].mxu0 %v1315_v29  ;;  %v1317_v48 = vmul.f32 %v1285_v42, %v1189_v36 }
 0x276   : > { %v4682_v34 = vpop.eup %4681  ;;  %v1229_v38 = vmul.f32 0.70710677, %v5779_v16  ;;  %v1316_v54 = vmul.f32 %v1284_v31, %v1188_v1  ;;  %v1197_v28 = vmul.f32 0.5, %v5779_v16 }
 0x277   : > { %v4684_v39 = vpop.eup %4683  ;;  %v1287_v41 = vadd.f32 1.0, %v4682_v34  ;;  %v1228_v30 = vmul.f32 0.70710677, %v5783_v33  ;;  %v3966_v23 = vpop.f32.mrb[36].mxu1  ;;  %v1196_v50 = vmul.f32 0.5, %v5783_v33 }
 0x278   : > { %v1286_v60 = vadd.f32 1.0, %v4684_v39  ;;  %4693 = verf.f32 %v1229_v38  ;;  %v5789_v45 = vadd.f32 %v3966_v23, %v5700_v47  ;;  %v1119_v17 = vpop.f32.mrb[37].mxu1  ;;  %4029 = vmatprep.mubr.f32.mxu0 %v1316_v54 }
 0x279   : > { %4695 = verf.f32 %v1228_v30  ;;  %v5793_v46 = vadd.f32 %v5700_v47, %v1119_v17  ;;  %4030 = vmatmul.mubr.f32.gmra.mrb[26].mxu0 %v1317_v48  ;;  %v1319_v59 = vmul.f32 %v1287_v41, %v1191_v49 }
 0x27a   : > { %v4686_v53 = vpop.eup %4685  ;;  %v1231_v56 = vmul.f32 0.70710677, %v5789_v45  ;;  %v1318_v51 = vmul.f32 %v1286_v60, %v1190_v25  ;;  %v1199_v30 = vmul.f32 0.5, %v5789_v45 }
 0x27b   : > { %v4688_v3 = vpop.eup %4687  ;;  %v1289_v37 = vadd.f32 1.0, %v4686_v53  ;;  %v1230_v14 = vmul.f32 0.70710677, %v5793_v46  ;;  %v3969_v58 = vpop.f32.mrb[38].mxu1  ;;  %v1198_v54 = vmul.f32 0.5, %v5793_v46 }
 0x27c   : > { %v1288_v61 = vadd.f32 1.0, %v4688_v3  ;;  %4697 = verf.f32 %v1231_v56  ;;  %v5799_v57 = vadd.f32 %v3969_v58, %v5700_v47  ;;  %v1129_v40 = vpop.f32.mrb[39].mxu1  ;;  %4032 = vmatprep.mubr.f32.mxu0 %v1318_v51 }
 0x27d   : > { %4699 = verf.f32 %v1230_v14  ;;  %v5803_v2 = vadd.f32 %v5700_v47, %v1129_v40  ;;  %4033 = vmatmul.mubr.f32.gmra.mrb[28].mxu0 %v1319_v59  ;;  %v1321_v22 = vmul.f32 %v1289_v37, %v1193_v63 }
 0x27e   : > { %v4690_v4 = vpop.eup %4689  ;;  %v1233_v43 = vmul.f32 0.70710677, %v5799_v57  ;;  %v1320_v55 = vmul.f32 %v1288_v61, %v1192_v21  ;;  %v1201_v45 = vmul.f32 0.5, %v5799_v57 }
 0x27f   : > { %v4692_v62 = vpop.eup %4691  ;;  %v1291_v44 = vadd.f32 1.0, %v4690_v4  ;;  %v1232_v10 = vmul.f32 0.70710677, %v5803_v2  ;;  %v3972_v12 = vpop.f32.mrb[40].mxu1  ;;  %v1200_v51 = vmul.f32 0.5, %v5803_v2 }
 0x280   : > { %v1290_v27 = vadd.f32 1.0, %v4692_v62  ;;  %4701 = verf.f32 %v1233_v43  ;;  %v5809_v9 = vadd.f32 %v3972_v12, %v5700_v47  ;;  %v1139_v7 = vpop.f32.mrb[41].mxu1  ;;  %4035 = vmatprep.mubr.f32.mxu0 %v1320_v55 }
 0x281   : > { %4703 = verf.f32 %v1232_v10  ;;  %v5813_v52 = vadd.f32 %v5700_v47, %v1139_v7  ;;  %4036 = vmatmul.mubr.f32.gmra.mrb[30].mxu0 %v1321_v22  ;;  %v1323_v26 = vmul.f32 %v1291_v44, %v1195_v8 }
 0x282   : > { %v4694_v0 = vpop.eup %4693  ;;  %v1235_v35 = vmul.f32 0.70710677, %v5809_v9  ;;  %v1322_v15 = vmul.f32 %v1290_v27, %v1194_v13  ;;  %v1203_v62 = vmul.f32 0.5, %v5809_v9 }
 0x283   : > { %v4696_v18 = vpop.eup %4695  ;;  %v1293_v19 = vadd.f32 1.0, %v4694_v0  ;;  %v1234_v20 = vmul.f32 0.70710677, %v5813_v52  ;;  %v3975_v24 = vpop.f32.mrb[42].mxu1  ;;  %v1202_v2 = vmul.f32 0.5, %v5813_v52 }
 0x284   : > { %v1292_v5 = vadd.f32 1.0, %v4696_v18  ;;  %4705 = verf.f32 %v1235_v35  ;;  %v5819_v11 = vadd.f32 %v3975_v24, %v5700_v47  ;;  %v1149_v42 = vpop.f32.mrb[43].mxu1  ;;  %4038 = vmatprep.mubr.f32.mxu0 %v1322_v15 }
 0x285   : > { %4707 = verf.f32 %v1234_v20  ;;  %v1150_v6 = vadd.f32 %v5700_v47, %v1149_v42  ;;  %4039 = vmatmul.mubr.f32.gmra.mrb[32].mxu0 %v1323_v26  ;;  %v1325_v38 = vmul.f32 %v1293_v19, %v1197_v28 }
 0x286   : > { %v4698_v29 = vpop.eup %4697  ;;  %v1237_v1 = vmul.f32 0.70710677, %v5819_v11  ;;  %v1324_v31 = vmul.f32 %v1292_v5, %v1196_v50  ;;  %v1205_v27 = vmul.f32 0.5, %v5819_v11 }
 0x287   : > { %v4700_v32 = vpop.eup %4699  ;;  %v1295_v36 = vadd.f32 1.0, %v4698_v29  ;;  %v1236_v33 = vmul.f32 0.70710677, %v1150_v6  ;;  %v3978_v34 = vpop.f32.mrb[44].mxu1  ;;  %v1204_v22 = vmul.f32 0.5, %v1150_v6  ;;  %v2353_v29 = vld [vmem:[%s6659_s9 + $0x30] sm:$0xff] }
 0x288   : > { %v1294_v39 = vadd.f32 1.0, %v4700_v32  ;;  %4709 = verf.f32 %v1237_v1  ;;  %v1165_v41 = vadd.f32 %v3978_v34, %v5700_v47  ;;  %v1159_v16 = vpop.f32.mrb[45].mxu1  ;;  %4041 = vmatprep.mubr.f32.mxu0 %v1324_v31  ;;  %v2354_v1 = vld [vmem:[%s6659_s9 + $0x38] sm:$0xff]  ;;  %v2355_v32 = vld [vmem:[%s6659_s9 + $0x40] sm:$0xff]  ;;  %v2357_v34 = vld [vmem:[%s6659_s9 + $0x50] sm:$0xff] }
 0x289   : > { %4711 = verf.f32 %v1236_v33  ;;  %v1160_v23 = vadd.f32 %v5700_v47, %v1159_v16  ;;  %4042 = vmatmul.mubr.f32.gmra.mrb[34].mxu0 %v1325_v38  ;;  %v1327_v46 = vmul.f32 %v1295_v36, %v1199_v30  ;;  %v4474_v31 = vpack.c.bf16 %v2354_v1, %v2353_v29  ;;  %v2356_v36 = vld [vmem:[%s6659_s9 + $0x48] sm:$0xff]  ;;  %v2358_v38 = vld [vmem:[%s6659_s9 + $0x58] sm:$0xff]  ;;  %v2359_v16 = vld [vmem:[%s6659_s9 + $0x60] sm:$0xff] }
 0x28a   : > { %v4702_v48 = vpop.eup %4701  ;;  %v1239_v25 = vmul.f32 0.70710677, %v1165_v41  ;;  %v1326_v60 = vmul.f32 %v1294_v39, %v1198_v54  ;;  %v1207_v18 = vmul.f32 0.5, %v1165_v41  ;;  %v4478_v33 = vpack.c.bf16 %v2356_v36, %v2355_v32  ;;  %v1758_v39 = vld [vmem:[%s6657_s7 + $0x60] sm:$0xff]  ;;  %v1759_v41 = vld [vmem:[%s6657_s7 + $0x68] sm:$0xff] }
 0x28b   : > { %v4704_v17 = vpop.eup %4703  ;;  %v1297_v49 = vadd.f32 1.0, %v4702_v48  ;;  %v1238_v53 = vmul.f32 0.70710677, %v1160_v23  ;;  %v3981_v56 = vpop.f32.mrb[46].mxu1  ;;  %v1206_v15 = vmul.f32 0.5, %v1160_v23  ;;  %4475 = vmatprep.subr.bf16.mxu0 %v4474_v31  ;;  %v4482_v54 = vpack.c.bf16 %v2358_v38, %v2357_v34  ;;  %v2360_v23 = vld [vmem:[%s6659_s9 + $0x68] sm:$0xff] }
 0x28c   : > { %v1296_v3 = vadd.f32 1.0, %v4704_v17  ;;  %4713 = verf.f32 %v1239_v25  ;;  %v1175_v37 = vadd.f32 %v3981_v56, %v5700_v47  ;;  %v1169_v14 = vpop.f32.mrb[47].mxu1  ;;  %4044 = vmatprep.mubr.f32.mxu0 %v1326_v60  ;;  %4477 = vmatpush3.bf16.msra.mxu0 %v4474_v31  ;;  %v4454_v30 = vpack.c.bf16 %v1759_v41, %v1758_v39  ;;  %v1760_v25 = vld [vmem:[%s6657_s7 + $0x70] sm:$0xff]  ;;  %v1761_v60 = vld [vmem:[%s6657_s7 + $0x78] sm:$0xff] }
 0x28d   : > { %4715 = verf.f32 %v1238_v53  ;;  %v1170_v58 = vadd.f32 %v5700_v47, %v1169_v14  ;;  %4045 = vmatmul.mubr.f32.gmra.mrb[36].mxu0 %v1327_v46  ;;  %v1329_v43 = vmul.f32 %v1297_v49, %v1201_v45  ;;  %4479 = vmatprep.subr.bf16.mxu0 %v4478_v33  ;;  %v4486_v48 = vpack.c.bf16 %v2360_v23, %v2359_v16  ;;  %v2361_v17 = vld [vmem:[%s6659_s9 + $0x70] sm:$0xff]  ;;  %v2362_v53 = vld [vmem:[%s6659_s9 + $0x78] sm:$0xff]  ;;  %v5880_v46 = vld [vmem:[%s6656_s6] ss:$0 sm:$0xff] }
 0x28e   : > { %v4706_v59 = vpop.eup %4705  ;;  %v1241_v21 = vmul.f32 0.70710677, %v1175_v37  ;;  %v1328_v61 = vmul.f32 %v1296_v3, %v1200_v51  ;;  %v1209_v11 = vmul.f32 0.5, %v1175_v37  ;;  %4455 = vmatprep.subr.bf16.mxu1 %v4454_v30  ;;  %v4458_v49 = vpack.c.bf16 %v1761_v60, %v1760_v25 }
 0x28f   : > { %v4708_v40 = vpop.eup %4707  ;;  %v1299_v63 = vadd.f32 1.0, %v4706_v59  ;;  %v1240_v4 = vmul.f32 0.70710677, %v1170_v58  ;;  %v1208_v5 = vmul.f32 0.5, %v1170_v58  ;;  %4457 = vmatpush3.bf16.msra.mxu1 %v4454_v30  ;;  %v4490_v56 = vpack.c.bf16 %v2362_v53, %v2361_v17 }
 0x290   : > { %v1298_v55 = vadd.f32 1.0, %v4708_v40  ;;  %4717 = verf.f32 %v1241_v21  ;;  %4047 = vmatprep.mubr.f32.mxu0 %v1328_v61  ;;  %4481 = vmatpush3.bf16.msra.mxu0 %v4478_v33 }
 0x291   : > { %4719 = verf.f32 %v1240_v4  ;;  %4048 = vmatmul.mubr.f32.gmra.mrb[38].mxu0 %v1329_v43  ;;  %v1331_v12 = vmul.f32 %v1299_v63, %v1203_v62  ;;  %4483 = vmatprep.subr.bf16.mxu0 %v4482_v54 }
 0x292   : > { %v4710_v57 = vpop.eup %4709  ;;  %v1330_v44 = vmul.f32 %v1298_v55, %v1202_v2  ;;  %4459 = vmatprep.subr.bf16.mxu1 %v4458_v49 }
 0x293   : > { %v4712_v47 = vpop.eup %4711  ;;  %v1301_v10 = vadd.f32 1.0, %v4710_v57  ;;  %4461 = vmatpush3.bf16.msra.mxu1 %v4458_v49 }
 0x294   : > { %v1300_v13 = vadd.f32 1.0, %v4712_v47  ;;  %4050 = vmatprep.mubr.f32.mxu0 %v1330_v44  ;;  %4485 = vmatpush3.bf16.msra.mxu0 %v4482_v54 }
 0x295   : > { %4051 = vmatmul.mubr.f32.gmra.mrb[40].mxu0 %v1331_v12  ;;  %v1333_v35 = vmul.f32 %v1301_v10, %v1205_v27  ;;  %4487 = vmatprep.subr.bf16.mxu0 %v4486_v48 }
 0x296   : > { %v4714_v7 = vpop.eup %4713  ;;  %v1332_v8 = vmul.f32 %v1300_v13, %v1204_v22 }
 0x297   : > { %v4716_v52 = vpop.eup %4715  ;;  %v1303_v0 = vadd.f32 1.0, %v4714_v7 }
 0x298   : > { %v1302_v9 = vadd.f32 1.0, %v4716_v52  ;;  %4053 = vmatprep.mubr.f32.mxu0 %v1332_v8  ;;  %4489 = vmatpush3.bf16.msra.mxu0 %v4486_v48 }
 0x299   : > { %4054 = vmatmul.mubr.f32.gmra.mrb[42].mxu0 %v1333_v35  ;;  %v1335_v50 = vmul.f32 %v1303_v0, %v1207_v18  ;;  %4491 = vmatprep.subr.bf16.mxu0 %v4490_v56 }
 0x29a   : > { %v4718_v19 = vpop.eup %4717  ;;  %v1334_v20 = vmul.f32 %v1302_v9, %v1206_v15 }
 0x29b   : > { %v4720_v24 = vpop.eup %4719  ;;  %v1305_v26 = vadd.f32 1.0, %v4718_v19 }
 0x29c   : > { %v1304_v42 = vadd.f32 1.0, %v4720_v24  ;;  %4056 = vmatprep.mubr.f32.mxu0 %v1334_v20  ;;  %4493 = vmatpush3.bf16.msra.mxu0 %v4490_v56 }
 0x29d   : > { %4057 = vmatmul.mubr.f32.gmra.mrb[44].mxu0 %v1335_v50  ;;  %v1337_v6 = vmul.f32 %v1305_v26, %v1209_v11 }
 0x29e   : > { %v1336_v28 = vmul.f32 %v1304_v42, %v1208_v5 }
 0x2a0   : > { %4059 = vmatprep.mubr.f32.mxu0 %v1336_v28 }
 0x2a1   : > { %4060 = vmatmul.mubr.f32.gmra.mrb[46].mxu0 %v1337_v6 }
 0x338   : > { %v4016_v51 = vpop.f32.mrb[16].mxu0 }
 0x339   : > { %v1433_v3 = vadd.f32 %v4016_v51, %v5880_v46  ;;  %v1427_v37 = vpop.f32.mrb[17].mxu0 }
 0x33a   : > { %v1428_v14 = vadd.f32 %v5880_v46, %v1427_v37 }
 0x33b   : > { %v1619_v45 = vmul.f32 0.70710677, %v1433_v3  ;;  %v1587_v19 = vmul.f32 0.5, %v1433_v3 }
 0x33c   : > { %v1618_v58 = vmul.f32 0.70710677, %v1428_v14  ;;  %v4019_v59 = vpop.f32.mrb[18].mxu0  ;;  %v1586_v35 = vmul.f32 0.5, %v1428_v14 }
 0x33d   : > { %4721 = verf.f32 %v1619_v45  ;;  %v1443_v21 = vadd.f32 %v4019_v59, %v5880_v46  ;;  %v1437_v61 = vpop.f32.mrb[19].mxu0 }
 0x33e   : > { %4723 = verf.f32 %v1618_v58  ;;  %v1438_v40 = vadd.f32 %v5880_v46, %v1437_v61 }
 0x33f   : > { %v1621_v63 = vmul.f32 0.70710677, %v1443_v21  ;;  %v1589_v36 = vmul.f32 0.5, %v1443_v21 }
 0x340   : > { %v1620_v4 = vmul.f32 0.70710677, %v1438_v40  ;;  %v4022_v43 = vpop.f32.mrb[20].mxu0  ;;  %v1588_v29 = vmul.f32 0.5, %v1438_v40 }
 0x341   : > { %4725 = verf.f32 %v1621_v63  ;;  %v1453_v2 = vadd.f32 %v4022_v43, %v5880_v46  ;;  %v1447_v55 = vpop.f32.mrb[21].mxu0 }
 0x342   : > { %4727 = verf.f32 %v1620_v4  ;;  %v1448_v62 = vadd.f32 %v5880_v46, %v1447_v55 }
 0x343   : > { %v1623_v57 = vmul.f32 0.70710677, %v1453_v2  ;;  %v1591_v49 = vmul.f32 0.5, %v1453_v2 }
 0x344   : > { %v1622_v44 = vmul.f32 0.70710677, %v1448_v62  ;;  %v4025_v47 = vpop.f32.mrb[22].mxu0  ;;  %v1590_v48 = vmul.f32 0.5, %v1448_v62 }
 0x345   : > { %4729 = verf.f32 %v1623_v57  ;;  %v5889_v10 = vadd.f32 %v4025_v47, %v5880_v46  ;;  %v1457_v12 = vpop.f32.mrb[23].mxu0 }
 0x346   : > { %4731 = verf.f32 %v1622_v44  ;;  %v5892_v22 = vadd.f32 %v5880_v46, %v1457_v12 }
 0x347   : > { %v4722_v13 = vpop.eup %4721  ;;  %v1625_v27 = vmul.f32 0.70710677, %v5889_v10  ;;  %v1593_v4 = vmul.f32 0.5, %v5889_v10 }
 0x348   : > { %v4724_v7 = vpop.eup %4723  ;;  %v1683_v8 = vadd.f32 1.0, %v4722_v13  ;;  %v1624_v52 = vmul.f32 0.70710677, %v5892_v22  ;;  %v4028_v0 = vpop.f32.mrb[24].mxu0  ;;  %v1592_v21 = vmul.f32 0.5, %v5892_v22 }
 0x349   : > { %v1682_v15 = vadd.f32 1.0, %v4724_v7  ;;  %4733 = verf.f32 %v1625_v27  ;;  %v5897_v9 = vadd.f32 %v4028_v0, %v5880_v46  ;;  %v1467_v18 = vpop.f32.mrb[25].mxu0 }
 0x34a   : > { %4735 = verf.f32 %v1624_v52  ;;  %v5900_v20 = vadd.f32 %v5880_v46, %v1467_v18  ;;  %v1715_v42 = vmul.f32 %v1683_v8, %v1587_v19 }
 0x34b   : > { %v4726_v24 = vpop.eup %4725  ;;  %v1627_v26 = vmul.f32 0.70710677, %v5897_v9  ;;  %v1714_v50 = vmul.f32 %v1682_v15, %v1586_v35  ;;  %v1595_v8 = vmul.f32 0.5, %v5897_v9 }
 0x34c   : > { %v4728_v5 = vpop.eup %4727  ;;  %v1685_v11 = vadd.f32 1.0, %v4726_v24  ;;  %v1626_v28 = vmul.f32 0.70710677, %v5900_v20  ;;  %v4031_v6 = vpop.f32.mrb[26].mxu0  ;;  %v1594_v13 = vmul.f32 0.5, %v5900_v20 }
 0x34d   : > { %v1684_v1 = vadd.f32 1.0, %v4728_v5  ;;  %4737 = verf.f32 %v1627_v26  ;;  %v5905_v31 = vadd.f32 %v4031_v6, %v5880_v46  ;;  %v1477_v32 = vpop.f32.mrb[27].mxu0  ;;  %4094 = vmatprep.mubr.f32.mxu1 %v1714_v50  ;;  %4174 = vmatprep.mubr.f32.mxu0 %v1714_v50 }
 0x34e   : > { %4739 = verf.f32 %v1626_v28  ;;  %v5908_v33 = vadd.f32 %v5880_v46, %v1477_v32  ;;  %4095 = vmatmul.mubr.f32.vlgmr.msra.gmra.mrb[48].mxu1 %v1715_v42  ;;  %4175 = vmatmul.mubr.f32.vlgmr.msra.gmra.mrb[48].mxu0 %v1715_v42  ;;  %v1717_v23 = vmul.f32 %v1685_v11, %v1589_v36 }
 0x34f   : > { %v4730_v34 = vpop.eup %4729  ;;  %v1629_v38 = vmul.f32 0.70710677, %v5905_v31  ;;  %v1716_v54 = vmul.f32 %v1684_v1, %v1588_v29  ;;  %v1597_v11 = vmul.f32 0.5, %v5905_v31 }
 0x350   : > { %v4732_v39 = vpop.eup %4731  ;;  %v1687_v41 = vadd.f32 1.0, %v4730_v34  ;;  %v1628_v16 = vmul.f32 0.70710677, %v5908_v33  ;;  %v4034_v30 = vpop.f32.mrb[28].mxu0  ;;  %v1596_v50 = vmul.f32 0.5, %v5908_v33 }
 0x351   : > { %v1686_v25 = vadd.f32 1.0, %v4732_v39  ;;  %4741 = verf.f32 %v1629_v38  ;;  %v5913_v60 = vadd.f32 %v4034_v30, %v5880_v46  ;;  %v1487_v17 = vpop.f32.mrb[29].mxu0  ;;  %4097 = vmatprep.mubr.f32.mxu1 %v1716_v54  ;;  %4177 = vmatprep.mubr.f32.mxu0 %v1716_v54 }
 0x352   : > { %4743 = verf.f32 %v1628_v16  ;;  %v5916_v53 = vadd.f32 %v5880_v46, %v1487_v17  ;;  %4098 = vmatmul.mubr.f32.gmra.mrb[50].mxu1 %v1717_v23  ;;  %4178 = vmatmul.mubr.f32.gmra.mrb[50].mxu0 %v1717_v23  ;;  %v1719_v59 = vmul.f32 %v1687_v41, %v1591_v49 }
 0x353   : > { %v4734_v56 = vpop.eup %4733  ;;  %v1631_v51 = vmul.f32 0.70710677, %v5913_v60  ;;  %v1718_v3 = vmul.f32 %v1686_v25, %v1590_v48  ;;  %v1599_v16 = vmul.f32 0.5, %v5913_v60 }
 0x354   : > { %v4736_v37 = vpop.eup %4735  ;;  %v1689_v14 = vadd.f32 1.0, %v4734_v56  ;;  %v1630_v45 = vmul.f32 0.70710677, %v5916_v53  ;;  %v4037_v58 = vpop.f32.mrb[30].mxu0  ;;  %v1598_v54 = vmul.f32 0.5, %v5916_v53 }
 0x355   : > { %v1688_v61 = vadd.f32 1.0, %v4736_v37  ;;  %4745 = verf.f32 %v1631_v51  ;;  %v5922_v40 = vadd.f32 %v4037_v58, %v5880_v46  ;;  %v1497_v63 = vpop.f32.mrb[31].mxu0  ;;  %4100 = vmatprep.mubr.f32.mxu1 %v1718_v3  ;;  %4180 = vmatprep.mubr.f32.mxu0 %v1718_v3 }
 0x356   : > { %4747 = verf.f32 %v1630_v45  ;;  %v5926_v43 = vadd.f32 %v5880_v46, %v1497_v63  ;;  %4101 = vmatmul.mubr.f32.gmra.mrb[52].mxu1 %v1719_v59  ;;  %4181 = vmatmul.mubr.f32.gmra.mrb[52].mxu0 %v1719_v59  ;;  %v1721_v22 = vmul.f32 %v1689_v14, %v1593_v4 }
 0x357   : > { %v4738_v2 = vpop.eup %4737  ;;  %v1633_v55 = vmul.f32 0.70710677, %v5922_v40  ;;  %v1720_v62 = vmul.f32 %v1688_v61, %v1592_v21  ;;  %v1601_v45 = vmul.f32 0.5, %v5922_v40 }
 0x358   : > { %v4740_v57 = vpop.eup %4739  ;;  %v1691_v44 = vadd.f32 1.0, %v4738_v2  ;;  %v1632_v47 = vmul.f32 0.70710677, %v5926_v43  ;;  %v4040_v12 = vpop.f32.mrb[32].mxu0  ;;  %v1600_v3 = vmul.f32 0.5, %v5926_v43 }
 0x359   : > { %v1690_v27 = vadd.f32 1.0, %v4740_v57  ;;  %4749 = verf.f32 %v1633_v55  ;;  %v5932_v10 = vadd.f32 %v4040_v12, %v5880_v46  ;;  %v1507_v7 = vpop.f32.mrb[33].mxu0  ;;  %4103 = vmatprep.mubr.f32.mxu1 %v1720_v62  ;;  %4183 = vmatprep.mubr.f32.mxu0 %v1720_v62 }
 0x35a   : > { %4751 = verf.f32 %v1632_v47  ;;  %v5936_v52 = vadd.f32 %v5880_v46, %v1507_v7  ;;  %4104 = vmatmul.mubr.f32.gmra.mrb[54].mxu1 %v1721_v22  ;;  %4184 = vmatmul.mubr.f32.gmra.mrb[54].mxu0 %v1721_v22  ;;  %v1723_v26 = vmul.f32 %v1691_v44, %v1595_v8 }
 0x35b   : > { %v4742_v0 = vpop.eup %4741  ;;  %v1635_v35 = vmul.f32 0.70710677, %v5932_v10  ;;  %v1722_v15 = vmul.f32 %v1690_v27, %v1594_v13  ;;  %v1603_v47 = vmul.f32 0.5, %v5932_v10 }
 0x35c   : > { %v4744_v18 = vpop.eup %4743  ;;  %v1693_v19 = vadd.f32 1.0, %v4742_v0  ;;  %v1634_v20 = vmul.f32 0.70710677, %v5936_v52  ;;  %v4043_v24 = vpop.f32.mrb[34].mxu0  ;;  %v1602_v62 = vmul.f32 0.5, %v5936_v52 }
 0x35d   : > { %v1692_v5 = vadd.f32 1.0, %v4744_v18  ;;  %4753 = verf.f32 %v1635_v35  ;;  %v5942_v9 = vadd.f32 %v4043_v24, %v5880_v46  ;;  %v1517_v42 = vpop.f32.mrb[35].mxu0  ;;  %4106 = vmatprep.mubr.f32.mxu1 %v1722_v15  ;;  %4186 = vmatprep.mubr.f32.mxu0 %v1722_v15 }
 0x35e   : > { %4755 = verf.f32 %v1634_v20  ;;  %v5946_v28 = vadd.f32 %v5880_v46, %v1517_v42  ;;  %4107 = vmatmul.mubr.f32.gmra.mrb[56].mxu1 %v1723_v26  ;;  %4187 = vmatmul.mubr.f32.gmra.mrb[56].mxu0 %v1723_v26  ;;  %v1725_v38 = vmul.f32 %v1693_v19, %v1597_v11 }
 0x35f   : > { %v4746_v6 = vpop.eup %4745  ;;  %v1637_v29 = vmul.f32 0.70710677, %v5942_v9  ;;  %v1724_v1 = vmul.f32 %v1692_v5, %v1596_v50  ;;  %v1605_v20 = vmul.f32 0.5, %v5942_v9 }
 0x360   : > { %v4748_v32 = vpop.eup %4747  ;;  %v1695_v36 = vadd.f32 1.0, %v4746_v6  ;;  %v1636_v33 = vmul.f32 0.70710677, %v5946_v28  ;;  %v4046_v34 = vpop.f32.mrb[36].mxu0  ;;  %v1604_v15 = vmul.f32 0.5, %v5946_v28 }
 0x361   : > { %v1694_v39 = vadd.f32 1.0, %v4748_v32  ;;  %4757 = verf.f32 %v1637_v29  ;;  %v5952_v31 = vadd.f32 %v4046_v34, %v5880_v46  ;;  %v1527_v41 = vpop.f32.mrb[37].mxu0  ;;  %4109 = vmatprep.mubr.f32.mxu1 %v1724_v1  ;;  %4189 = vmatprep.mubr.f32.mxu0 %v1724_v1 }
 0x362   : > { %4759 = verf.f32 %v1636_v33  ;;  %v5956_v30 = vadd.f32 %v5880_v46, %v1527_v41  ;;  %4110 = vmatmul.mubr.f32.gmra.mrb[58].mxu1 %v1725_v38  ;;  %4190 = vmatmul.mubr.f32.gmra.mrb[58].mxu0 %v1725_v38  ;;  %v1727_v51 = vmul.f32 %v1695_v36, %v1599_v16 }
 0x363   : > { %v4750_v23 = vpop.eup %4749  ;;  %v1639_v48 = vmul.f32 0.70710677, %v5952_v31  ;;  %v1726_v25 = vmul.f32 %v1694_v39, %v1598_v54  ;;  %v1607_v33 = vmul.f32 0.5, %v5952_v31 }
 0x364   : > { %v4752_v17 = vpop.eup %4751  ;;  %v1697_v49 = vadd.f32 1.0, %v4750_v23  ;;  %v1638_v53 = vmul.f32 0.70710677, %v5956_v30  ;;  %v4049_v56 = vpop.f32.mrb[38].mxu0  ;;  %v1606_v1 = vmul.f32 0.5, %v5956_v30 }
 0x365   : > { %v1696_v37 = vadd.f32 1.0, %v4752_v17  ;;  %4761 = verf.f32 %v1639_v48  ;;  %v5962_v60 = vadd.f32 %v4049_v56, %v5880_v46  ;;  %v1537_v14 = vpop.f32.mrb[39].mxu0  ;;  %4112 = vmatprep.mubr.f32.mxu1 %v1726_v25  ;;  %4192 = vmatprep.mubr.f32.mxu0 %v1726_v25 }
 0x366   : > { %4763 = verf.f32 %v1638_v53  ;;  %v5966_v58 = vadd.f32 %v5880_v46, %v1537_v14  ;;  %4113 = vmatmul.mubr.f32.gmra.mrb[60].mxu1 %v1727_v51  ;;  %4193 = vmatmul.mubr.f32.gmra.mrb[60].mxu0 %v1727_v51  ;;  %v1729_v55 = vmul.f32 %v1697_v49, %v1601_v45 }
 0x367   : > { %v4754_v59 = vpop.eup %4753  ;;  %v1641_v21 = vmul.f32 0.70710677, %v5962_v60  ;;  %v1728_v61 = vmul.f32 %v1696_v37, %v1600_v3  ;;  %v1609_v53 = vmul.f32 0.5, %v5962_v60 }
 0x368   : > { %v4756_v63 = vpop.eup %4755  ;;  %v1699_v4 = vadd.f32 1.0, %v4754_v59  ;;  %v1640_v43 = vmul.f32 0.70710677, %v5966_v58  ;;  %v4052_v2 = vpop.f32.mrb[40].mxu0  ;;  %v1608_v25 = vmul.f32 0.5, %v5966_v58 }
 0x369   : > { %v1698_v57 = vadd.f32 1.0, %v4756_v63  ;;  %4765 = verf.f32 %v1641_v21  ;;  %v5972_v40 = vadd.f32 %v4052_v2, %v5880_v46  ;;  %v1547_v44 = vpop.f32.mrb[41].mxu0  ;;  %4115 = vmatprep.mubr.f32.mxu1 %v1728_v61  ;;  %4195 = vmatprep.mubr.f32.mxu0 %v1728_v61 }
 0x36a   : > { %4767 = verf.f32 %v1640_v43  ;;  %v5976_v12 = vadd.f32 %v5880_v46, %v1547_v44  ;;  %4116 = vmatmul.mubr.f32.gmra.mrb[62].mxu1 %v1729_v55  ;;  %4196 = vmatmul.mubr.f32.gmra.mrb[62].mxu0 %v1729_v55  ;;  %v1731_v35 = vmul.f32 %v1699_v4, %v1603_v47 }
 0x36b   : > { %v4758_v22 = vpop.eup %4757  ;;  %v1643_v13 = vmul.f32 0.70710677, %v5972_v40  ;;  %v1730_v27 = vmul.f32 %v1698_v57, %v1602_v62  ;;  %v1611_v60 = vmul.f32 0.5, %v5972_v40 }
 0x36c   : > { %v4760_v7 = vpop.eup %4759  ;;  %v1701_v8 = vadd.f32 1.0, %v4758_v22  ;;  %v1642_v52 = vmul.f32 0.70710677, %v5976_v12  ;;  %v4055_v0 = vpop.f32.mrb[42].mxu0  ;;  %v1610_v21 = vmul.f32 0.5, %v5976_v12 }
 0x36d   : > { %v1700_v18 = vadd.f32 1.0, %v4760_v7  ;;  %4769 = verf.f32 %v1643_v13  ;;  %v5982_v10 = vadd.f32 %v4055_v0, %v5880_v46  ;;  %v1557_v19 = vpop.f32.mrb[43].mxu0  ;;  %4118 = vmatprep.mubr.f32.mxu1 %v1730_v27  ;;  %4198 = vmatprep.mubr.f32.mxu0 %v1730_v27 }
 0x36e   : > { %4771 = verf.f32 %v1642_v52  ;;  %v5986_v24 = vadd.f32 %v5880_v46, %v1557_v19  ;;  %4119 = vmatmul.mubr.f32.gmra.mrb[64].mxu1 %v1731_v35  ;;  %4199 = vmatmul.mubr.f32.gmra.mrb[64].mxu0 %v1731_v35  ;;  %v1733_v29 = vmul.f32 %v1701_v8, %v1605_v20 }
 0x36f   : > { %v4762_v26 = vpop.eup %4761  ;;  %v1645_v50 = vmul.f32 0.70710677, %v5982_v10  ;;  %v1732_v5 = vmul.f32 %v1700_v18, %v1604_v15  ;;  %v1613_v57 = vmul.f32 0.5, %v5982_v10 }
 0x370   : > { %v4764_v42 = vpop.eup %4763  ;;  %v1703_v11 = vadd.f32 1.0, %v4762_v26  ;;  %v1644_v28 = vmul.f32 0.70710677, %v5986_v24  ;;  %v4058_v6 = vpop.f32.mrb[44].mxu0  ;;  %v1612_v55 = vmul.f32 0.5, %v5986_v24 }
 0x371   : > { %v1702_v32 = vadd.f32 1.0, %v4764_v42  ;;  %4773 = verf.f32 %v1645_v50  ;;  %v5992_v9 = vadd.f32 %v4058_v6, %v5880_v46  ;;  %v1567_v36 = vpop.f32.mrb[45].mxu0  ;;  %4121 = vmatprep.mubr.f32.mxu1 %v1732_v5  ;;  %4201 = vmatprep.mubr.f32.mxu0 %v1732_v5  ;;  %v6009_v26 = vld [vmem:[%s6658_s8] ss:$0 sm:$0xff] }
 0x372   : > { %4775 = verf.f32 %v1644_v28  ;;  %v1568_v34 = vadd.f32 %v5880_v46, %v1567_v36  ;;  %4122 = vmatmul.mubr.f32.gmra.mrb[66].mxu1 %v1733_v29  ;;  %4202 = vmatmul.mubr.f32.gmra.mrb[66].mxu0 %v1733_v29  ;;  %v1735_v48 = vmul.f32 %v1703_v11, %v1607_v33 }
 0x373   : > { %v4766_v38 = vpop.eup %4765  ;;  %v1647_v54 = vmul.f32 0.70710677, %v5992_v9  ;;  %v1734_v39 = vmul.f32 %v1702_v32, %v1606_v1  ;;  %v1615_v7 = vmul.f32 0.5, %v5992_v9 }
 0x374   : > { %v4768_v41 = vpop.eup %4767  ;;  %v1705_v16 = vadd.f32 1.0, %v4766_v38  ;;  %v1646_v30 = vmul.f32 0.70710677, %v1568_v34  ;;  %v4061_v23 = vpop.f32.mrb[46].mxu0  ;;  %v1614_v13 = vmul.f32 0.5, %v1568_v34 }
 0x375   : > { %v1704_v17 = vadd.f32 1.0, %v4768_v41  ;;  %4777 = verf.f32 %v1647_v54  ;;  %v1583_v31 = vadd.f32 %v4061_v23, %v5880_v46  ;;  %v1577_v49 = vpop.f32.mrb[47].mxu0  ;;  %4124 = vmatprep.mubr.f32.mxu1 %v1734_v39  ;;  %4204 = vmatprep.mubr.f32.mxu0 %v1734_v39 }
 0x376   : > { %4779 = verf.f32 %v1646_v30  ;;  %v1578_v56 = vadd.f32 %v5880_v46, %v1577_v49  ;;  %4125 = vmatmul.mubr.f32.gmra.mrb[68].mxu1 %v1735_v48  ;;  %4205 = vmatmul.mubr.f32.gmra.mrb[68].mxu0 %v1735_v48  ;;  %v1737_v59 = vmul.f32 %v1705_v16, %v1609_v53 }
 0x377   : > { %v4770_v51 = vpop.eup %4769  ;;  %v1649_v3 = vmul.f32 0.70710677, %v1583_v31  ;;  %v1736_v37 = vmul.f32 %v1704_v17, %v1608_v25  ;;  %v1617_v19 = vmul.f32 0.5, %v1583_v31 }
 0x378   : > { %v4772_v14 = vpop.eup %4771  ;;  %v1707_v45 = vadd.f32 1.0, %v4770_v51  ;;  %v1648_v58 = vmul.f32 0.70710677, %v1578_v56  ;;  %v1616_v18 = vmul.f32 0.5, %v1578_v56 }
 0x379   : > { %v1706_v61 = vadd.f32 1.0, %v4772_v14  ;;  %4781 = verf.f32 %v1649_v3  ;;  %4127 = vmatprep.mubr.f32.mxu1 %v1736_v37  ;;  %4207 = vmatprep.mubr.f32.mxu0 %v1736_v37 }
 0x37a   : > { %4783 = verf.f32 %v1648_v58  ;;  %4128 = vmatmul.mubr.f32.gmra.mrb[70].mxu1 %v1737_v59  ;;  %4208 = vmatmul.mubr.f32.gmra.mrb[70].mxu0 %v1737_v59  ;;  %v1739_v2 = vmul.f32 %v1707_v45, %v1611_v60 }
 0x37b   : > { %v4774_v46 = vpop.eup %4773  ;;  %v1738_v63 = vmul.f32 %v1706_v61, %v1610_v21 }
 0x37c   : > { %v4776_v4 = vpop.eup %4775  ;;  %v1709_v43 = vadd.f32 1.0, %v4774_v46 }
 0x37d   : > { %v1708_v62 = vadd.f32 1.0, %v4776_v4  ;;  %4130 = vmatprep.mubr.f32.mxu1 %v1738_v63  ;;  %4210 = vmatprep.mubr.f32.mxu0 %v1738_v63 }
 0x37e   : > { %4131 = vmatmul.mubr.f32.gmra.mrb[72].mxu1 %v1739_v2  ;;  %4211 = vmatmul.mubr.f32.gmra.mrb[72].mxu0 %v1739_v2  ;;  %v1741_v22 = vmul.f32 %v1709_v43, %v1613_v57 }
 0x37f   : > { %v4778_v44 = vpop.eup %4777  ;;  %v1740_v47 = vmul.f32 %v1708_v62, %v1612_v55 }
 0x380   : > { %v4780_v40 = vpop.eup %4779  ;;  %v1711_v12 = vadd.f32 1.0, %v4778_v44 }
 0x381   : > { %v1710_v27 = vadd.f32 1.0, %v4780_v40  ;;  %4133 = vmatprep.mubr.f32.mxu1 %v1740_v47  ;;  %4213 = vmatprep.mubr.f32.mxu0 %v1740_v47 }
 0x382   : > { %4134 = vmatmul.mubr.f32.gmra.mrb[74].mxu1 %v1741_v22  ;;  %4214 = vmatmul.mubr.f32.gmra.mrb[74].mxu0 %v1741_v22  ;;  %v1743_v15 = vmul.f32 %v1711_v12, %v1615_v7 }
 0x383   : > { %v4782_v8 = vpop.eup %4781  ;;  %v1742_v52 = vmul.f32 %v1710_v27, %v1614_v13 }
 0x384   : > { %v4784_v0 = vpop.eup %4783  ;;  %v1713_v35 = vadd.f32 1.0, %v4782_v8 }
 0x385   : > { %v1712_v10 = vadd.f32 1.0, %v4784_v0  ;;  %4136 = vmatprep.mubr.f32.mxu1 %v1742_v52  ;;  %4216 = vmatprep.mubr.f32.mxu0 %v1742_v52 }
 0x386   : > { %4137 = vmatmul.mubr.f32.gmra.mrb[76].mxu1 %v1743_v15  ;;  %4217 = vmatmul.mubr.f32.gmra.mrb[76].mxu0 %v1743_v15  ;;  %v1745_v24 = vmul.f32 %v1713_v35, %v1617_v19 }
 0x387   : > { %v1744_v20 = vmul.f32 %v1712_v10, %v1616_v18 }
 0x389   : > { %4139 = vmatprep.mubr.f32.mxu1 %v1744_v20  ;;  %4219 = vmatprep.mubr.f32.mxu0 %v1744_v20 }
 0x38a   : > { %4140 = vmatmul.mubr.f32.gmra.mrb[78].mxu1 %v1745_v24  ;;  %4220 = vmatmul.mubr.f32.gmra.mrb[78].mxu0 %v1745_v24 }
 0x421   : > { %v4096_v50 = vpop.f32.mrb[48].mxu1  ;;  %v6011_v5 = vpop.f32.mrb[48].mxu0 }
 0x422   : > { %v1835_v42 = vpop.f32.mrb[49].mxu1  ;;  %v6013_v11 = vpop.f32.mrb[49].mxu0  ;;  %v6019_v6 = vadd.f32 %v4096_v50, %v6009_v26 }
 0x423   : > { %v6016_v28 = vadd.f32 %v6009_v26, %v1835_v42 }
 0x424   : > { %v1998_v41 = vsel %vm1994_vm0, %v6019_v6, -inf }
 0x425   : > { %v4099_v29 = vpop.f32.mrb[50].mxu1  ;;  %v6021_v1 = vpop.f32.mrb[50].mxu0  ;;  %v1995_v32 = vsel %vm1994_vm0, %v6016_v28, -inf }
 0x426   : > { %v1845_v9 = vpop.f32.mrb[51].mxu1  ;;  %v6025_v36 = vpop.f32.mrb[51].mxu0  ;;  %1996 = vmax.xlane.f32.xlu0 %v1995_v32  ;;  %v6031_v34 = vadd.f32 %v4099_v29, %v6009_v26 }
 0x427   : > { %v6028_v33 = vadd.f32 %v6009_v26, %v1845_v9 }
 0x428   : > { %v2004_v31 = vsel %vm1994_vm0, %v6031_v34, -inf }
 0x429   : > { %v4102_v38 = vpop.f32.mrb[52].mxu1  ;;  %v6033_v54 = vpop.f32.mrb[52].mxu0  ;;  %v2001_v39 = vsel %vm1994_vm0, %v6028_v33, -inf }
 0x42a   : > { %v1855_v16 = vpop.f32.mrb[53].mxu1  ;;  %v6039_v30 = vpop.f32.mrb[53].mxu0  ;;  %2002 = vmax.xlane.f32.xlu1 %v2001_v39  ;;  %1999 = vmax.xlane.f32.xlu0 %v1998_v41  ;;  %v6045_v48 = vadd.f32 %v4102_v38, %v6009_v26 }
 0x42b   : > { %v6042_v23 = vadd.f32 %v6009_v26, %v1855_v16 }
 0x42c   : > { %v2010_v45 = vsel %vm1994_vm0, %v6045_v48, -inf }
 0x42d   : > { %v4105_v25 = vpop.f32.mrb[54].mxu1  ;;  %v6047_v17 = vpop.f32.mrb[54].mxu0  ;;  %v2007_v49 = vsel %vm1994_vm0, %v6042_v23, -inf }
 0x42e   : > { %v1865_v53 = vpop.f32.mrb[55].mxu1  ;;  %v6053_v56 = vpop.f32.mrb[55].mxu0  ;;  %2005 = vmax.xlane.f32.xlu1 %v2004_v31  ;;  %2008 = vmax.xlane.f32.xlu0 %v2007_v49  ;;  %v6059_v3 = vadd.f32 %v4105_v25, %v6009_v26 }
 0x42f   : > { %v6056_v51 = vadd.f32 %v6009_v26, %v1865_v53 }
 0x430   : > { %v2016_v4 = vsel %vm1994_vm0, %v6059_v3, -inf }
 0x431   : > { %v4108_v37 = vpop.f32.mrb[56].mxu1  ;;  %v6061_v14 = vpop.f32.mrb[56].mxu0  ;;  %v2013_v58 = vsel %vm1994_vm0, %v6056_v51, -inf }
 0x432   : > { %v1875_v59 = vpop.f32.mrb[57].mxu1  ;;  %v6067_v21 = vpop.f32.mrb[57].mxu0  ;;  %2011 = vmax.xlane.f32.xlu1 %v2010_v45  ;;  %2014 = vmax.xlane.f32.xlu0 %v2013_v58  ;;  %v6073_v60 = vadd.f32 %v4108_v37, %v6009_v26 }
 0x433   : > { %v6070_v61 = vadd.f32 %v6009_v26, %v1875_v59 }
 0x434   : > { %v2022_v40 = vsel %vm1994_vm0, %v6073_v60, -inf }
 0x435   : > { %v4111_v46 = vpop.f32.mrb[58].mxu1  ;;  %v6075_v63 = vpop.f32.mrb[58].mxu0  ;;  %v2019_v43 = vsel %vm1994_vm0, %v6070_v61, -inf }
 0x436   : > { %v1885_v2 = vpop.f32.mrb[59].mxu1  ;;  %v6081_v55 = vpop.f32.mrb[59].mxu0  ;;  %2017 = vmax.xlane.f32.xlu1 %v2016_v4  ;;  %2020 = vmax.xlane.f32.xlu0 %v2019_v43  ;;  %v6087_v57 = vadd.f32 %v4111_v46, %v6009_v26 }
 0x437   : > { %v6084_v62 = vadd.f32 %v6009_v26, %v1885_v2 }
 0x438   : > { %v2028_v0 = vsel %vm1994_vm0, %v6087_v57, -inf }
 0x439   : > { %v4114_v44 = vpop.f32.mrb[60].mxu1  ;;  %v6089_v47 = vpop.f32.mrb[60].mxu0  ;;  %v2025_v12 = vsel %vm1994_vm0, %v6084_v62, -inf }
 0x43a   : > { %v1895_v22 = vpop.f32.mrb[61].mxu1  ;;  %v6095_v13 = vpop.f32.mrb[61].mxu0  ;;  %2023 = vmax.xlane.f32.xlu1 %v2022_v40  ;;  %2026 = vmax.xlane.f32.xlu0 %v2025_v12  ;;  %v6101_v7 = vadd.f32 %v4114_v44, %v6009_v26 }
 0x43b   : > { %v6098_v27 = vadd.f32 %v6009_v26, %v1895_v22 }
 0x43c   : > { %v2034_v50 = vsel %vm1994_vm0, %v6101_v7, -inf }
 0x43d   : > { %v4117_v8 = vpop.f32.mrb[62].mxu1  ;;  %v6103_v52 = vpop.f32.mrb[62].mxu0  ;;  %v2031_v35 = vsel %vm1994_vm0, %v6098_v27, -inf }
 0x43e   : > { %v1905_v15 = vpop.f32.mrb[63].mxu1  ;;  %v6109_v18 = vpop.f32.mrb[63].mxu0  ;;  %2029 = vmax.xlane.f32.xlu1 %v2028_v0  ;;  %2032 = vmax.xlane.f32.xlu0 %v2031_v35  ;;  %v6115_v19 = vadd.f32 %v4117_v8, %v6009_v26 }
 0x43f   : > { %v6112_v10 = vadd.f32 %v6009_v26, %v1905_v15 }
 0x440   : > { %v2040_v16 = vsel %vm1994_vm0, %v6115_v19, -inf }
 0x441   : > { %v4120_v20 = vpop.f32.mrb[64].mxu1  ;;  %v6117_v24 = vpop.f32.mrb[64].mxu0  ;;  %v2037_v42 = vsel %vm1994_vm0, %v6112_v10, -inf }
 0x442   : > { %v1915_v29 = vpop.f32.mrb[65].mxu1  ;;  %v6123_v32 = vpop.f32.mrb[65].mxu0  ;;  %2035 = vmax.xlane.f32.xlu1 %v2034_v50  ;;  %2038 = vmax.xlane.f32.xlu0 %v2037_v42  ;;  %v6129_v38 = vadd.f32 %v4120_v20, %v6009_v26 }
 0x443   : > { %v6126_v9 = vadd.f32 %v6009_v26, %v1915_v29 }
 0x444   : > { %v2046_v59 = vsel %vm1994_vm0, %v6129_v38, -inf }
 0x445   : > { %v4123_v39 = vpop.f32.mrb[66].mxu1  ;;  %v6131_v41 = vpop.f32.mrb[66].mxu0  ;;  %v2043_v25 = vsel %vm1994_vm0, %v6126_v9, -inf }
 0x446   : > { %6689 = vst [vmem:[#allocation14_spill] sm:$0xff] %v6131_v41  ;;  %v1925_v31 = vpop.f32.mrb[67].mxu1  ;;  %v6137_v49 = vpop.f32.mrb[67].mxu0  ;;  %2041 = vmax.xlane.f32.xlu1 %v2040_v16  ;;  %2044 = vmax.xlane.f32.xlu0 %v2043_v25  ;;  %v6143_v37 = vadd.f32 %v4123_v39, %v6009_v26 }
 0x447   : > { %6690 = vst [vmem:[#allocation15_spill] sm:$0xff] %v6137_v49  ;;  %v6140_v53 = vadd.f32 %v6009_v26, %v1925_v31 }
 0x448   : > { %v2052_v22 = vsel %vm1994_vm0, %v6143_v37, -inf }
 0x449   : > { %v4126_v45 = vpop.f32.mrb[68].mxu1  ;;  %v6145_v58 = vpop.f32.mrb[68].mxu0  ;;  %v2049_v46 = vsel %vm1994_vm0, %v6140_v53, -inf }
 0x44a   : > { %6691 = vst [vmem:[#allocation16_spill] sm:$0xff] %v6145_v58  ;;  %v1935_v4 = vpop.f32.mrb[69].mxu1  ;;  %v6151_v43 = vpop.f32.mrb[69].mxu0  ;;  %2047 = vmax.xlane.f32.xlu1 %v2046_v59  ;;  %2050 = vmax.xlane.f32.xlu0 %v2049_v46  ;;  %v6157_v44 = vadd.f32 %v4126_v45, %v6009_v26 }
 0x44b   : > { %6692 = vst [vmem:[#allocation17_spill] sm:$0xff] %v6151_v43  ;;  %v6154_v2 = vadd.f32 %v6009_v26, %v1935_v4 }
 0x44c   : > { %v2058_v29 = vsel %vm1994_vm0, %v6157_v44, -inf }
 0x44d   : > { %v4129_v40 = vpop.f32.mrb[70].mxu1  ;;  %v6159_v12 = vpop.f32.mrb[70].mxu0  ;;  %v2055_v8 = vsel %vm1994_vm0, %v6154_v2, -inf }
 0x44e   : > { %6693 = vst [vmem:[#allocation18_spill] sm:$0xff] %v6159_v12  ;;  %v1945_v0 = vpop.f32.mrb[71].mxu1  ;;  %v6165_v35 = vpop.f32.mrb[71].mxu0  ;;  %2053 = vmax.xlane.f32.xlu1 %v2052_v22  ;;  %2056 = vmax.xlane.f32.xlu0 %v2055_v8  ;;  %v6171_v20 = vadd.f32 %v4129_v40, %v6009_v26 }
 0x44f   : > { %6694 = vst [vmem:[#allocation19_spill] sm:$0xff] %v6165_v35  ;;  %v6168_v15 = vadd.f32 %v6009_v26, %v1945_v0 }
 0x450   : > { %v2064_v4 = vsel %vm1994_vm0, %v6171_v20, -inf }
 0x451   : > { %v4132_v50 = vpop.f32.mrb[72].mxu1  ;;  %v6173_v42 = vpop.f32.mrb[72].mxu0  ;;  %v2061_v39 = vsel %vm1994_vm0, %v6168_v15, -inf }
 0x452   : > { %6695 = vst [vmem:[#allocation20_spill] sm:$0xff] %v6173_v42  ;;  %v1955_v16 = vpop.f32.mrb[73].mxu1  ;;  %v6179_v25 = vpop.f32.mrb[73].mxu0  ;;  %2059 = vmax.xlane.f32.xlu1 %v2058_v29  ;;  %2062 = vmax.xlane.f32.xlu0 %v2061_v39  ;;  %v6185_v45 = vadd.f32 %v4132_v50, %v6009_v26 }
 0x453   : > { %6696 = vst [vmem:[#allocation21_spill] sm:$0xff] %v6179_v25  ;;  %v6182_v31 = vadd.f32 %v6009_v26, %v1955_v16 }
 0x454   : > { %v2070_v16 = vsel %vm1994_vm0, %v6185_v45, -inf }
 0x455   : > { %v4135_v59 = vpop.f32.mrb[74].mxu1  ;;  %v6187_v46 = vpop.f32.mrb[74].mxu0  ;;  %v2067_v40 = vsel %vm1994_vm0, %v6182_v31, -inf }
 0x456   : > { %6697 = vst [vmem:[#allocation22_spill] sm:$0xff] %v6187_v46  ;;  %v1965_v22 = vpop.f32.mrb[75].mxu1  ;;  %v6193_v8 = vpop.f32.mrb[75].mxu0  ;;  %2065 = vmax.xlane.f32.xlu1 %v2064_v4  ;;  %2068 = vmax.xlane.f32.xlu0 %v2067_v40  ;;  %v6199_v50 = vadd.f32 %v4135_v59, %v6009_v26 }
 0x457   : > { %6698 = vst [vmem:[#allocation23_spill] sm:$0xff] %v6193_v8  ;;  %v6196_v0 = vadd.f32 %v6009_v26, %v1965_v22 }
 0x459   : > { %v4138_v29 = vpop.f32.mrb[76].mxu1  ;;  %v6201_v39 = vpop.f32.mrb[76].mxu0  ;;  %v2073_v46 = vsel %vm1994_vm0, %v6196_v0, -inf }
 0x45a   : > { %6699 = vst [vmem:[#allocation24_spill] sm:$0xff] %v6201_v39  ;;  %v1975_v25 = vpop.f32.mrb[77].mxu1  ;;  %v6207_v42 = vpop.f32.mrb[77].mxu0  ;;  %2071 = vmax.xlane.f32.xlu1 %v2070_v16  ;;  %2074 = vmax.xlane.f32.xlu0 %v2073_v46  ;;  %v6213_v59 = vadd.f32 %v4138_v29, %v6009_v26  ;;  %v2076_v39 = vsel %vm1994_vm0, %v6199_v50, -inf }
 0x45b   : > { %6700 = vst [vmem:[#allocation25_spill] sm:$0xff] %v6207_v42  ;;  %v6210_v4 = vadd.f32 %v6009_v26, %v1975_v25 }
 0x45c   : > { %v2082_v29 = vsel %vm1994_vm0, %v6213_v59, -inf }
 0x45d   : > { %v4141_v40 = vpop.f32.mrb[78].mxu1  ;;  %v6215_v22 = vpop.f32.mrb[78].mxu0  ;;  %v2079_v8 = vsel %vm1994_vm0, %v6210_v4, -inf }
 0x45e   : > { %6701 = vst [vmem:[#allocation26_spill] sm:$0xff] %v6215_v22  ;;  %v6222_v35 = vadd.f32 %v4141_v40, %v6009_v26  ;;  %v1985_v16 = vpop.f32.mrb[79].mxu1  ;;  %v6224_v46 = vpop.f32.mrb[79].mxu0  ;;  %2077 = vmax.xlane.f32.xlu1 %v2076_v39  ;;  %2080 = vmax.xlane.f32.xlu0 %v2079_v8  ;;  %v2595_v39 = vld [vmem:[%s6703_s16] sm:$0xf]  ;;  %s5076_s16 = smov [#allocation8]  }
 0x45f   : > { %6702 = vst [vmem:[#allocation27_spill] sm:$0xff] %v6224_v46  ;;  %v6227_v25 = vadd.f32 %v6009_v26, %v1985_v16  ;;  %4222 = vmatprep.subr.msk.mxu1 %vm2692_vm1, %v2595_v39  ;;  %s5003_s25 = sshll.u32 %s5076_s16, 4  ;;  %s5004_s25 = int_to_ptr.vmem [resolvable:$false] %s5003_s25 }
 0x460   : > { %v2088_v40 = vsel %vm1994_vm0, %v6222_v35, -inf  ;;  %4223 = vmatpush3.msk.msra.mxu1 %vm2692_vm1, %v2595_v39  ;;  %s5005_s19 = scalar_lea.vmem %s5004_s25, 8192  ;;  %p5006_p7 = scmp.lt.s32.totalorder %s6604_s21, %s5004_s25 }
 0x461   : > { %v2085_v22 = vsel %vm1994_vm0, %v6227_v25, -inf  ;;  %p5007_p9 = scmp.lt.s32.totalorder %s5005_s19, %s4999_s29 }
 0x462   : > { %2083 = vmax.xlane.f32.xlu1 %v2082_v29  ;;  %2086 = vmax.xlane.f32.xlu0 %v2085_v22 }
 0x463   : > { %p5008_p12 = por %p5007_p9, %p5006_p7 }
 0x465   : > { %p5009_p1 = pnand %p5008_p12, %p5002_p3 }
 0x466   : > { %2089 = vmax.xlane.f32.xlu1 %v2088_v40 }
 0x4b3   : > { %v1997_v26 = vpop.xlane.xlu0 %1996 }
 0x4b4   : > { %v2091_v8 = vsub.f32 %v6016_v28, %v1997_v26 }
 0x4b6   : > { %v2123_v16 = vmul.f32 1.442695, %v2091_v8 }
 0x4b7   : > { %v2003_v46 = vpop.xlane.xlu1 %2002  ;;  %v2000_v42 = vpop.xlane.xlu0 %1999 }
 0x4b8   : > { %4785 = vpow2.f32 %v2123_v16  ;;  %v2093_v22 = vsub.f32 %v6028_v33, %v2003_v46  ;;  %v2092_v29 = vsub.f32 %v6019_v6, %v2000_v42 }
 0x4ba   : > { %v2127_v12 = vmul.f32 1.442695, %v2093_v22  ;;  %v2125_v40 = vmul.f32 1.442695, %v2092_v29 }
 0x4bb   : > { %v2006_v43 = vpop.xlane.xlu1 %2005  ;;  %v2009_v58 = vpop.xlane.xlu0 %2008 }
 0x4bc   : > { %4787 = vpow2.f32 %v2127_v12  ;;  %v2094_v49 = vsub.f32 %v6031_v34, %v2006_v43  ;;  %v2095_v39 = vsub.f32 %v6042_v23, %v2009_v58 }
 0x4bd   : > { %4789 = vpow2.f32 %v2125_v40 }
 0x4be   : > { %v2129_v41 = vmul.f32 1.442695, %v2094_v49  ;;  %v2131_v28 = vmul.f32 1.442695, %v2095_v39 }
 0x4bf   : > { %v2012_v26 = vpop.xlane.xlu1 %2011  ;;  %v2015_v8 = vpop.xlane.xlu0 %2014 }
 0x4c0   : > { %4791 = vpow2.f32 %v2129_v41  ;;  %v2096_v16 = vsub.f32 %v6045_v48, %v2012_v26  ;;  %v2097_v33 = vsub.f32 %v6056_v51, %v2015_v8 }
 0x4c1   : > { %4793 = vpow2.f32 %v2131_v28 }
 0x4c2   : > { %v6245_v6 = vpop.eup %4785  ;;  %v2133_v42 = vmul.f32 1.442695, %v2096_v16  ;;  %v2135_v46 = vmul.f32 1.442695, %v2097_v33 }
 0x4c3   : > { %v2018_v12 = vpop.xlane.xlu1 %2017  ;;  %v2021_v22 = vpop.xlane.xlu0 %2020  ;;  %v2187_v34 = vsel %vm1994_vm0, %v6245_v6, 0.0 }
 0x4c4   : > { %4795 = vpow2.f32 %v2133_v42  ;;  %v2098_v23 = vsub.f32 %v6059_v3, %v2018_v12  ;;  %v2099_v49 = vsub.f32 %v6070_v61, %v2021_v22  ;;  %2188 = vadd.xlane.f32.xlu0 %v2187_v34 }
 0x4c5   : > { %4797 = vpow2.f32 %v2135_v46 }
 0x4c6   : > { %v6251_v48 = vpop.eup %4787  ;;  %v2137_v51 = vmul.f32 1.442695, %v2098_v23  ;;  %v2139_v41 = vmul.f32 1.442695, %v2099_v49 }
 0x4c7   : > { %v6253_v58 = vpop.eup %4789  ;;  %v2024_v43 = vpop.xlane.xlu1 %2023  ;;  %v2193_v40 = vsel %vm1994_vm0, %v6251_v48, 0.0 }
 0x4c8   : > { %v2027_v29 = vpop.xlane.xlu0 %2026  ;;  %4799 = vpow2.f32 %v2137_v51  ;;  %v2100_v39 = vsub.f32 %v6073_v60, %v2024_v43  ;;  %2194 = vadd.xlane.f32.xlu0 %v2193_v40  ;;  %v2190_v61 = vsel %vm1994_vm0, %v6253_v58, 0.0 }
 0x4c9   : > { %v2101_v3 = vsub.f32 %v6084_v62, %v2027_v29  ;;  %4801 = vpow2.f32 %v2139_v41  ;;  %2191 = vadd.xlane.f32.xlu1 %v2190_v61 }
 0x4ca   : > { %v6261_v28 = vpop.eup %4791  ;;  %v2141_v26 = vmul.f32 1.442695, %v2100_v39 }
 0x4cb   : > { %v2143_v8 = vmul.f32 1.442695, %v2101_v3  ;;  %v6263_v16 = vpop.eup %4793  ;;  %v2030_v33 = vpop.xlane.xlu1 %2029  ;;  %v2196_v46 = vsel %vm1994_vm0, %v6261_v28, 0.0 }
 0x4cc   : > { %v2033_v42 = vpop.xlane.xlu0 %2032  ;;  %4803 = vpow2.f32 %v2141_v26  ;;  %v2102_v60 = vsub.f32 %v6087_v57, %v2030_v33  ;;  %v2199_v12 = vsel %vm1994_vm0, %v6263_v16, 0.0 }
 0x4cd   : > { %v2103_v62 = vsub.f32 %v6098_v27, %v2033_v42  ;;  %4805 = vpow2.f32 %v2143_v8  ;;  %2197 = vadd.xlane.f32.xlu1 %v2196_v46  ;;  %2200 = vadd.xlane.f32.xlu0 %v2199_v12 }
 0x4ce   : > { %v6271_v22 = vpop.eup %4795  ;;  %v2145_v34 = vmul.f32 1.442695, %v2102_v60 }
 0x4cf   : > { %v2147_v23 = vmul.f32 1.442695, %v2103_v62  ;;  %v6273_v49 = vpop.eup %4797  ;;  %v2036_v51 = vpop.xlane.xlu1 %2035  ;;  %v2202_v43 = vsel %vm1994_vm0, %v6271_v22, 0.0 }
 0x4d0   : > { %v2039_v41 = vpop.xlane.xlu0 %2038  ;;  %4807 = vpow2.f32 %v2145_v34  ;;  %v2104_v57 = vsub.f32 %v6101_v7, %v2036_v51  ;;  %v2205_v29 = vsel %vm1994_vm0, %v6273_v49, 0.0 }
 0x4d1   : > { %v2105_v27 = vsub.f32 %v6112_v10, %v2039_v41  ;;  %4809 = vpow2.f32 %v2147_v23  ;;  %2203 = vadd.xlane.f32.xlu1 %v2202_v43  ;;  %2206 = vadd.xlane.f32.xlu0 %v2205_v29 }
 0x4d2   : > { %v6281_v40 = vpop.eup %4799  ;;  %v2149_v39 = vmul.f32 1.442695, %v2104_v57 }
 0x4d3   : > { %v2151_v3 = vmul.f32 1.442695, %v2105_v27  ;;  %v6283_v61 = vpop.eup %4801  ;;  %v2042_v26 = vpop.xlane.xlu1 %2041  ;;  %v2208_v33 = vsel %vm1994_vm0, %v6281_v40, 0.0 }
 0x4d4   : > { %v2045_v8 = vpop.xlane.xlu0 %2044  ;;  %4811 = vpow2.f32 %v2149_v39  ;;  %v2106_v7 = vsub.f32 %v6115_v19, %v2042_v26  ;;  %v2211_v42 = vsel %vm1994_vm0, %v6283_v61, 0.0 }
 0x4d5   : > { %v2107_v10 = vsub.f32 %v6126_v9, %v2045_v8  ;;  %4813 = vpow2.f32 %v2151_v3  ;;  %2209 = vadd.xlane.f32.xlu1 %v2208_v33  ;;  %2212 = vadd.xlane.f32.xlu0 %v2211_v42 }
 0x4d6   : > { %v6291_v46 = vpop.eup %4803  ;;  %v2153_v60 = vmul.f32 1.442695, %v2106_v7 }
 0x4d7   : > { %v2155_v62 = vmul.f32 1.442695, %v2107_v10  ;;  %v6293_v12 = vpop.eup %4805  ;;  %v2048_v34 = vpop.xlane.xlu1 %2047  ;;  %v2214_v51 = vsel %vm1994_vm0, %v6291_v46, 0.0 }
 0x4d8   : > { %v2051_v23 = vpop.xlane.xlu0 %2050  ;;  %4815 = vpow2.f32 %v2153_v60  ;;  %v2108_v19 = vsub.f32 %v6129_v38, %v2048_v34  ;;  %v2217_v41 = vsel %vm1994_vm0, %v6293_v12, 0.0 }
 0x4d9   : > { %v2109_v9 = vsub.f32 %v6140_v53, %v2051_v23  ;;  %4817 = vpow2.f32 %v2155_v62  ;;  %2215 = vadd.xlane.f32.xlu1 %v2214_v51  ;;  %2218 = vadd.xlane.f32.xlu0 %v2217_v41 }
 0x4da   : > { %v6301_v43 = vpop.eup %4807  ;;  %v2157_v57 = vmul.f32 1.442695, %v2108_v19 }
 0x4db   : > { %v2159_v27 = vmul.f32 1.442695, %v2109_v9  ;;  %v6303_v29 = vpop.eup %4809  ;;  %v2054_v39 = vpop.xlane.xlu1 %2053  ;;  %v2220_v26 = vsel %vm1994_vm0, %v6301_v43, 0.0 }
 0x4dc   : > { %v2057_v3 = vpop.xlane.xlu0 %2056  ;;  %4819 = vpow2.f32 %v2157_v57  ;;  %v2110_v38 = vsub.f32 %v6143_v37, %v2054_v39  ;;  %v2223_v8 = vsel %vm1994_vm0, %v6303_v29, 0.0 }
 0x4dd   : > { %v2111_v53 = vsub.f32 %v6154_v2, %v2057_v3  ;;  %4821 = vpow2.f32 %v2159_v27  ;;  %2221 = vadd.xlane.f32.xlu1 %v2220_v26  ;;  %2224 = vadd.xlane.f32.xlu0 %v2223_v8 }
 0x4de   : > { %v6311_v33 = vpop.eup %4811  ;;  %v2161_v7 = vmul.f32 1.442695, %v2110_v38 }
 0x4df   : > { %v2163_v10 = vmul.f32 1.442695, %v2111_v53  ;;  %v6313_v42 = vpop.eup %4813  ;;  %v2060_v60 = vpop.xlane.xlu1 %2059  ;;  %v2226_v34 = vsel %vm1994_vm0, %v6311_v33, 0.0 }
 0x4e0   : > { %v2063_v62 = vpop.xlane.xlu0 %2062  ;;  %4823 = vpow2.f32 %v2161_v7  ;;  %v2112_v37 = vsub.f32 %v6157_v44, %v2060_v60  ;;  %v2229_v23 = vsel %vm1994_vm0, %v6313_v42, 0.0 }
 0x4e1   : > { %v2113_v2 = vsub.f32 %v6168_v15, %v2063_v62  ;;  %4825 = vpow2.f32 %v2163_v10  ;;  %2227 = vadd.xlane.f32.xlu1 %v2226_v34  ;;  %2230 = vadd.xlane.f32.xlu0 %v2229_v23 }
 0x4e2   : > { %v6321_v51 = vpop.eup %4815  ;;  %v2165_v19 = vmul.f32 1.442695, %v2112_v37 }
 0x4e3   : > { %v2167_v9 = vmul.f32 1.442695, %v2113_v2  ;;  %v6323_v41 = vpop.eup %4817  ;;  %v2066_v57 = vpop.xlane.xlu1 %2065  ;;  %v2232_v39 = vsel %vm1994_vm0, %v6321_v51, 0.0 }
 0x4e4   : > { %v2069_v27 = vpop.xlane.xlu0 %2068  ;;  %4827 = vpow2.f32 %v2165_v19  ;;  %v2114_v44 = vsub.f32 %v6171_v20, %v2066_v57  ;;  %v2235_v3 = vsel %vm1994_vm0, %v6323_v41, 0.0 }
 0x4e5   : > { %v2115_v15 = vsub.f32 %v6182_v31, %v2069_v27  ;;  %4829 = vpow2.f32 %v2167_v9  ;;  %2233 = vadd.xlane.f32.xlu1 %v2232_v39  ;;  %2236 = vadd.xlane.f32.xlu0 %v2235_v3 }
 0x4e6   : > { %v6331_v26 = vpop.eup %4819  ;;  %v2169_v38 = vmul.f32 1.442695, %v2114_v44 }
 0x4e7   : > { %v2171_v53 = vmul.f32 1.442695, %v2115_v15  ;;  %v6333_v8 = vpop.eup %4821  ;;  %v2072_v7 = vpop.xlane.xlu1 %2071  ;;  %v2238_v60 = vsel %vm1994_vm0, %v6331_v26, 0.0 }
 0x4e8   : > { %v2075_v10 = vpop.xlane.xlu0 %2074  ;;  %4831 = vpow2.f32 %v2169_v38  ;;  %v2116_v20 = vsub.f32 %v6185_v45, %v2072_v7  ;;  %v2241_v62 = vsel %vm1994_vm0, %v6333_v8, 0.0 }
 0x4e9   : > { %v2117_v31 = vsub.f32 %v6196_v0, %v2075_v10  ;;  %4833 = vpow2.f32 %v2171_v53  ;;  %2239 = vadd.xlane.f32.xlu1 %v2238_v60  ;;  %2242 = vadd.xlane.f32.xlu0 %v2241_v62 }
 0x4ea   : > { %v6341_v34 = vpop.eup %4823  ;;  %v2173_v37 = vmul.f32 1.442695, %v2116_v20 }
 0x4eb   : > { %v2175_v2 = vmul.f32 1.442695, %v2117_v31  ;;  %v6343_v23 = vpop.eup %4825  ;;  %v2078_v19 = vpop.xlane.xlu1 %2077  ;;  %v2244_v57 = vsel %vm1994_vm0, %v6341_v34, 0.0 }
 0x4ec   : > { %v2081_v9 = vpop.xlane.xlu0 %2080  ;;  %4835 = vpow2.f32 %v2173_v37  ;;  %v2118_v45 = vsub.f32 %v6199_v50, %v2078_v19  ;;  %v2247_v27 = vsel %vm1994_vm0, %v6343_v23, 0.0 }
 0x4ed   : > { %v2119_v0 = vsub.f32 %v6210_v4, %v2081_v9  ;;  %4837 = vpow2.f32 %v2175_v2  ;;  %2245 = vadd.xlane.f32.xlu1 %v2244_v57  ;;  %2248 = vadd.xlane.f32.xlu0 %v2247_v27 }
 0x4ee   : > { %v6351_v39 = vpop.eup %4827  ;;  %v2177_v44 = vmul.f32 1.442695, %v2118_v45 }
 0x4ef   : > { %v2179_v15 = vmul.f32 1.442695, %v2119_v0  ;;  %v6353_v3 = vpop.eup %4829  ;;  %v2084_v38 = vpop.xlane.xlu1 %2083  ;;  %v2250_v7 = vsel %vm1994_vm0, %v6351_v39, 0.0 }
 0x4f0   : > { %v2087_v53 = vpop.xlane.xlu0 %2086  ;;  %4839 = vpow2.f32 %v2177_v44  ;;  %v2120_v50 = vsub.f32 %v6213_v59, %v2084_v38  ;;  %v2253_v10 = vsel %vm1994_vm0, %v6353_v3, 0.0 }
 0x4f1   : > { %v2121_v4 = vsub.f32 %v6227_v25, %v2087_v53  ;;  %4841 = vpow2.f32 %v2179_v15  ;;  %2251 = vadd.xlane.f32.xlu1 %v2250_v7  ;;  %2254 = vadd.xlane.f32.xlu0 %v2253_v10 }
 0x4f2   : > { %v6361_v60 = vpop.eup %4831  ;;  %v2181_v20 = vmul.f32 1.442695, %v2120_v50 }
 0x4f3   : > { %v2183_v31 = vmul.f32 1.442695, %v2121_v4  ;;  %v6363_v62 = vpop.eup %4833  ;;  %v2090_v37 = vpop.xlane.xlu1 %2089  ;;  %v2256_v2 = vsel %vm1994_vm0, %v6361_v60, 0.0 }
 0x4f4   : > { %4843 = vpow2.f32 %v2181_v20  ;;  %v2122_v59 = vsub.f32 %v6222_v35, %v2090_v37  ;;  %v2259_v25 = vsel %vm1994_vm0, %v6363_v62, 0.0  ;;  %v2953_v20 = vld [vmem:[#allocation7] sm:$0xff]  ;;  %v2955_v37 = vld [vmem:[#allocation7 + $0x10] sm:$0xff] }
 0x4f5   : > { %4845 = vpow2.f32 %v2183_v31  ;;  %2257 = vadd.xlane.f32.xlu1 %v2256_v2  ;;  %2260 = vadd.xlane.f32.xlu0 %v2259_v25  ;;  %v2954_v31 = vld [vmem:[#allocation7 + $0x8] sm:$0xff] }
 0x4f6   : > { %v6370_v19 = vpop.eup %4835  ;;  %v2185_v9 = vmul.f32 1.442695, %v2122_v59  ;;  %v4494_v2 = vpack.c.bf16 %v2954_v31, %v2953_v20  ;;  %v2956_v59 = vld [vmem:[#allocation7 + $0x18] sm:$0xff] }
 0x4f7   : > { %v6372_v57 = vpop.eup %4837  ;;  %v2262_v45 = vsel %vm1994_vm0, %v6370_v19, 0.0  ;;  %v4498_v25 = vpack.c.bf16 %v2956_v59, %v2955_v37 }
 0x4f8   : > { %4847 = vpow2.f32 %v2185_v9  ;;  %v2265_v0 = vsel %vm1994_vm0, %v6372_v57, 0.0  ;;  %v2957_v9 = vld [vmem:[#allocation7 + $0x20] sm:$0xff]  ;;  %4495 = vmatprep.subr.bf16.mxu0 %v4494_v2 }
 0x4f9   : > { %2263 = vadd.xlane.f32.xlu1 %v2262_v45  ;;  %2266 = vadd.xlane.f32.xlu0 %v2265_v0  ;;  %v2958_v45 = vld [vmem:[#allocation7 + $0x28] sm:$0xff] }
 0x4fa   : > { %v6378_v35 = vpop.eup %4839  ;;  %4497 = vmatpush3.bf16.msra.mxu0 %v4494_v2  ;;  %v4502_v0 = vpack.c.bf16 %v2958_v45, %v2957_v9 }
 0x4fb   : > { %v6380_v27 = vpop.eup %4841  ;;  %v2268_v44 = vsel %vm1994_vm0, %v6378_v35, 0.0  ;;  %4499 = vmatprep.subr.bf16.mxu0 %v4498_v25 }
 0x4fc   : > { %v2271_v15 = vsel %vm1994_vm0, %v6380_v27, 0.0 }
 0x4fd   : > { %2269 = vadd.xlane.f32.xlu1 %v2268_v44  ;;  %2272 = vadd.xlane.f32.xlu0 %v2271_v15  ;;  %v2959_v44 = vld [vmem:[#allocation7 + $0x30] sm:$0xff] }
 0x4fe   : > { %v6386_v38 = vpop.eup %4843  ;;  %4501 = vmatpush3.bf16.msra.mxu0 %v4498_v25 }
 0x4ff   : > { %v6388_v53 = vpop.eup %4845  ;;  %v2274_v7 = vsel %vm1994_vm0, %v6386_v38, 0.0  ;;  %4503 = vmatprep.subr.bf16.mxu0 %v4502_v0 }
 0x500   : > { %v2277_v50 = vsel %vm1994_vm0, %v6388_v53, 0.0 }
 0x501   : > { %2275 = vadd.xlane.f32.xlu1 %v2274_v7  ;;  %2278 = vadd.xlane.f32.xlu0 %v2277_v50 }
 0x502   : > { %v6394_v4 = vpop.eup %4847  ;;  %4505 = vmatpush3.bf16.msra.mxu0 %v4502_v0 }
 0x503   : > { %v2280_v10 = vsel %vm1994_vm0, %v6394_v4, 0.0  ;;  %4284 = vmatprep.subr.mxu0 %v2959_v44 }
 0x505   : > { %2281 = vadd.xlane.f32.xlu1 %v2280_v10 }
 0x506   : > { %4285 = vmatpush3.msra.mxu0 %v2959_v44 }
 0x551   : > { %v2189_v15 = vpop.xlane.xlu0 %2188 }
 0x552   : > { %4849 = vrcp.f32 %v2189_v15 }
 0x555   : > { %v2195_v7 = vpop.xlane.xlu0 %2194 }
 0x556   : > { %v2192_v50 = vpop.xlane.xlu1 %2191  ;;  %4851 = vrcp.f32 %v2195_v7 }
 0x557   : > { %4853 = vrcp.f32 %v2192_v50 }
 0x55a   : > { %v2198_v10 = vpop.xlane.xlu1 %2197  ;;  %v2201_v20 = vpop.xlane.xlu0 %2200 }
 0x55b   : > { %4855 = vrcp.f32 %v2198_v10 }
 0x55c   : > { %v4850_v31 = vpop.eup %4849  ;;  %4857 = vrcp.f32 %v2201_v20 }
 0x55d   : > { %v2284_v37 = vmul.f32 %v4850_v31, %v6245_v6 }
 0x55e   : > { %v2204_v2 = vpop.xlane.xlu1 %2203  ;;  %v2207_v59 = vpop.xlane.xlu0 %2206 }
 0x55f   : > { %4859 = vrcp.f32 %v2204_v2  ;;  %4224 = vmatprep.mubr.msk.f32.mxu1 %vm1994_vm0, %v2284_v37 }
 0x560   : > { %v4852_v25 = vpop.eup %4851  ;;  %4861 = vrcp.f32 %v2207_v59 }
 0x561   : > { %v4854_v9 = vpop.eup %4853  ;;  %v2288_v45 = vmul.f32 %v4852_v25, %v6251_v48 }
 0x562   : > { %v2286_v0 = vmul.f32 %v4854_v9, %v6253_v58  ;;  %v2210_v44 = vpop.xlane.xlu1 %2209  ;;  %v2213_v15 = vpop.xlane.xlu0 %2212 }
 0x563   : > { %4863 = vrcp.f32 %v2210_v44 }
 0x564   : > { %4865 = vrcp.f32 %v2213_v15  ;;  %4225 = vmatmul.mubr.msk.f32.vlgmr.msra.gmra.mrb[80].mxu1 %vm1994_vm0, %v2286_v0 }
 0x565   : > { %v4856_v7 = vpop.eup %4855  ;;  %4227 = vmatprep.mubr.msk.f32.mxu1 %vm1994_vm0, %v2288_v45 }
 0x566   : > { %v4858_v6 = vpop.eup %4857  ;;  %v2216_v50 = vpop.xlane.xlu1 %2215  ;;  %v2290_v20 = vmul.f32 %v4856_v7, %v6261_v28 }
 0x567   : > { %v2219_v10 = vpop.xlane.xlu0 %2218  ;;  %4867 = vrcp.f32 %v2216_v50  ;;  %v2292_v31 = vmul.f32 %v4858_v6, %v6263_v16 }
 0x568   : > { %4869 = vrcp.f32 %v2219_v10  ;;  %4228 = vmatmul.mubr.msk.f32.gmra.mrb[82].mxu1 %vm1994_vm0, %v2290_v20 }
 0x569   : > { %v4860_v48 = vpop.eup %4859  ;;  %4230 = vmatprep.mubr.msk.f32.mxu1 %vm1994_vm0, %v2292_v31 }
 0x56a   : > { %v4862_v58 = vpop.eup %4861  ;;  %v2222_v37 = vpop.xlane.xlu1 %2221  ;;  %v2294_v59 = vmul.f32 %v4860_v48, %v6271_v22 }
 0x56b   : > { %v2225_v2 = vpop.xlane.xlu0 %2224  ;;  %4871 = vrcp.f32 %v2222_v37  ;;  %v2296_v25 = vmul.f32 %v4862_v58, %v6273_v49 }
 0x56c   : > { %4873 = vrcp.f32 %v2225_v2  ;;  %4231 = vmatmul.mubr.msk.f32.gmra.mrb[84].mxu1 %vm1994_vm0, %v2294_v59 }
 0x56d   : > { %v4864_v28 = vpop.eup %4863  ;;  %4233 = vmatprep.mubr.msk.f32.mxu1 %vm1994_vm0, %v2296_v25 }
 0x56e   : > { %v4866_v16 = vpop.eup %4865  ;;  %v2228_v9 = vpop.xlane.xlu1 %2227  ;;  %v2298_v0 = vmul.f32 %v4864_v28, %v6281_v40 }
 0x56f   : > { %v2231_v45 = vpop.xlane.xlu0 %2230  ;;  %4875 = vrcp.f32 %v2228_v9  ;;  %v2300_v44 = vmul.f32 %v4866_v16, %v6283_v61 }
 0x570   : > { %4877 = vrcp.f32 %v2231_v45  ;;  %4234 = vmatmul.mubr.msk.f32.gmra.mrb[86].mxu1 %vm1994_vm0, %v2298_v0 }
 0x571   : > { %v4868_v22 = vpop.eup %4867  ;;  %4236 = vmatprep.mubr.msk.f32.mxu1 %vm1994_vm0, %v2300_v44 }
 0x572   : > { %v4870_v49 = vpop.eup %4869  ;;  %v2234_v15 = vpop.xlane.xlu1 %2233  ;;  %v2302_v6 = vmul.f32 %v4868_v22, %v6291_v46 }
 0x573   : > { %v2237_v7 = vpop.xlane.xlu0 %2236  ;;  %4879 = vrcp.f32 %v2234_v15  ;;  %v2304_v50 = vmul.f32 %v4870_v49, %v6293_v12 }
 0x574   : > { %4881 = vrcp.f32 %v2237_v7  ;;  %4237 = vmatmul.mubr.msk.f32.gmra.mrb[88].mxu1 %vm1994_vm0, %v2302_v6 }
 0x575   : > { %v4872_v40 = vpop.eup %4871  ;;  %4239 = vmatprep.mubr.msk.f32.mxu1 %vm1994_vm0, %v2304_v50 }
 0x576   : > { %v4874_v61 = vpop.eup %4873  ;;  %v2240_v10 = vpop.xlane.xlu1 %2239  ;;  %v2306_v31 = vmul.f32 %v4872_v40, %v6301_v43 }
 0x577   : > { %v2243_v20 = vpop.xlane.xlu0 %2242  ;;  %4883 = vrcp.f32 %v2240_v10  ;;  %v2308_v48 = vmul.f32 %v4874_v61, %v6303_v29 }
 0x578   : > { %4885 = vrcp.f32 %v2243_v20  ;;  %4240 = vmatmul.mubr.msk.f32.gmra.mrb[90].mxu1 %vm1994_vm0, %v2306_v31 }
 0x579   : > { %v4876_v46 = vpop.eup %4875  ;;  %4242 = vmatprep.mubr.msk.f32.mxu1 %vm1994_vm0, %v2308_v48 }
 0x57a   : > { %v4878_v12 = vpop.eup %4877  ;;  %v2246_v58 = vpop.xlane.xlu1 %2245  ;;  %v2310_v2 = vmul.f32 %v4876_v46, %v6311_v33 }
 0x57b   : > { %v2249_v37 = vpop.xlane.xlu0 %2248  ;;  %4887 = vrcp.f32 %v2246_v58  ;;  %v2312_v59 = vmul.f32 %v4878_v12, %v6313_v42 }
 0x57c   : > { %4889 = vrcp.f32 %v2249_v37  ;;  %4243 = vmatmul.mubr.msk.f32.gmra.mrb[92].mxu1 %vm1994_vm0, %v2310_v2 }
 0x57d   : > { %v4880_v43 = vpop.eup %4879  ;;  %4245 = vmatprep.mubr.msk.f32.mxu1 %vm1994_vm0, %v2312_v59 }
 0x57e   : > { %v4882_v29 = vpop.eup %4881  ;;  %v2252_v25 = vpop.xlane.xlu1 %2251  ;;  %v2314_v16 = vmul.f32 %v4880_v43, %v6321_v51 }
 0x57f   : > { %v2255_v28 = vpop.xlane.xlu0 %2254  ;;  %4891 = vrcp.f32 %v2252_v25  ;;  %v2316_v9 = vmul.f32 %v4882_v29, %v6323_v41 }
 0x580   : > { %4893 = vrcp.f32 %v2255_v28  ;;  %4246 = vmatmul.mubr.msk.f32.gmra.mrb[94].mxu1 %vm1994_vm0, %v2314_v16 }
 0x581   : > { %v4884_v33 = vpop.eup %4883  ;;  %4248 = vmatprep.mubr.msk.f32.mxu1 %vm1994_vm0, %v2316_v9 }
 0x582   : > { %v4886_v42 = vpop.eup %4885  ;;  %v2258_v45 = vpop.xlane.xlu1 %2257  ;;  %v2318_v44 = vmul.f32 %v4884_v33, %v6331_v26 }
 0x583   : > { %v2261_v0 = vpop.xlane.xlu0 %2260  ;;  %4895 = vrcp.f32 %v2258_v45  ;;  %v2320_v22 = vmul.f32 %v4886_v42, %v6333_v8 }
 0x584   : > { %4897 = vrcp.f32 %v2261_v0  ;;  %4249 = vmatmul.mubr.msk.f32.gmra.mrb[96].mxu1 %vm1994_vm0, %v2318_v44 }
 0x585   : > { %v4888_v51 = vpop.eup %4887  ;;  %4251 = vmatprep.mubr.msk.f32.mxu1 %vm1994_vm0, %v2320_v22 }
 0x586   : > { %v4890_v41 = vpop.eup %4889  ;;  %v2264_v49 = vpop.xlane.xlu1 %2263  ;;  %v2322_v7 = vmul.f32 %v4888_v51, %v6341_v34 }
 0x587   : > { %v2267_v15 = vpop.xlane.xlu0 %2266  ;;  %4899 = vrcp.f32 %v2264_v49  ;;  %v2324_v6 = vmul.f32 %v4890_v41, %v6343_v23 }
 0x588   : > { %4901 = vrcp.f32 %v2267_v15  ;;  %4252 = vmatmul.mubr.msk.f32.gmra.mrb[98].mxu1 %vm1994_vm0, %v2322_v7 }
 0x589   : > { %v4892_v26 = vpop.eup %4891  ;;  %4254 = vmatprep.mubr.msk.f32.mxu1 %vm1994_vm0, %v2324_v6 }
 0x58a   : > { %v4894_v8 = vpop.eup %4893  ;;  %v2270_v50 = vpop.xlane.xlu1 %2269  ;;  %v2326_v61 = vmul.f32 %v4892_v26, %v6351_v39 }
 0x58b   : > { %v2273_v40 = vpop.xlane.xlu0 %2272  ;;  %4903 = vrcp.f32 %v2270_v50  ;;  %v2328_v10 = vmul.f32 %v4894_v8, %v6353_v3 }
 0x58c   : > { %4905 = vrcp.f32 %v2273_v40  ;;  %4255 = vmatmul.mubr.msk.f32.gmra.mrb[100].mxu1 %vm1994_vm0, %v2326_v61 }
 0x58d   : > { %v4896_v34 = vpop.eup %4895  ;;  %4257 = vmatprep.mubr.msk.f32.mxu1 %vm1994_vm0, %v2328_v10 }
 0x58e   : > { %v4898_v23 = vpop.eup %4897  ;;  %v2276_v20 = vpop.xlane.xlu1 %2275  ;;  %v2330_v48 = vmul.f32 %v4896_v34, %v6361_v60 }
 0x58f   : > { %v2279_v31 = vpop.xlane.xlu0 %2278  ;;  %4907 = vrcp.f32 %v2276_v20  ;;  %v2332_v46 = vmul.f32 %v4898_v23, %v6363_v62 }
 0x590   : > { %4909 = vrcp.f32 %v2279_v31  ;;  %4258 = vmatmul.mubr.msk.f32.gmra.mrb[102].mxu1 %vm1994_vm0, %v2330_v48 }
 0x591   : > { %v4900_v39 = vpop.eup %4899  ;;  %4260 = vmatprep.mubr.msk.f32.mxu1 %vm1994_vm0, %v2332_v46 }
 0x592   : > { %v4902_v3 = vpop.eup %4901  ;;  %v2282_v12 = vpop.xlane.xlu1 %2281  ;;  %v2334_v58 = vmul.f32 %v4900_v39, %v6370_v19 }
 0x593   : > { %4911 = vrcp.f32 %v2282_v12  ;;  %v2336_v37 = vmul.f32 %v4902_v3, %v6372_v57 }
 0x594   : > { %4261 = vmatmul.mubr.msk.f32.gmra.mrb[104].mxu1 %vm1994_vm0, %v2334_v58 }
 0x595   : > { %v4904_v2 = vpop.eup %4903  ;;  %4263 = vmatprep.mubr.msk.f32.mxu1 %vm1994_vm0, %v2336_v37 }
 0x596   : > { %v4906_v60 = vpop.eup %4905  ;;  %v2338_v62 = vmul.f32 %v4904_v2, %v6378_v35  ;;  %v6465_v35 = vld [vmem:[%s6704_s10] ss:$0 sm:$0xff] }
 0x597   : > { %v2340_v59 = vmul.f32 %v4906_v60, %v6380_v27  ;;  %v2442_v27 = vadd.f32 %v6011_v5, %v6465_v35  ;;  %v2447_v42 = vadd.f32 %v6465_v35, %v6025_v36  ;;  %v2457_v22 = vadd.f32 %v6465_v35, %v6039_v30 }
 0x598   : > { %4264 = vmatmul.mubr.msk.f32.gmra.mrb[106].mxu1 %vm1994_vm0, %v2338_v62  ;;  %v2472_v49 = vadd.f32 %v6047_v17, %v6465_v35  ;;  %v2467_v15 = vadd.f32 %v6465_v35, %v6053_v56  ;;  %v2482_v26 = vadd.f32 %v6061_v14, %v6465_v35  ;;  %v2477_v8 = vadd.f32 %v6465_v35, %v6067_v21 }
 0x599   : > { %v4908_v43 = vpop.eup %4907  ;;  %4266 = vmatprep.mubr.msk.f32.mxu1 %vm1994_vm0, %v2340_v59  ;;  %v2492_v61 = vadd.f32 %v6075_v63, %v6465_v35  ;;  %v2487_v10 = vadd.f32 %v6465_v35, %v6081_v55  ;;  %v2502_v20 = vadd.f32 %v6089_v47, %v6465_v35  ;;  %v2497_v31 = vadd.f32 %v6465_v35, %v6095_v13  ;;  %v6705_v59 = vld [vmem:[#allocation14_spill] sm:$0xff] }
 0x59a   : > { %v4910_v29 = vpop.eup %4909  ;;  %v2342_v19 = vmul.f32 %v4908_v43, %v6386_v38  ;;  %v2437_v38 = vadd.f32 %v6465_v35, %v6013_v11  ;;  %v2462_v11 = vadd.f32 %v6033_v54, %v6465_v35  ;;  %v2512_v39 = vadd.f32 %v6103_v52, %v6465_v35 }
 0x59b   : > { %v2344_v57 = vmul.f32 %v4910_v29, %v6388_v53  ;;  %v2507_v3 = vadd.f32 %v6465_v35, %v6109_v18  ;;  %v2522_v37 = vadd.f32 %v6117_v24, %v6465_v35  ;;  %v2517_v2 = vadd.f32 %v6465_v35, %v6123_v32  ;;  %v6706_v29 = vld [vmem:[#allocation15_spill] sm:$0xff] }
 0x59c   : > { %4267 = vmatmul.mubr.msk.f32.gmra.mrb[108].mxu1 %vm1994_vm0, %v2342_v19  ;;  %v2532_v43 = vadd.f32 %v6705_v59, %v6465_v35  ;;  %v2527_v19 = vadd.f32 %v6465_v35, %v6706_v29 }
 0x59d   : > { %v4912_v25 = vpop.eup %4911  ;;  %4269 = vmatprep.mubr.msk.f32.mxu1 %vm1994_vm0, %v2344_v57 }
 0x59e   : > { %v2346_v28 = vmul.f32 %v4912_v25, %v6394_v4  ;;  %v2452_v4 = vadd.f32 %v6021_v1, %v6465_v35 }
 0x5a0   : > { %4270 = vmatmul.mubr.msk.f32.gmra.mrb[110].mxu1 %vm1994_vm0, %v2346_v28  ;;  %v6707_v28 = vld [vmem:[#allocation16_spill] sm:$0xff] }
 0x637   : > { %v4226_v53 = vpop.f32.mrb[80].mxu1 }
 0x638   : > { %v2922_v16 = vmul.f32 %v4226_v53, %v2442_v27  ;;  %v2762_v9 = vpop.f32.mrb[81].mxu1  ;;  %v2542_v27 = vadd.f32 %v6707_v28, %v6465_v35 }
 0x639   : > { %v2921_v33 = vmul.f32 %v2762_v9, %v2437_v38  ;;  %v6708_v38 = vld [vmem:[#allocation17_spill] sm:$0xff] }
 0x63a   : > { %v2537_v53 = vadd.f32 %v6465_v35, %v6708_v38 }
 0x63b   : > { %v4229_v45 = vpop.f32.mrb[82].mxu1  ;;  %4286 = vmatprep.mubr.msk.f32.mxu0 %vm2960_vm2, %v2921_v33 }
 0x63c   : > { %v2924_v0 = vmul.f32 %v4229_v45, %v2452_v4  ;;  %v2772_v44 = vpop.f32.mrb[83].mxu1  ;;  %4287 = vmatmul.mubr.msk.f32.vlgmr.msra.gmra.mrb[80].mxu0 %vm2960_vm2, %v2922_v16 }
 0x63d   : > { %v2923_v5 = vmul.f32 %v2772_v44, %v2447_v42  ;;  %v6709_v42 = vld [vmem:[#allocation18_spill] sm:$0xff] }
 0x63e   : > { %v2552_v45 = vadd.f32 %v6709_v42, %v6465_v35 }
 0x63f   : > { %v4232_v51 = vpop.f32.mrb[84].mxu1  ;;  %4289 = vmatprep.mubr.msk.f32.mxu0 %vm2960_vm2, %v2923_v5 }
 0x640   : > { %v2926_v1 = vmul.f32 %v4232_v51, %v2462_v11  ;;  %v2782_v41 = vpop.f32.mrb[85].mxu1  ;;  %4290 = vmatmul.mubr.msk.f32.gmra.mrb[82].mxu0 %vm2960_vm2, %v2924_v0  ;;  %v6710_v0 = vld [vmem:[#allocation19_spill] sm:$0xff] }
 0x641   : > { %v2925_v36 = vmul.f32 %v2782_v41, %v2457_v22  ;;  %v2547_v44 = vadd.f32 %v6465_v35, %v6710_v0 }
 0x643   : > { %v4235_v7 = vpop.f32.mrb[86].mxu1  ;;  %4292 = vmatprep.mubr.msk.f32.mxu0 %vm2960_vm2, %v2925_v36  ;;  %v6712_v36 = vld [vmem:[#allocation21_spill] sm:$0xff] }
 0x644   : > { %v2928_v54 = vmul.f32 %v4235_v7, %v2472_v49  ;;  %v2792_v6 = vpop.f32.mrb[87].mxu1  ;;  %4293 = vmatmul.mubr.msk.f32.gmra.mrb[84].mxu0 %vm2960_vm2, %v2926_v1  ;;  %v6711_v1 = vld [vmem:[#allocation20_spill] sm:$0xff]  ;;  %v2557_v49 = vadd.f32 %v6465_v35, %v6712_v36 }
 0x645   : > { %v2927_v30 = vmul.f32 %v2792_v6, %v2467_v15  ;;  %v2562_v41 = vadd.f32 %v6711_v1, %v6465_v35 }
 0x647   : > { %v4238_v50 = vpop.f32.mrb[88].mxu1  ;;  %4295 = vmatprep.mubr.msk.f32.mxu0 %vm2960_vm2, %v2927_v30  ;;  %v6713_v30 = vld [vmem:[#allocation22_spill] sm:$0xff] }
 0x648   : > { %v2930_v17 = vmul.f32 %v4238_v50, %v2482_v26  ;;  %v2802_v40 = vpop.f32.mrb[89].mxu1  ;;  %4296 = vmatmul.mubr.msk.f32.gmra.mrb[86].mxu0 %vm2960_vm2, %v2928_v54  ;;  %v2572_v26 = vadd.f32 %v6713_v30, %v6465_v35 }
 0x649   : > { %v2929_v56 = vmul.f32 %v2802_v40, %v2477_v8  ;;  %v6714_v8 = vld [vmem:[#allocation23_spill] sm:$0xff] }
 0x64a   : > { %v2567_v50 = vadd.f32 %v6465_v35, %v6714_v8 }
 0x64b   : > { %v4241_v34 = vpop.f32.mrb[90].mxu1  ;;  %4298 = vmatprep.mubr.msk.f32.mxu0 %vm2960_vm2, %v2929_v56 }
 0x64c   : > { %v2932_v14 = vmul.f32 %v4241_v34, %v2492_v61  ;;  %v2812_v23 = vpop.f32.mrb[91].mxu1  ;;  %4299 = vmatmul.mubr.msk.f32.gmra.mrb[88].mxu0 %vm2960_vm2, %v2930_v17 }
 0x64d   : > { %v2931_v21 = vmul.f32 %v2812_v23, %v2487_v10  ;;  %v6715_v10 = vld [vmem:[#allocation24_spill] sm:$0xff] }
 0x64e   : > { %v2582_v34 = vadd.f32 %v6715_v10, %v6465_v35 }
 0x64f   : > { %v4244_v48 = vpop.f32.mrb[92].mxu1  ;;  %4301 = vmatprep.mubr.msk.f32.mxu0 %vm2960_vm2, %v2931_v21 }
 0x650   : > { %v2934_v63 = vmul.f32 %v4244_v48, %v2502_v20  ;;  %v2822_v46 = vpop.f32.mrb[93].mxu1  ;;  %4302 = vmatmul.mubr.msk.f32.gmra.mrb[90].mxu0 %vm2960_vm2, %v2932_v14  ;;  %v6716_v14 = vld [vmem:[#allocation25_spill] sm:$0xff] }
 0x651   : > { %v2933_v55 = vmul.f32 %v2822_v46, %v2497_v31  ;;  %v2577_v23 = vadd.f32 %v6465_v35, %v6716_v14 }
 0x653   : > { %v4247_v12 = vpop.f32.mrb[94].mxu1  ;;  %4304 = vmatprep.mubr.msk.f32.mxu0 %vm2960_vm2, %v2933_v55  ;;  %v6718_v55 = vld [vmem:[#allocation27_spill] sm:$0xff] }
 0x654   : > { %v2936_v47 = vmul.f32 %v4247_v12, %v2512_v39  ;;  %v2832_v58 = vpop.f32.mrb[95].mxu1  ;;  %4305 = vmatmul.mubr.msk.f32.gmra.mrb[92].mxu0 %vm2960_vm2, %v2934_v63  ;;  %v6717_v63 = vld [vmem:[#allocation26_spill] sm:$0xff]  ;;  %v2587_v39 = vadd.f32 %v6465_v35, %v6718_v55 }
 0x655   : > { %v2935_v13 = vmul.f32 %v2832_v58, %v2507_v3  ;;  %v2592_v46 = vadd.f32 %v6717_v63, %v6465_v35 }
 0x657   : > { %v4250_v60 = vpop.f32.mrb[96].mxu1  ;;  %4307 = vmatprep.mubr.msk.f32.mxu0 %vm2960_vm2, %v2935_v13 }
 0x658   : > { %v2938_v52 = vmul.f32 %v4250_v60, %v2522_v37  ;;  %v2842_v62 = vpop.f32.mrb[97].mxu1  ;;  %4308 = vmatmul.mubr.msk.f32.gmra.mrb[94].mxu0 %vm2960_vm2, %v2936_v47 }
 0x659   : > { %v2937_v18 = vmul.f32 %v2842_v62, %v2517_v2 }
 0x65b   : > { %v4253_v57 = vpop.f32.mrb[98].mxu1  ;;  %4310 = vmatprep.mubr.msk.f32.mxu0 %vm2960_vm2, %v2937_v18 }
 0x65c   : > { %v2940_v24 = vmul.f32 %v4253_v57, %v2532_v43  ;;  %v2852_v25 = vpop.f32.mrb[99].mxu1  ;;  %4311 = vmatmul.mubr.msk.f32.gmra.mrb[96].mxu0 %vm2960_vm2, %v2938_v52 }
 0x65d   : > { %v2939_v32 = vmul.f32 %v2852_v25, %v2527_v19 }
 0x65f   : > { %v4256_v16 = vpop.f32.mrb[100].mxu1  ;;  %4313 = vmatprep.mubr.msk.f32.mxu0 %vm2960_vm2, %v2939_v32 }
 0x660   : > { %v2942_v9 = vmul.f32 %v4256_v16, %v2542_v27  ;;  %v2862_v33 = vpop.f32.mrb[101].mxu1  ;;  %4314 = vmatmul.mubr.msk.f32.gmra.mrb[98].mxu0 %vm2960_vm2, %v2940_v24 }
 0x661   : > { %v2941_v4 = vmul.f32 %v2862_v33, %v2537_v53 }
 0x663   : > { %v4259_v5 = vpop.f32.mrb[102].mxu1  ;;  %4316 = vmatprep.mubr.msk.f32.mxu0 %vm2960_vm2, %v2941_v4 }
 0x664   : > { %v2944_v11 = vmul.f32 %v4259_v5, %v2552_v45  ;;  %v2872_v22 = vpop.f32.mrb[103].mxu1  ;;  %4317 = vmatmul.mubr.msk.f32.gmra.mrb[100].mxu0 %vm2960_vm2, %v2942_v9 }
 0x665   : > { %v2943_v51 = vmul.f32 %v2872_v22, %v2547_v44 }
 0x667   : > { %v4262_v15 = vpop.f32.mrb[104].mxu1  ;;  %4319 = vmatprep.mubr.msk.f32.mxu0 %vm2960_vm2, %v2943_v51 }
 0x668   : > { %v2946_v7 = vmul.f32 %v4262_v15, %v2562_v41  ;;  %v2882_v54 = vpop.f32.mrb[105].mxu1  ;;  %4320 = vmatmul.mubr.msk.f32.gmra.mrb[102].mxu0 %vm2960_vm2, %v2944_v11 }
 0x669   : > { %v2945_v6 = vmul.f32 %v2882_v54, %v2557_v49 }
 0x66b   : > { %v4265_v17 = vpop.f32.mrb[106].mxu1  ;;  %4322 = vmatprep.mubr.msk.f32.mxu0 %vm2960_vm2, %v2945_v6 }
 0x66c   : > { %v2948_v40 = vmul.f32 %v4265_v17, %v2572_v26  ;;  %v2892_v56 = vpop.f32.mrb[107].mxu1  ;;  %4323 = vmatmul.mubr.msk.f32.gmra.mrb[104].mxu0 %vm2960_vm2, %v2946_v7 }
 0x66d   : > { %v2947_v61 = vmul.f32 %v2892_v56, %v2567_v50 }
 0x66f   : > { %v4268_v21 = vpop.f32.mrb[108].mxu1  ;;  %4325 = vmatprep.mubr.msk.f32.mxu0 %vm2960_vm2, %v2947_v61 }
 0x670   : > { %v2950_v20 = vmul.f32 %v4268_v21, %v2582_v34  ;;  %v2902_v31 = vpop.f32.mrb[109].mxu1  ;;  %4326 = vmatmul.mubr.msk.f32.gmra.mrb[106].mxu0 %vm2960_vm2, %v2948_v40 }
 0x671   : > { %v2949_v48 = vmul.f32 %v2902_v31, %v2577_v23 }
 0x673   : > { %v4271_v3 = vpop.f32.mrb[110].mxu1  ;;  %4328 = vmatprep.mubr.msk.f32.mxu0 %vm2960_vm2, %v2949_v48 }
 0x674   : > { %v2952_v12 = vmul.f32 %v4271_v3, %v2592_v46  ;;  %v2912_v47 = vpop.f32.mrb[111].mxu1  ;;  %4329 = vmatmul.mubr.msk.f32.gmra.mrb[108].mxu0 %vm2960_vm2, %v2950_v20 }
 0x675   : > { %v2951_v58 = vmul.f32 %v2912_v47, %v2587_v39 }
 0x677   : > { %4331 = vmatprep.mubr.msk.f32.mxu0 %vm2960_vm2, %v2951_v58 }
 0x678   : > { %4332 = vmatmul.mubr.msk.f32.gmra.mrb[110].mxu0 %vm2960_vm2, %v2952_v12 }
 0x70f   : > { %v4288_v13 = vpop.f32.mrb[80].mxu0 }
 0x710   : > { %3283 = vst [vmem:[%s6565_s22 + $0x8] sm:$0xff] %v4288_v13  ;;  %v3123_v35 = vpop.f32.mrb[81].mxu0 }
 0x711   : > { %3282 = vst [vmem:[%s6565_s22] sm:$0xff] %v3123_v35 }
 0x713   : > { %v4291_v37 = vpop.f32.mrb[82].mxu0 }
 0x714   : > { %3285 = vst [vmem:[%s6565_s22 + $0x18] sm:$0xff] %v4291_v37  ;;  %v3133_v2 = vpop.f32.mrb[83].mxu0 }
 0x715   : > { %3284 = vst [vmem:[%s6565_s22 + $0x10] sm:$0xff] %v3133_v2 }
 0x717   : > { %v4294_v60 = vpop.f32.mrb[84].mxu0 }
 0x718   : > { %3287 = vst [vmem:[%s6565_s22 + $0x28] sm:$0xff] %v4294_v60  ;;  %v3143_v52 = vpop.f32.mrb[85].mxu0 }
 0x719   : > { %3286 = vst [vmem:[%s6565_s22 + $0x20] sm:$0xff] %v3143_v52 }
 0x71b   : > { %v4297_v62 = vpop.f32.mrb[86].mxu0 }
 0x71c   : > { %3289 = vst [vmem:[%s6565_s22 + $0x38] sm:$0xff] %v4297_v62  ;;  %v3153_v18 = vpop.f32.mrb[87].mxu0 }
 0x71d   : > { %3288 = vst [vmem:[%s6565_s22 + $0x30] sm:$0xff] %v3153_v18 }
 0x71f   : > { %v4300_v59 = vpop.f32.mrb[88].mxu0 }
 0x720   : > { %3291 = vst [vmem:[%s6565_s22 + $0x48] sm:$0xff] %v4300_v59  ;;  %v3163_v43 = vpop.f32.mrb[89].mxu0 }
 0x721   : > { %3290 = vst [vmem:[%s6565_s22 + $0x40] sm:$0xff] %v3163_v43 }
 0x723   : > { %v4303_v29 = vpop.f32.mrb[90].mxu0 }
 0x724   : > { %3293 = vst [vmem:[%s6565_s22 + $0x58] sm:$0xff] %v4303_v29  ;;  %v3173_v19 = vpop.f32.mrb[91].mxu0 }
 0x725   : > { %3292 = vst [vmem:[%s6565_s22 + $0x50] sm:$0xff] %v3173_v19 }
 0x727   : > { %v4306_v57 = vpop.f32.mrb[92].mxu0 }
 0x728   : > { %3295 = vst [vmem:[%s6565_s22 + $0x68] sm:$0xff] %v4306_v57  ;;  %v3183_v24 = vpop.f32.mrb[93].mxu0 }
 0x729   : > { %3294 = vst [vmem:[%s6565_s22 + $0x60] sm:$0xff] %v3183_v24 }
 0x72b   : > { %v4309_v25 = vpop.f32.mrb[94].mxu0 }
 0x72c   : > { %3297 = vst [vmem:[%s6565_s22 + $0x78] sm:$0xff] %v4309_v25  ;;  %v3193_v32 = vpop.f32.mrb[95].mxu0 }
 0x72d   : > { %3296 = vst [vmem:[%s6565_s22 + $0x70] sm:$0xff] %v3193_v32 }
 0x72f   : > { %v4312_v28 = vpop.f32.mrb[96].mxu0 }
 0x730   : > { %3299 = vst [vmem:[%s6565_s22 + $0x88] sm:$0xff] %v4312_v28  ;;  %v3203_v27 = vpop.f32.mrb[97].mxu0 }
 0x731   : > { %3298 = vst [vmem:[%s6565_s22 + $0x80] sm:$0xff] %v3203_v27 }
 0x733   : > { %v4315_v38 = vpop.f32.mrb[98].mxu0 }
 0x734   : > { %3301 = vst [vmem:[%s6565_s22 + $0x98] sm:$0xff] %v4315_v38  ;;  %v3213_v53 = vpop.f32.mrb[99].mxu0 }
 0x735   : > { %3300 = vst [vmem:[%s6565_s22 + $0x90] sm:$0xff] %v3213_v53 }
 0x737   : > { %v4318_v16 = vpop.f32.mrb[100].mxu0 }
 0x738   : > { %3303 = vst [vmem:[%s6565_s22 + $0xa8] sm:$0xff] %v4318_v16  ;;  %v3223_v9 = vpop.f32.mrb[101].mxu0 }
 0x739   : > { %3302 = vst [vmem:[%s6565_s22 + $0xa0] sm:$0xff] %v3223_v9 }
 0x73b   : > { %v4321_v33 = vpop.f32.mrb[102].mxu0 }
 0x73c   : > { %3305 = vst [vmem:[%s6565_s22 + $0xb8] sm:$0xff] %v4321_v33  ;;  %v3233_v4 = vpop.f32.mrb[103].mxu0 }
 0x73d   : > { %3304 = vst [vmem:[%s6565_s22 + $0xb0] sm:$0xff] %v3233_v4 }
 0x73f   : > { %v4324_v42 = vpop.f32.mrb[104].mxu0 }
 0x740   : > { %3307 = vst [vmem:[%s6565_s22 + $0xc8] sm:$0xff] %v4324_v42  ;;  %v3243_v45 = vpop.f32.mrb[105].mxu0 }
 0x741   : > { %3306 = vst [vmem:[%s6565_s22 + $0xc0] sm:$0xff] %v3243_v45 }
 0x743   : > { %v4327_v0 = vpop.f32.mrb[106].mxu0 }
 0x744   : > { %3309 = vst [vmem:[%s6565_s22 + $0xd8] sm:$0xff] %v4327_v0  ;;  %v3253_v44 = vpop.f32.mrb[107].mxu0 }
 0x745   : > { %3308 = vst [vmem:[%s6565_s22 + $0xd0] sm:$0xff] %v3253_v44 }
 0x747   : > { %v4330_v5 = vpop.f32.mrb[108].mxu0 }
 0x748   : > { %3311 = vst [vmem:[%s6565_s22 + $0xe8] sm:$0xff] %v4330_v5  ;;  %v3263_v11 = vpop.f32.mrb[109].mxu0 }
 0x749   : > { %3310 = vst [vmem:[%s6565_s22 + $0xe0] sm:$0xff] %v3263_v11 }
 0x74b   : > { %v4333_v22 = vpop.f32.mrb[110].mxu0 }
 0x74c   : > { %3313 = vst [vmem:[%s6565_s22 + $0xf8] sm:$0xff] %v4333_v22  ;;  %v3273_v51 = vpop.f32.mrb[111].mxu0 }
 0x74d   : > { %3312 = vst [vmem:[%s6565_s22 + $0xf0] sm:$0xff] %v3273_v51 }
 0x74e   : > { %5012 = shalt.err (!%p5009_p1)
}
 0x74f   : > { %s5013_s10 = scalar_lea.hbm %s6602_s20, 4096  ;;  %s5017_s18 = scalar_lea.hbm %s6719_s15, 8192 }
 0x750   : > { %p5014_p13 = scmp.ne.s32.totalorder %s6602_s20, %s5013_s10  ;;  %p5018_p4 = scmp.lt.u32.totalorder %s6602_s20, %s6719_s15 }
 0x751   : > { %p5019_p5 = scmp.lt.u32.totalorder %s5017_s18, %s5013_s10  ;;  %p5021_p11 = scmp.lt.u32.totalorder %s5013_s10, %s6602_s20 }
 0x752   : > { %p5015_p6 = pnand %p5014_p13, %p6720_p0 }
 0x753   : > { %p5020_p8 = por %p5019_p5, %p5018_p4 }
 0x754   : > { %p5016_p10 = pneg %p5015_p6 }
 0x755   : > { %p5022_p2 = por %p5021_p11, %p5020_p8 }
 0x757   : > { %p5023_p3 = pnand %p5022_p2, %p5016_p10 }
 0x759   : > { %5026 = shalt.err (!%p5023_p3)
}
 0x75a   : > { %s5077_s29 = smov 128   ;;  %s5078_s25 = smov 8  }
 0x75b   : > { %4532 = dma.vmem_to_hbm [thread:$0]  (%p6720_p0), %s6604_s21, 4096, %s6602_s20, %s3315_s17, %s5077_s29, %s5077_s29, %s5078_s25  }
 0x75c PF: > { %s6721_s19 = sld [smem:[#allocation12_spill]]  ;;  %s6722_s22 = sld [smem:[#allocation13_spill]] }
 0x75d   : > { %p6724_p9 = scmp.ge.s32.totalorder %s5069_s28, 2 }
 0x762   : > { %s3343_s30 = sand.u32 1, %s6721_s19   ;;  %p6723_p7 = scmp.ne.s32.totalorder %s6722_s22, 0 }
 0x763   : > { %s3344_s10 = scalar_lea.sflag [#allocation4], %s3343_s30 }
 0x764   : > { %p4546_p12 = pnand %p6724_p9, %p6723_p7 }
 0x766   : > { %5052 = dma.done.wait (!%p4546_p12), %s3344_s10, 4096  }
 0x767   : > { %5054 = vsyncadd (!%p4546_p12), %s3344_s10, 4294963200  ;;  %p27_p1 = scmp.ge.s32.totalorder %s5265_s13, 4   ;;  %s6725_s25 = smov %s5061_s26 }
 0x768   : > { %s6726_s26 = smov %s5065_s27  ;;  %s6727_s27 = smov %s5281_s24 }
 0x769   : > { %s6728_s28 = smov %s5265_s13  ;;  %29 = sbr.rel (!%p27_p1) target bundleno = 10 (0xa), region = 125 }
 0x770   :  { %3349 = vsyncpa [#allocation3], 1 }
 0x771   :  { %3351 = vsyncpa [#allocation3 + $0x1], 1 }
 0x772   :  { %3352 = vsyncpa [#allocation6], 1 }
 0x773   :  { %3353 = vsyncpa [#allocation4], 1 }
 0x774   :  { %3355 = vsyncpa [#allocation4 + $0x1], 1 }

</bundles_post_ra>
